<compile_context>
chip_gen: v5e
topology: v5e:2x2
jax: 0.10.0
libtpu: 0.0.40
codegen_flags: <defaults>
</compile_context>

<pallas_src>
import functools

import jax
import jax.numpy as jnp
from jax import lax
from jax.experimental import pallas as pl
from jax.experimental.pallas import tpu as pltpu


def _round_up(x, m):
    return (x + m - 1) // m * m


# ---------------------------------------------------------------------------
# One-time parameter packing: a single VMEM blob, sliced statically in-kernel.
# ---------------------------------------------------------------------------
def _pack_params(w1_eff, b1, w2, b2, w3, b3, wf, bf):
    """Pack all forward parameters into one sublane-aligned f32 blob.

    Row layout (width = H lanes, every segment starts on a multiple of 8 rows):
      [0, k1)              w1_eff                          (k1 x H)
      [r_b1]               b1                              (1  x H)
      [r_w2, +H)           w2                              (H  x H)
      [r_b2]               b2                              (1  x H)
      [r_w3f, +O)          (w3 @ wf).T                     (O  x H)   market NT matmul
      [r_w3f_ho, +H)       (w3 @ wf)                       (H  x O)   general NN matmul
      [r_bcol, +O)         b_out[o] broadcast over lanes   (O  x H)   read as [O, 1]
      [r_brow]             b_out as a row                  (1  x O)   read as [1, O]
    with b_out = b3 @ wf + bf  (conv3-bias folded through the fc layer).
    """
    k1, h = w1_eff.shape
    assert w2.shape == (h, h) and w3.shape == (h, h)
    o = wf.shape[1]
    assert o <= h, "output_size must be <= hidden_channels for this packing"

    w3f = w3 @ wf                      # [H, O]
    b_out = b3 @ wf + bf               # [1, O]

    r_b1 = _round_up(k1, 8)
    r_w2 = r_b1 + 8
    r_b2 = r_w2 + _round_up(h, 8)
    r_w3f = r_b2 + 8
    r_w3f_ho = r_w3f + _round_up(o, 8)
    r_bcol = r_w3f_ho + _round_up(h, 8)
    r_brow = r_bcol + _round_up(o, 8)
    rows = r_brow + 8

    blob = jnp.zeros((rows, h), jnp.float32)
    blob = blob.at[0:k1, :].set(w1_eff.astype(jnp.float32))
    blob = blob.at[r_b1, :].set(b1.reshape(-1).astype(jnp.float32))
    blob = blob.at[r_w2:r_w2 + h, :].set(w2.astype(jnp.float32))
    blob = blob.at[r_b2, :].set(b2.reshape(-1).astype(jnp.float32))
    blob = blob.at[r_w3f:r_w3f + o, :].set(jnp.transpose(w3f).astype(jnp.float32))
    blob = blob.at[r_w3f_ho:r_w3f_ho + h, 0:o].set(w3f.astype(jnp.float32))
    blob = blob.at[r_bcol:r_bcol + o, :].set(
        jnp.broadcast_to(jnp.transpose(b_out), (o, h)).astype(jnp.float32))
    blob = blob.at[r_brow, 0:o].set(b_out.reshape(-1).astype(jnp.float32))

    offs = dict(k1=k1, h=h, o=o, r_b1=r_b1, r_w2=r_w2, r_b2=r_b2,
                r_w3f=r_w3f, r_w3f_ho=r_w3f_ho, r_bcol=r_bcol, r_brow=r_brow)
    return blob, offs


def prepare_market_params(params, num_nodes):
    """Fast-path prep (fully-connected market graph only).

    Folds the node mean of conv1 into W1 by replicating it over the flattened
    (node, feature) axis and scaling by 1/N -> kernel input is x.reshape(B, N*F)
    and the node pooling happens on the MXU (K = N*F) instead of the XLU.
    """
    f = params["w1"].shape[0]
    w1_rep = jnp.tile(params["w1"], (num_nodes, 1)) / float(num_nodes)   # [N*F, H]
    blob, offs = _pack_params(w1_rep, params["b1"], params["w2"], params["b2"],
                              params["w3"], params["b3"], params["wf"], params["bf"])
    return {"blob": blob, "offs": offs, "num_nodes": num_nodes, "f": f}


def prepare_general_params(params):
    blob, offs = _pack_params(params["w1"], params["b1"], params["w2"], params["b2"],
                              params["w3"], params["b3"], params["wf"], params["bf"])
    return {"blob": blob, "offs": offs, "f": params["w1"].shape[0]}


# ---------------------------------------------------------------------------
# Fast path kernel: fully-connected market graph, batched over a 1-D grid.
# ---------------------------------------------------------------------------
def _market_kernel(x_ref, p_ref, out_ref, *, offs):
    """One batch tile of the collapsed market-graph forward.

    x_ref:   [TB, N*F] f32  (flattened node features; node mean folded into W1)
    p_ref:   packed parameter blob (constant block across the grid)
    out_ref: [O, TB]  f32   (lane-dense: batch in the lane dimension)
    """
    k1, h, o = offs["k1"], offs["h"], offs["o"]
    x = x_ref[...]

    # conv1 (node mean folded into the replicated/scaled W1) + bias + ReLU.
    # dropout == identity in eval mode.
    z = jnp.dot(x, p_ref[0:k1, :], preferred_element_type=jnp.float32)
    z = jnp.maximum(z + p_ref[offs["r_b1"]:offs["r_b1"] + 1, :], 0.0)

    # conv2 + ReLU (all node rows identical after conv1 => A_norm @ h == h).
    z = jnp.dot(z, p_ref[offs["r_w2"]:offs["r_w2"] + h, :],
                preferred_element_type=jnp.float32)
    z = jnp.maximum(z + p_ref[offs["r_b2"]:offs["r_b2"] + 1, :], 0.0)

    # conv3 + mean-pool + fc folded into one [O, H] projection.  NT matmul
    # ([O,H] x [TB,H]^T) keeps the output lane-dense without materializing z.T.
    w3f_t = p_ref[offs["r_w3f"]:offs["r_w3f"] + o, :]                 # [O, H]
    out = lax.dot_general(w3f_t, z, (((1,), (1,)), ((), ())),
                          preferred_element_type=jnp.float32)          # [O, TB]
    out_ref[...] = out + p_ref[offs["r_bcol"]:offs["r_bcol"] + o, 0:1]


def crypto_gnn_forward_market(x_batched, prepared, *, block_b=2048):
    """Batched forward for the fully-connected market graph.

    x_batched: [B, N, F] f32.  Returns [B, O] f32.
    Valid only for the create_market_graph topology (gate with
    is_uniform_market_adjacency before using this path).
    """
    blob, offs = prepared["blob"], prepared["offs"]
    b, n, f = x_batched.shape
    assert n == prepared["num_nodes"] and f == prepared["f"]
    o = offs["o"]
    nf = n * f

    # Batch tile: multiple of 8 sublanes; multiple of 128 lanes when tiled so the
    # lane-dense [O, TB] output block satisfies the (8,128) constraint.
    if b <= block_b:
        tb = _round_up(b, 8)
    else:
        tb = _round_up(block_b, 128)
    b_pad = _round_up(b, tb)

    x2d = x_batched.reshape(b, nf)                 # free: contiguous reshape
    if b_pad != b:
        x2d = jnp.pad(x2d, ((0, b_pad - b), (0, 0)))

    # VMEM per step: x tile (<=2048x128 lanes f32 ~1 MiB, double-buffered) +
    # ~64 KiB blob -> far below the 32 MiB scoped default / v7x 64 MiB ceiling,
    # so no explicit vmem_limit_bytes needed.
    out = pl.pallas_call(
        functools.partial(_market_kernel, offs=offs),
        out_shape=jax.ShapeDtypeStruct((o, b_pad), jnp.float32),
        grid=(b_pad // tb,),
        in_specs=[
            pl.BlockSpec((tb, nf), lambda i: (i, 0)),      # batch tile of features
            pl.BlockSpec(blob.shape, lambda i: (0, 0)),    # params: one constant DMA
        ],
        out_specs=pl.BlockSpec((o, tb), lambda i: (0, i)),  # lane-dense output slab
        compiler_params=pltpu.CompilerParams(
            dimension_semantics=("parallel",)),             # v7x: 2 TCs split the grid
    )(x2d, blob)

    return out[:, :b].T                                     # layout plumbing -> [B, O]


# ---------------------------------------------------------------------------
# General path kernel: arbitrary graphs, batched over a grid of G graphs.
# ---------------------------------------------------------------------------
def _general_kernel(a_ref, am_ref, x_ref, p_ref, out_ref, *, offs):
    """GCN forward for one graph with a dense normalized adjacency."""
    k1, h, o = offs["k1"], offs["h"], offs["o"]
    a = a_ref[0]                                            # [N, N]
    x = x_ref[0]                                            # [N, F]

    # conv1: aggregate first (F < H keeps the intermediate at [N, F]) + ReLU.
    z = jnp.dot(jnp.dot(a, x, preferred_element_type=jnp.float32),
                p_ref[0:k1, :], preferred_element_type=jnp.float32)
    z = jnp.maximum(z + p_ref[offs["r_b1"]:offs["r_b1"] + 1, :], 0.0)

    # conv2 + ReLU.
    z = jnp.dot(a, jnp.dot(z, p_ref[offs["r_w2"]:offs["r_w2"] + h, :],
                           preferred_element_type=jnp.float32),
                preferred_element_type=jnp.float32)
    z = jnp.maximum(z + p_ref[offs["r_b2"]:offs["r_b2"] + 1, :], 0.0)

    # conv3 + mean-pool + fc folded:
    #   mean_rows(A @ (z W3) + b3) @ Wf + bf
    # = (mean_rows(A) @ z) @ (W3 Wf) + (b3 Wf + bf),   mean_rows(A) precomputed.
    pooled = jnp.dot(am_ref[0], z, preferred_element_type=jnp.float32)   # [1, H]
    out = jnp.dot(pooled, p_ref[offs["r_w3f_ho"]:offs["r_w3f_ho"] + h, 0:o],
                  preferred_element_type=jnp.float32)                    # [1, O]
    out_ref[0] = out + p_ref[offs["r_brow"]:offs["r_brow"] + 1, 0:o]


def crypto_gnn_forward_general(x_stack, a_stack, prepared, am_stack=None):
    """Batched forward over G independent graphs with arbitrary topology.

    x_stack: [G, N, F], a_stack: [G, N, N] normalized adjacencies (precompute
    once per topology with build_normalized_adjacency).  Returns [G, O] f32.
    """
    blob, offs = prepared["blob"], prepared["offs"]
    g, n, f = x_stack.shape
    assert a_stack.shape == (g, n, n) and f == offs["k1"]
    o = offs["o"]
    if am_stack is None:
        # Per-topology constant; ideally precomputed once alongside a_stack.
        am_stack = jnp.mean(a_stack, axis=1, keepdims=True)              # [G, 1, N]

    out = pl.pallas_call(
        functools.partial(_general_kernel, offs=offs),
        out_shape=jax.ShapeDtypeStruct((g, 1, o), jnp.float32),
        grid=(g,),
        in_specs=[
            pl.BlockSpec((1, n, n), lambda i: (i, 0, 0)),   # A_norm[g]
            pl.BlockSpec((1, 1, n), lambda i: (i, 0, 0)),   # mean_rows(A_norm[g])
            pl.BlockSpec((1, n, f), lambda i: (i, 0, 0)),   # X[g]
            pl.BlockSpec(blob.shape, lambda i: (0, 0)),     # params: one constant DMA
        ],
        out_specs=pl.BlockSpec((1, 1, o), lambda i: (i, 0, 0)),
        compiler_params=pltpu.CompilerParams(
            dimension_semantics=("parallel",)),
    )(a_stack, am_stack, x_stack, blob)

    return out[:, 0, :]


# ---------------------------------------------------------------------------
# Graph / parameter helpers (one-time, outside the hot path).
# ---------------------------------------------------------------------------
def init_params(key, node_features=10, hidden_channels=64, output_size=1):
    ks = jax.random.split(key, 8)

    def glorot(k, shape):
        fan_in, fan_out = shape
        lim = jnp.sqrt(6.0 / (fan_in + fan_out))
        return jax.random.uniform(k, shape, jnp.float32, -lim, lim)

    def bias(k, n):
        return jax.random.uniform(k, (1, n), jnp.float32, -0.1, 0.1)

    return {
        "w1": glorot(ks[0], (node_features, hidden_channels)),
        "b1": bias(ks[1], hidden_channels),
        "w2": glorot(ks[2], (hidden_channels, hidden_channels)),
        "b2": bias(ks[3], hidden_channels),
        "w3": glorot(ks[4], (hidden_channels, hidden_channels)),
        "b3": bias(ks[5], hidden_channels),
        "wf": glorot(ks[6], (hidden_channels, output_size)),
        "bf": bias(ks[7], output_size),
    }


def build_normalized_adjacency(edge_index, num_nodes):
    """D^{-1/2} (A + I) D^{-1/2}.  Run ONCE per graph topology, not per forward."""
    row, col = edge_index[0], edge_index[1]
    adj = jnp.zeros((num_nodes, num_nodes), jnp.float32).at[col, row].add(1.0)
    adj = adj + jnp.eye(num_nodes, dtype=jnp.float32)
    deg = jnp.sum(adj, axis=1)
    d_inv_sqrt = jnp.where(deg > 0, lax.rsqrt(deg), 0.0)
    return d_inv_sqrt[:, None] * adj * d_inv_sqrt[None, :]


def make_market_edge_index(num_nodes):
    """Mirror of CryptoGNN.create_market_graph: fully connected graph (i != j)."""
    edges = [[i, j] for i in range(num_nodes) for j in range(num_nodes) if i != j]
    return jnp.asarray(edges, dtype=jnp.int32).T            # [2, E]


def is_uniform_market_adjacency(a_norm, tol=1e-6):
    """True iff a_norm == ones/N, i.e. the collapsed fast path is valid."""
    n = a_norm.shape[0]
    return bool(jnp.all(jnp.abs(a_norm - 1.0 / n) <= tol))


def crypto_gnn_reference(x, a_norm, params):
    """Pure-JAX mirror of the PyTorch module (eval mode), high-precision matmuls."""
    dot = functools.partial(jnp.dot, precision=jax.lax.Precision.HIGHEST)
    h = dot(a_norm, dot(x, params["w1"])) + params["b1"]
    h = jnp.maximum(h, 0.0)
    h = dot(a_norm, dot(h, params["w2"])) + params["b2"]
    h = jnp.maximum(h, 0.0)
    h = dot(a_norm, dot(h, params["w3"])) + params["b3"]
    pooled = jnp.mean(h, axis=0, keepdims=True)
    return dot(pooled, params["wf"]) + params["bf"]


if __name__ == "__main__":
    key = jax.random.PRNGKey(0)
    k_x, k_p = jax.random.split(key)

    num_nodes, node_features, hidden, out_size = 8, 10, 64, 1
    batch = 4096   # forward is dispatch/DMA-bound: amortize over a large batch

    params = init_params(k_p, node_features, hidden, out_size)

    edge_index = make_market_edge_index(num_nodes)
    a_norm = build_normalized_adjacency(edge_index, num_nodes)

    xs = jax.random.normal(k_x, (batch, num_nodes, node_features), jnp.float32)

    # --- fast market path: gate on the actual topology, not the call site ---
    assert is_uniform_market_adjacency(a_norm)
    market_params = prepare_market_params(params, num_nodes)
    fwd_market = jax.jit(functools.partial(crypto_gnn_forward_market,
                                           prepared=market_params))
    out_fast = jax.block_until_ready(fwd_market(xs))
    assert out_fast.shape == (batch, out_size)

    # small ragged batch exercises the padding / single-tile path
    out_small = jax.block_until_ready(fwd_market(xs[:4]))
    assert out_small.shape == (4, out_size)

    # --- general path: G graphs with (precomputed) normalized adjacency ---
    g = 8
    general_params = prepare_general_params(params)
    a_stack = jnp.tile(a_norm[None], (g, 1, 1))
    out_gen = jax.block_until_ready(
        crypto_gnn_forward_general(xs[:g], a_stack, general_params))
    assert out_gen.shape == (g, out_size)

    # --- correctness vs a pure-JAX mirror of the PyTorch module (eval mode) ---
    ref_fn = jax.jit(jax.vmap(lambda xi: crypto_gnn_reference(xi, a_norm, params)[0]))
    ref = jax.block_until_ready(ref_fn(xs))
    assert jnp.allclose(out_fast, ref, atol=1e-3, rtol=1e-3), (out_fast[:4], ref[:4])
    assert jnp.allclose(out_small, ref[:4], atol=1e-3, rtol=1e-3), (out_small, ref[:4])
    assert jnp.allclose(out_gen, ref[:g], atol=1e-3, rtol=1e-3), (out_gen, ref[:g])

    print("KERNEL_OK")
</pallas_src>

<mosaic_0001>
module attributes {stable_mosaic.version = 11 : i64} {
  func.func @_market_kernel(%arg0: i32, %arg1: memref<2048x80xf32, #tpu.memory_space<vmem>>, %arg2: memref<248x64xf32, #tpu.memory_space<vmem>>, %arg3: memref<1x2048xf32, #tpu.memory_space<vmem>>) attributes {dimension_semantics = [#tpu.dimension_semantics<parallel>], iteration_bounds = array<i64: 2>, scalar_prefetch = 0 : i64, scratch_operands = 0 : i64, tpu.core_type = #tpu.core_type<tc>, window_params = [{transform_indices = @transform_0, window_bounds = array<i64: 2048, 80>}, {pipeline_mode = #tpu.pipeline_mode<synchronous>, transform_indices = @transform_1, window_bounds = array<i64: 248, 64>}, {transform_indices = @transform_2, window_bounds = array<i64: 1, 2048>}]} {
    %c0 = arith.constant 0 : index
    %c0_0 = arith.constant 0 : index
    %0 = vector.load %arg1[%c0, %c0_0] : memref<2048x80xf32, #tpu.memory_space<vmem>>, vector<2048x80xf32>
    %c0_1 = arith.constant 0 : index
    %c0_2 = arith.constant 0 : index
    %1 = vector.load %arg2[%c0_1, %c0_2] : memref<248x64xf32, #tpu.memory_space<vmem>>, vector<80x64xf32>
    %cst = arith.constant dense<0.000000e+00> : vector<2048x64xf32>
    %2 = tpu.matmul %0, %1, %cst {dimension_numbers = #tpu.dot_dimension_numbers<[1], [0], [0], [1], [0, 0, 1, 1], [], []>} : vector<2048x80xf32>, vector<80x64xf32>, vector<2048x64xf32> -> vector<2048x64xf32>
    %c80 = arith.constant 80 : index
    %c0_3 = arith.constant 0 : index
    %3 = vector.load %arg2[%c80, %c0_3] : memref<248x64xf32, #tpu.memory_space<vmem>>, vector<1x64xf32>
    %4 = vector.broadcast %3 : vector<1x64xf32> to vector<2048x64xf32>
    %5 = arith.addf %2, %4 : vector<2048x64xf32>
    %cst_4 = arith.constant 0.000000e+00 : f32
    %6 = vector.broadcast %cst_4 : f32 to vector<2048x64xf32>
    %7 = arith.maximumf %5, %6 : vector<2048x64xf32>
    %c88 = arith.constant 88 : index
    %c0_5 = arith.constant 0 : index
    %8 = vector.load %arg2[%c88, %c0_5] : memref<248x64xf32, #tpu.memory_space<vmem>>, vector<64x64xf32>
    %cst_6 = arith.constant dense<0.000000e+00> : vector<2048x64xf32>
    %9 = tpu.matmul %7, %8, %cst_6 {dimension_numbers = #tpu.dot_dimension_numbers<[1], [0], [0], [1], [0, 0, 1, 1], [], []>} : vector<2048x64xf32>, vector<64x64xf32>, vector<2048x64xf32> -> vector<2048x64xf32>
    %c152 = arith.constant 152 : index
    %c0_7 = arith.constant 0 : index
    %10 = vector.load %arg2[%c152, %c0_7] : memref<248x64xf32, #tpu.memory_space<vmem>>, vector<1x64xf32>
    %11 = vector.broadcast %10 : vector<1x64xf32> to vector<2048x64xf32>
    %12 = arith.addf %9, %11 : vector<2048x64xf32>
    %cst_8 = arith.constant 0.000000e+00 : f32
    %13 = vector.broadcast %cst_8 : f32 to vector<2048x64xf32>
    %14 = arith.maximumf %12, %13 : vector<2048x64xf32>
    %c160 = arith.constant 160 : index
    %c0_9 = arith.constant 0 : index
    %15 = vector.load %arg2[%c160, %c0_9] : memref<248x64xf32, #tpu.memory_space<vmem>>, vector<1x64xf32>
    %cst_10 = arith.constant dense<0.000000e+00> : vector<1x2048xf32>
    %16 = tpu.matmul %15, %14, %cst_10 {dimension_numbers = #tpu.dot_dimension_numbers<[1], [1], [0], [0], [0, 0, 1, 0], [], []>} : vector<1x64xf32>, vector<2048x64xf32>, vector<1x2048xf32> -> vector<1x2048xf32>
    %c232 = arith.constant 232 : index
    %c0_11 = arith.constant 0 : index
    %17 = vector.load %arg2[%c232, %c0_11] : memref<248x64xf32, #tpu.memory_space<vmem>>, vector<1x1xf32>
    %18 = vector.broadcast %17 : vector<1x1xf32> to vector<1x2048xf32>
    %19 = arith.addf %16, %18 : vector<1x2048xf32>
    %c0_12 = arith.constant 0 : index
    %c0_13 = arith.constant 0 : index
    %20 = vector.load %arg3[%c0_12, %c0_13] : memref<1x2048xf32, #tpu.memory_space<vmem>>, vector<1x2048xf32>
    tpu.vector_store %arg3[%c0_12, %c0_13], %19 {strides = array<i32>} : memref<1x2048xf32, #tpu.memory_space<vmem>>, vector<1x2048xf32>,
    return
  }
  func.func @transform_0(%arg0: i32) -> (i32, i32) {
    %c0_i32 = arith.constant 0 : i32
    %c0_i32_0 = arith.constant 0 : i32
    return %arg0, %c0_i32 : i32, i32
  }
  func.func @transform_1(%arg0: i32) -> (i32, i32) {
    %c0_i32 = arith.constant 0 : i32
    %c0_i32_0 = arith.constant 0 : i32
    %c0_i32_1 = arith.constant 0 : i32
    return %c0_i32, %c0_i32_0 : i32, i32
  }
  func.func @transform_2(%arg0: i32) -> (i32, i32) {
    %c0_i32 = arith.constant 0 : i32
    %c0_i32_0 = arith.constant 0 : i32
    return %c0_i32, %arg0 : i32, i32
  }
}

</mosaic_0001>

<bundles_post_ra>
// kernel: crypto_gnn_forward_market.1
= control target key start
LH: loop header
LB: loop body
LE: loop exit
PB: predicated region body
PF: predicated region fallthrough
CT: control target
= control target key end

     0   :  { %7 = vsyncpa [#allocation3], 0  ;;  %s8886_s0 = inlined_call_operand.vmem [shape: f32[4096,80], index: 0, kind: input, shape index: {}]   ;;  %s8887_s1 = inlined_call_operand.vmem [shape: f32[248,64], index: 1, kind: input, shape index: {}]   ;;  %s8888_s2 = inlined_call_operand.hbm [shape: f32[1,4096], index: 2, kind: output, shape index: {}]  }
   0x1   :  { %9 = vsyncpa [#allocation3 + $0x1], 0  ;;  %s6217_s9 = smov 0   ;;  %s6219_s10 = smov 0  }
   0x2   :  { %s6221_s11 = smov 0   ;;  %s6223_s12 = smov 0  }
   0x3 LB: > { %s6238_s13 = sadd.s32 4294967295, %s6199_s12   ;;  %s5271_s14 = sadd.s32 4294967294, %s6199_s12   ;;  %s6199_s12 = sphi %s6223_s12, %s9072_s12   ;;  %s6195_s11 = sphi %s6221_s11, %s9071_s11   ;;  %s6191_s10 = sphi %s6219_s10, %s9070_s10   ;;  %s6187_s9 = sphi %s6217_s9, %s9069_s9  }
   0x4   : > { %s6242_s15 = sadd.s32 1, %s6199_s12   ;;  %s69_s16 = sadd.s32 1, %s6195_s11 }
   0x5   : > { %s66_s17 = ssub.s32 %s6199_s12, %s6242_s15  ;;  %p79_p0 = scmp.ne.s32.totalorder %s6195_s11, %s6191_s10 }
   0x6   : > { %p67_p1 = scmp.eq.s32.totalorder %s66_s17, 0  ;;  %p80_p2 = scmp.eq.s32.totalorder %s6238_s13, 1 }
   0x7   : > { %p85_p3 = scmp.ne.s32.totalorder %s6191_s10, %s6187_s9  ;;  %p86_p4 = scmp.eq.s32.totalorder %s5271_s14, 1 }
   0x8   : > { %s6253_s18 = scalar_select %p67_p1, %s6195_s11, %s69_s16  }
   0x9   : > { %p6255_p5 = por %p80_p2, %p79_p0  ;;  %p6259_p6 = por %p86_p4, %p85_p3 }
   0xa   : > { %p5274_p7 = scmp.ge.s32.totalorder %s6199_s12, 1  ;;  %p116_p8 = scmp.lt.s32.totalorder %s6199_s12, 3 }
   0xc   : > { %p117_p9 = pnand %p5274_p7, %p116_p8 }
   0xe   : > { %120 = sbr.rel (%p117_p9) target bundleno = 2743 (0xab7), region = 28 }
  0x13   : > { %v410_v0 = vld [vmem:[%s8887_s1 + $0x48] sm:$0xff]  ;;  %v409_v1 = vld [vmem:[%s8887_s1 + $0x40] sm:$0xff]  ;;  %s5276_s25 = sshll.u32 %s6238_s13, 8  ;;  %v408_v2 = vld [vmem:[%s8887_s1 + $0x38] sm:$0xff]  ;;  %vm413_vm0 = vcmask 654336   ;;  %vm2233_vm1 = vcmask 523264  }
  0x14   : > { %1188 = vmatpush.msra.mxu0 %v410_v0  ;;  %6066 = vmatpush.msra.mxu2 %v410_v0  ;;  %p139_p10 = scmp.lt.s32.totalorder %s5276_s25, 511  ;;  %v407_v3 = vld [vmem:[%s8887_s1 + $0x30] sm:$0xff]  ;;  %v406_v4 = vld [vmem:[%s8887_s1 + $0x28] sm:$0xff]  ;;  %v405_v5 = vld [vmem:[%s8887_s1 + $0x20] sm:$0xff]  ;;  %s135_s6 = sand.u32 1, %s6191_s10   ;;  %vm5173_vm2 = vcmask 1042434  }
  0x15   : > { %v404_v6 = vld [vmem:[%s8887_s1 + $0x18] sm:$0xff]  ;;  %v403_v7 = vld [vmem:[%s8887_s1 + $0x10] sm:$0xff]  ;;  %v402_v8 = vld [vmem:[%s8887_s1 + $0x8] sm:$0xff]  ;;  %vm5171_vm3 = vcmask 1040384   ;;  %vm5177_vm4 = vcmask 1044484   ;;  %vm5179_vm5 = vcmask 1046534  }
  0x16   : > { %1189 = vmatpush.msra.mxu0 %v409_v1  ;;  %6067 = vmatpush.msra.mxu2 %v409_v1  ;;  %s9074_s25 = smov (!%p139_p10, %s5276_s25), 511  ;;  %v401_v9 = vld [vmem:[%s8887_s1] sm:$0xff]  ;;  %v2230_v22 = vld [vmem:[%s8887_s1 + $0x90] sm:$0xff]  ;;  %v2229_v24 = vld [vmem:[%s8887_s1 + $0x88] sm:$0xff]  ;;  %s5275_s7 = sshll.u32 %s135_s6, 4  ;;  %vm5175_vm6 = vcmask 1041408  }
  0x17   : > { %s5277_s8 = sshll.u32 %s9074_s25, 3  ;;  %3010 = vmatpush.msra.mxu1 %v2230_v22  ;;  %v2228_v25 = vld [vmem:[%s8887_s1 + $0x80] sm:$0xff]  ;;  %6076 = vmatpush.msra.mxu3 %v2230_v22  ;;  %v2227_v27 = vld [vmem:[%s8887_s1 + $0x78] sm:$0xff]  ;;  %v2226_v28 = vld [vmem:[%s8887_s1 + $0x70] sm:$0xff]  ;;  %vm5181_vm7 = vcmask 1045508   ;;  %vm5183_vm8 = vcmask 1043456  }
  0x18   : > { %1190 = vmatpush.msra.mxu0 %v408_v2  ;;  %6068 = vmatpush.msra.mxu2 %v408_v2  ;;  %s6296_s24 = scalar_lea.vmem %s8886_s0, %s5277_s8  ;;  %v2225_v30 = vld [vmem:[%s8887_s1 + $0x68] sm:$0xff]  ;;  %v2224_v32 = vld [vmem:[%s8887_s1 + $0x60] sm:$0xff]  ;;  %v2223_v33 = vld [vmem:[%s8887_s1 + $0x58] sm:$0xff]  ;;  %s8752_s8 = scalar_lea.vmem [#allocation2], %s5275_s7 }
  0x19   : > { %v145_v10 = vld [vmem:[%s6296_s24] sm:$0xff]  ;;  %v146_v11 = vld [vmem:[%s6296_s24 + $0x8] sm:$0xff]  ;;  %v147_v12 = vld [vmem:[%s6296_s24 + $0x10] sm:$0xff]  ;;  %3011 = vmatpush.msra.mxu1 %v2229_v24  ;;  %6077 = vmatpush.msra.mxu3 %v2229_v24  ;;  %s6063_s14 = sshll.u32 %s6238_s13, 4  ;;  %s5209_s13 = sshll.u32 %s8752_s8, 4  ;;  %s5210_s13 = int_to_ptr.vmem [resolvable:$true] %s5209_s13 }
  0x1a   : > { %1191 = vmatpush.msra.mxu0 %v407_v3  ;;  %6069 = vmatpush.msra.mxu2 %v407_v3  ;;  %v148_v13 = vld [vmem:[%s6296_s24 + $0x18] sm:$0xff]  ;;  %v149_v14 = vld [vmem:[%s6296_s24 + $0x20] sm:$0xff]  ;;  %v150_v15 = vld [vmem:[%s6296_s24 + $0x28] sm:$0xff]  ;;  %s5207_s17 = scalar_lea.hbm %s8888_s2, %s6063_s14  ;;  %s5197_s22 = scalar_lea.sflag [#allocation3], %s135_s6 }
  0x1b   : > { %v151_v16 = vld [vmem:[%s6296_s24 + $0x30] sm:$0xff]  ;;  %v152_v17 = vld [vmem:[%s6296_s24 + $0x38] sm:$0xff]  ;;  %v153_v18 = vld [vmem:[%s6296_s24 + $0x40] sm:$0xff]  ;;  %3012 = vmatpush.msra.mxu1 %v2228_v25  ;;  %6078 = vmatpush.msra.mxu3 %v2228_v25  ;;  %s5211_s21 = sshll.u32 %s5207_s17, 4  ;;  %s6157_s28 = scalar_lea.hbm %s8888_s2, 32  ;;  %s5212_s21 = int_to_ptr.hbm [resolvable:$true] %s5211_s21 }
  0x1c   : > { %1192 = vmatpush.msra.mxu0 %v406_v4  ;;  %6070 = vmatpush.msra.mxu2 %v406_v4  ;;  %v154_v19 = vld [vmem:[%s6296_s24 + $0x48] sm:$0xff]  ;;  %v303_v20 = vld [vmem:[%s6296_s24 + $0x4f0] sm:$0xff]  ;;  %v304_v23 = vld [vmem:[%s6296_s24 + $0x4f8] sm:$0xff]  ;;  %s6151_s23 = sshra.s32 %s5212_s21, 4  ;;  %s6152_s23 = int_to_ptr.hbm [resolvable:$true] %s6151_s23 }
  0x1d   : > { %v155_v21 = vld [vmem:[%s6296_s24 + $0x50] sm:$0xff]  ;;  %v156_v26 = vld [vmem:[%s6296_s24 + $0x58] sm:$0xff]  ;;  %v305_v29 = vld [vmem:[%s6296_s24 + $0x500] sm:$0xff]  ;;  %3013 = vmatpush.msra.mxu1 %v2227_v27  ;;  %6079 = vmatpush.msra.mxu3 %v2227_v27  ;;  %s6153_s25 = scalar_lea.hbm %s6152_s23, 16  ;;  %p6158_p0 = scmp.lt.s32.totalorder %s6152_s23, %s8888_s2 }
  0x1e   : > { %1193 = vmatpush.msra.mxu0 %v405_v5  ;;  %6071 = vmatpush.msra.mxu2 %v405_v5  ;;  %v157_v31 = vld [vmem:[%s6296_s24 + $0x60] sm:$0xff]  ;;  %v306_v34 = vld [vmem:[%s6296_s24 + $0x508] sm:$0xff]  ;;  %v307_v36 = vld [vmem:[%s6296_s24 + $0x510] sm:$0xff]  ;;  %p6154_p11 = scmp.ne.s32.totalorder %s6152_s23, %s6153_s25  ;;  %p6159_p1 = scmp.lt.s32.totalorder %s6157_s28, %s6153_s25 }
  0x1f   : > { %3014 = vmatpush.msra.mxu1 %v2226_v28  ;;  %6080 = vmatpush.msra.mxu3 %v2226_v28  ;;  %v158_v35 = vld [vmem:[%s6296_s24 + $0x68] sm:$0xff]  ;;  %v159_v37 = vld [vmem:[%s6296_s24 + $0x70] sm:$0xff]  ;;  %v308_v38 = vld [vmem:[%s6296_s24 + $0x518] sm:$0xff] }
  0x20   : > { %1194 = vmatpush.msra.mxu0 %v404_v6  ;;  %6072 = vmatpush.msra.mxu2 %v404_v6  ;;  %v160_v39 = vld [vmem:[%s6296_s24 + $0x78] sm:$0xff]  ;;  %v6372_v40 = vld [vmem:[%s8887_s1 + $0x50] ss:$0 sm:$0xff]  ;;  %v309_v41 = vld [vmem:[%s6296_s24 + $0x520] sm:$0xff]  ;;  %p6155_p12 = pnand %p6154_p11, %p6255_p5  ;;  %p6160_p2 = por %p6159_p1, %p6158_p0 }
  0x21   : > { %3015 = vmatpush.msra.mxu1 %v2225_v30  ;;  %6081 = vmatpush.msra.mxu3 %v2225_v30  ;;  %v161_v43 = vld [vmem:[%s6296_s24 + $0x80] sm:$0xff]  ;;  %v310_v46 = vld [vmem:[%s6296_s24 + $0x528] sm:$0xff]  ;;  %v311_v51 = vld [vmem:[%s6296_s24 + $0x530] sm:$0xff] }
  0x22   : > { %1195 = vmatpush.msra.mxu0 %v403_v7  ;;  %6073 = vmatpush.msra.mxu2 %v403_v7  ;;  %v162_v48 = vld [vmem:[%s6296_s24 + $0x88] sm:$0xff]  ;;  %v163_v53 = vld [vmem:[%s6296_s24 + $0x90] sm:$0xff]  ;;  %v312_v56 = vld [vmem:[%s6296_s24 + $0x538] sm:$0xff]  ;;  %p6156_p13 = pneg %p6155_p12 }
  0x23   : > { %3016 = vmatpush.msra.mxu1 %v2224_v32  ;;  %6082 = vmatpush.msra.mxu3 %v2224_v32  ;;  %v164_v58 = vld [vmem:[%s6296_s24 + $0x98] sm:$0xff]  ;;  %v313_v61 = vld [vmem:[%s6296_s24 + $0x540] sm:$0xff]  ;;  %v314_v2 = vld [vmem:[%s6296_s24 + $0x548] sm:$0xff] }
  0x24   : > { %1196 = vmatpush.msra.mxu0 %v402_v8  ;;  %6074 = vmatpush.msra.mxu2 %v402_v8  ;;  %v165_v63 = vld [vmem:[%s6296_s24 + $0xa0] sm:$0xff]  ;;  %v166_v4 = vld [vmem:[%s6296_s24 + $0xa8] sm:$0xff]  ;;  %v315_v7 = vld [vmem:[%s6296_s24 + $0x550] sm:$0xff]  ;;  %p6161_p3 = pnand %p6160_p2, %p6156_p13 }
  0x25   : > { %3017 = vmatpush.msra.mxu1 %v2223_v33  ;;  %6083 = vmatpush.msra.mxu3 %v2223_v33  ;;  %v318_v22 = vld [vmem:[%s6296_s24 + $0x568] sm:$0xff]  ;;  %v319_v27 = vld [vmem:[%s6296_s24 + $0x570] sm:$0xff]  ;;  %v320_v32 = vld [vmem:[%s6296_s24 + $0x578] sm:$0xff] }
  0x26   : > { %1197 = vmatpush.msra.mxu0 %v401_v9  ;;  %6075 = vmatpush.msra.mxu2 %v401_v9  ;;  %v167_v9 = vld [vmem:[%s6296_s24 + $0xb0] sm:$0xff]  ;;  %v170_v24 = vld [vmem:[%s6296_s24 + $0xc8] sm:$0xff] }
  0x27   : > { %5278 = vmatmul.msk.f32.vlgmr.msra.gmra.mxu0 %vm413_vm0, %v145_v10  ;;  %5436 = vmatmul.msk.f32.vlgmr.msra.gmra.mxu2 %vm413_vm0, %v303_v20 }
  0x2f   : > { %5279 = vmatmul.msk.f32.gmra.mxu0 %vm413_vm0, %v146_v11  ;;  %5437 = vmatmul.msk.f32.gmra.mxu2 %vm413_vm0, %v304_v23 }
  0x37   : > { %5280 = vmatmul.msk.f32.gmra.mxu0 %vm413_vm0, %v147_v12  ;;  %5438 = vmatmul.msk.f32.gmra.mxu2 %vm413_vm0, %v305_v29  ;;  %v316_v12 = vld [vmem:[%s6296_s24 + $0x558] sm:$0xff]  ;;  %v171_v29 = vld [vmem:[%s6296_s24 + $0xd0] sm:$0xff] }
  0x3f   : > { %5281 = vmatmul.msk.f32.gmra.mxu0 %vm413_vm0, %v148_v13  ;;  %5439 = vmatmul.msk.f32.gmra.mxu2 %vm413_vm0, %v306_v34  ;;  %v172_v34 = vld [vmem:[%s6296_s24 + $0xd8] sm:$0xff] }
  0x47   : > { %5282 = vmatmul.msk.f32.gmra.mxu0 %vm413_vm0, %v149_v14  ;;  %5440 = vmatmul.msk.f32.gmra.mxu2 %vm413_vm0, %v307_v36  ;;  %v168_v14 = vld [vmem:[%s6296_s24 + $0xb8] sm:$0xff] }
  0x4f   : > { %5283 = vmatmul.msk.f32.gmra.mxu0 %vm413_vm0, %v150_v15  ;;  %5441 = vmatmul.msk.f32.gmra.mxu2 %vm413_vm0, %v308_v38 }
  0x57   : > { %5284 = vmatmul.msk.f32.gmra.mxu0 %vm413_vm0, %v151_v16  ;;  %5442 = vmatmul.msk.f32.gmra.mxu2 %vm413_vm0, %v309_v41 }
  0x5f   : > { %5285 = vmatmul.msk.f32.gmra.mxu0 %vm413_vm0, %v152_v17  ;;  %5443 = vmatmul.msk.f32.gmra.mxu2 %vm413_vm0, %v310_v46  ;;  %v317_v17 = vld [vmem:[%s6296_s24 + $0x560] sm:$0xff] }
  0x67   : > { %5286 = vmatmul.msk.f32.gmra.mxu0 %vm413_vm0, %v153_v18  ;;  %5444 = vmatmul.msk.f32.gmra.mxu2 %vm413_vm0, %v311_v51 }
  0x6f   : > { %5287 = vmatmul.msk.f32.gmra.mxu0 %vm413_vm0, %v154_v19  ;;  %5445 = vmatmul.msk.f32.gmra.mxu2 %vm413_vm0, %v312_v56  ;;  %v169_v19 = vld [vmem:[%s6296_s24 + $0xc0] sm:$0xff] }
  0x77   : > { %5288 = vmatmul.msk.f32.gmra.mxu0 %vm413_vm0, %v155_v21  ;;  %5446 = vmatmul.msk.f32.gmra.mxu2 %vm413_vm0, %v313_v61 }
  0x7f   : > { %5289 = vmatmul.msk.f32.gmra.mxu0 %vm413_vm0, %v156_v26  ;;  %5447 = vmatmul.msk.f32.gmra.mxu2 %vm413_vm0, %v314_v2  ;;  %v178_v2 = vld [vmem:[%s6296_s24 + $0x108] sm:$0xff] }
  0x87   : > { %5290 = vmatmul.msk.f32.gmra.mxu0 %vm413_vm0, %v157_v31  ;;  %5448 = vmatmul.msk.f32.gmra.mxu2 %vm413_vm0, %v315_v7  ;;  %v327_v7 = vld [vmem:[%s6296_s24 + $0x5b0] sm:$0xff] }
  0x8f   : > { %5291 = vmatmul.msk.f32.gmra.mxu0 %vm413_vm0, %v158_v35  ;;  %5449 = vmatmul.msk.f32.gmra.mxu2 %vm413_vm0, %v316_v12 }
  0x97   : > { %5292 = vmatmul.msk.f32.gmra.mxu0 %vm413_vm0, %v159_v37  ;;  %5450 = vmatmul.msk.f32.gmra.mxu2 %vm413_vm0, %v317_v17  ;;  %v321_v37 = vld [vmem:[%s6296_s24 + $0x580] sm:$0xff] }
  0x9f   : > { %5293 = vmatmul.msk.f32.gmra.mxu0 %vm413_vm0, %v160_v39  ;;  %5451 = vmatmul.msk.f32.gmra.mxu2 %vm413_vm0, %v318_v22  ;;  %v173_v39 = vld [vmem:[%s6296_s24 + $0xe0] sm:$0xff] }
  0xa4   : > { %v1199_v42 = vpop.f32.mrf.mxu0 }
  0xa5   : > { %v1200_v44 = vadd.f32 %v6372_v40, %v1199_v42 }
  0xa7   : > { %v1967_v45 = vmax.f32 %v1200_v44, 0.0  ;;  %5294 = vmatmul.msk.f32.gmra.mxu0 %vm413_vm0, %v161_v43  ;;  %5452 = vmatmul.msk.f32.gmra.mxu2 %vm413_vm0, %v319_v27  ;;  %v322_v43 = vld [vmem:[%s6296_s24 + $0x588] sm:$0xff] }
  0xa9   : > { %5534 = vmatmul.msk.f32.vlgmr.msra.gmra.mxu1 %vm2233_vm1, %v1967_v45  ;;  %v174_v45 = vld [vmem:[%s6296_s24 + $0xe8] sm:$0xff] }
  0xac   : > { %v1202_v47 = vpop.f32.mrf.mxu0 }
  0xad   : > { %v1203_v49 = vadd.f32 %v6372_v40, %v1202_v47 }
  0xaf   : > { %v1968_v50 = vmax.f32 %v1203_v49, 0.0  ;;  %5295 = vmatmul.msk.f32.gmra.mxu0 %vm413_vm0, %v162_v48  ;;  %5453 = vmatmul.msk.f32.gmra.mxu2 %vm413_vm0, %v320_v32  ;;  %v323_v48 = vld [vmem:[%s6296_s24 + $0x590] sm:$0xff] }
  0xb1   : > { %5535 = vmatmul.msk.f32.gmra.mxu1 %vm2233_vm1, %v1968_v50  ;;  %v175_v50 = vld [vmem:[%s6296_s24 + $0xf0] sm:$0xff] }
  0xb4   : > { %v1205_v52 = vpop.f32.mrf.mxu0 }
  0xb5   : > { %v1206_v54 = vadd.f32 %v6372_v40, %v1205_v52 }
  0xb7   : > { %v1969_v55 = vmax.f32 %v1206_v54, 0.0  ;;  %5296 = vmatmul.msk.f32.gmra.mxu0 %vm413_vm0, %v163_v53  ;;  %5454 = vmatmul.msk.f32.gmra.mxu2 %vm413_vm0, %v321_v37  ;;  %v324_v53 = vld [vmem:[%s6296_s24 + $0x598] sm:$0xff]  ;;  %v183_v37 = vld [vmem:[%s6296_s24 + $0x130] sm:$0xff] }
  0xb9   : > { %5536 = vmatmul.msk.f32.gmra.mxu1 %vm2233_vm1, %v1969_v55  ;;  %v176_v55 = vld [vmem:[%s6296_s24 + $0xf8] sm:$0xff] }
  0xbc   : > { %v1208_v57 = vpop.f32.mrf.mxu0 }
  0xbd   : > { %v1209_v59 = vadd.f32 %v6372_v40, %v1208_v57 }
  0xbf   : > { %v1970_v60 = vmax.f32 %v1209_v59, 0.0  ;;  %5297 = vmatmul.msk.f32.gmra.mxu0 %vm413_vm0, %v164_v58  ;;  %5455 = vmatmul.msk.f32.gmra.mxu2 %vm413_vm0, %v322_v43  ;;  %v325_v58 = vld [vmem:[%s6296_s24 + $0x5a0] sm:$0xff]  ;;  %v332_v43 = vld [vmem:[%s6296_s24 + $0x5d8] sm:$0xff] }
  0xc1   : > { %5537 = vmatmul.msk.f32.gmra.mxu1 %vm2233_vm1, %v1970_v60  ;;  %v177_v60 = vld [vmem:[%s6296_s24 + $0x100] sm:$0xff] }
  0xc4   : > { %v1211_v62 = vpop.f32.mrf.mxu0 }
  0xc5   : > { %v1212_v0 = vadd.f32 %v6372_v40, %v1211_v62 }
  0xc7   : > { %v1971_v1 = vmax.f32 %v1212_v0, 0.0  ;;  %5298 = vmatmul.msk.f32.gmra.mxu0 %vm413_vm0, %v165_v63  ;;  %5456 = vmatmul.msk.f32.gmra.mxu2 %vm413_vm0, %v323_v48  ;;  %v326_v0 = vld [vmem:[%s6296_s24 + $0x5a8] sm:$0xff] }
  0xc9   : > { %5538 = vmatmul.msk.f32.gmra.mxu1 %vm2233_vm1, %v1971_v1 }
  0xcc   : > { %v1214_v3 = vpop.f32.mrf.mxu0 }
  0xcd   : > { %v1215_v5 = vadd.f32 %v6372_v40, %v1214_v3 }
  0xcf   : > { %v1972_v6 = vmax.f32 %v1215_v5, 0.0  ;;  %5299 = vmatmul.msk.f32.gmra.mxu0 %vm413_vm0, %v166_v4  ;;  %5457 = vmatmul.msk.f32.gmra.mxu2 %vm413_vm0, %v324_v53 }
  0xd1   : > { %5539 = vmatmul.msk.f32.gmra.mxu1 %vm2233_vm1, %v1972_v6  ;;  %v6486_v6 = vpop.f32.mrf.mxu2 }
  0xd4   : > { %v1217_v8 = vpop.f32.mrf.mxu0 }
  0xd5   : > { %v1218_v10 = vadd.f32 %v6372_v40, %v1217_v8 }
  0xd7   : > { %v1973_v11 = vmax.f32 %v1218_v10, 0.0  ;;  %5300 = vmatmul.msk.f32.gmra.mxu0 %vm413_vm0, %v167_v9  ;;  %5458 = vmatmul.msk.f32.gmra.mxu2 %vm413_vm0, %v325_v58  ;;  %v179_v9 = vld [vmem:[%s6296_s24 + $0x110] sm:$0xff] }
  0xd9   : > { %5540 = vmatmul.msk.f32.gmra.mxu1 %vm2233_vm1, %v1973_v11 }
  0xdc   : > { %v1220_v13 = vpop.f32.mrf.mxu0 }
  0xdd   : > { %v1221_v15 = vadd.f32 %v6372_v40, %v1220_v13  ;;  %v6496_v13 = vpop.f32.mrf.mxu2 }
  0xdf   : > { %v1974_v16 = vmax.f32 %v1221_v15, 0.0  ;;  %5301 = vmatmul.msk.f32.gmra.mxu0 %vm413_vm0, %v168_v14  ;;  %5459 = vmatmul.msk.f32.gmra.mxu2 %vm413_vm0, %v326_v0  ;;  %v328_v14 = vld [vmem:[%s6296_s24 + $0x5b8] sm:$0xff] }
  0xe1   : > { %5541 = vmatmul.msk.f32.gmra.mxu1 %vm2233_vm1, %v1974_v16  ;;  %v180_v16 = vld [vmem:[%s6296_s24 + $0x118] sm:$0xff] }
  0xe4   : > { %v1223_v18 = vpop.f32.mrf.mxu0 }
  0xe5   : > { %v1224_v20 = vadd.f32 %v6372_v40, %v1223_v18 }
  0xe7   : > { %v1975_v21 = vmax.f32 %v1224_v20, 0.0  ;;  %5302 = vmatmul.msk.f32.gmra.mxu0 %vm413_vm0, %v169_v19  ;;  %5460 = vmatmul.msk.f32.gmra.mxu2 %vm413_vm0, %v327_v7  ;;  %v6506_v20 = vpop.f32.mrf.mxu2 }
  0xe9   : > { %5542 = vmatmul.msk.f32.gmra.mxu1 %vm2233_vm1, %v1975_v21  ;;  %v329_v21 = vld [vmem:[%s6296_s24 + $0x5c0] sm:$0xff] }
  0xec   : > { %v1226_v23 = vpop.f32.mrf.mxu0 }
  0xed   : > { %v1227_v25 = vadd.f32 %v6372_v40, %v1226_v23  ;;  %v181_v23 = vld [vmem:[%s6296_s24 + $0x120] sm:$0xff] }
  0xef   : > { %v1976_v26 = vmax.f32 %v1227_v25, 0.0  ;;  %5303 = vmatmul.msk.f32.gmra.mxu0 %vm413_vm0, %v170_v24  ;;  %5461 = vmatmul.msk.f32.gmra.mxu2 %vm413_vm0, %v328_v14  ;;  %v6516_v27 = vpop.f32.mrf.mxu2  ;;  %v188_v14 = vld [vmem:[%s6296_s24 + $0x158] sm:$0xff] }
  0xf1   : > { %5543 = vmatmul.msk.f32.gmra.mxu1 %vm2233_vm1, %v1976_v26 }
  0xf4   : > { %v1229_v28 = vpop.f32.mrf.mxu0 }
  0xf5   : > { %v1230_v30 = vadd.f32 %v6372_v40, %v1229_v28  ;;  %v330_v28 = vld [vmem:[%s6296_s24 + $0x5c8] sm:$0xff] }
  0xf7   : > { %v1977_v31 = vmax.f32 %v1230_v30, 0.0  ;;  %5304 = vmatmul.msk.f32.gmra.mxu0 %vm413_vm0, %v171_v29  ;;  %5462 = vmatmul.msk.f32.gmra.mxu2 %vm413_vm0, %v329_v21  ;;  %v182_v30 = vld [vmem:[%s6296_s24 + $0x128] sm:$0xff]  ;;  %v337_v21 = vld [vmem:[%s6296_s24 + $0x600] sm:$0xff] }
  0xf9   : > { %5544 = vmatmul.msk.f32.gmra.mxu1 %vm2233_vm1, %v1977_v31 }
  0xfc   : > { %v1232_v33 = vpop.f32.mrf.mxu0 }
  0xfd   : > { %v1233_v35 = vadd.f32 %v6372_v40, %v1232_v33 }
  0xff   : > { %v1978_v36 = vmax.f32 %v1233_v35, 0.0  ;;  %5305 = vmatmul.msk.f32.gmra.mxu0 %vm413_vm0, %v172_v34  ;;  %5463 = vmatmul.msk.f32.gmra.mxu2 %vm413_vm0, %v330_v28  ;;  %v6526_v34 = vpop.f32.mrf.mxu2  ;;  %v331_v35 = vld [vmem:[%s6296_s24 + $0x5d0] sm:$0xff] }
 0x101   : > { %5545 = vmatmul.msk.f32.gmra.mxu1 %vm2233_vm1, %v1978_v36 }
 0x104   : > { %v1235_v38 = vpop.f32.mrf.mxu0 }
 0x105   : > { %v1236_v41 = vadd.f32 %v6372_v40, %v1235_v38 }
 0x107   : > { %v1979_v42 = vmax.f32 %v1236_v41, 0.0  ;;  %5306 = vmatmul.msk.f32.gmra.mxu0 %vm413_vm0, %v173_v39  ;;  %5464 = vmatmul.msk.f32.gmra.mxu2 %vm413_vm0, %v331_v35 }
 0x109   : > { %5546 = vmatmul.msk.f32.gmra.mxu1 %vm2233_vm1, %v1979_v42  ;;  %v6536_v42 = vpop.f32.mrf.mxu2 }
 0x10c   : > { %v1238_v44 = vpop.f32.mrf.mxu0 }
 0x10d   : > { %v1239_v46 = vadd.f32 %v6372_v40, %v1238_v44 }
 0x10f   : > { %v1980_v47 = vmax.f32 %v1239_v46, 0.0  ;;  %5307 = vmatmul.msk.f32.gmra.mxu0 %vm413_vm0, %v174_v45  ;;  %5465 = vmatmul.msk.f32.gmra.mxu2 %vm413_vm0, %v332_v43  ;;  %v184_v45 = vld [vmem:[%s6296_s24 + $0x138] sm:$0xff] }
 0x111   : > { %5547 = vmatmul.msk.f32.gmra.mxu1 %vm2233_vm1, %v1980_v47 }
 0x114   : > { %v1241_v49 = vpop.f32.mrf.mxu0 }
 0x115   : > { %v1242_v51 = vadd.f32 %v6372_v40, %v1241_v49  ;;  %v6546_v49 = vpop.f32.mrf.mxu2 }
 0x117   : > { %v1981_v52 = vmax.f32 %v1242_v51, 0.0  ;;  %5308 = vmatmul.msk.f32.gmra.mxu0 %vm413_vm0, %v175_v50  ;;  %v333_v50 = vld [vmem:[%s6296_s24 + $0x5e0] sm:$0xff] }
 0x118   : > { %5466 = vmatmul.msk.f32.gmra.mxu2 %vm413_vm0, %v333_v50 }
 0x119   : > { %5548 = vmatmul.msk.f32.gmra.mxu1 %vm2233_vm1, %v1981_v52  ;;  %v185_v52 = vld [vmem:[%s6296_s24 + $0x140] sm:$0xff] }
 0x11c   : > { %v1244_v54 = vpop.f32.mrf.mxu0 }
 0x11d   : > { %v1245_v56 = vadd.f32 %v6372_v40, %v1244_v54 }
 0x11f   : > { %v1982_v57 = vmax.f32 %v1245_v56, 0.0  ;;  %5309 = vmatmul.msk.f32.gmra.mxu0 %vm413_vm0, %v176_v55  ;;  %v6556_v56 = vpop.f32.mrf.mxu2 }
 0x121   : > { %5549 = vmatmul.msk.f32.gmra.mxu1 %vm2233_vm1, %v1982_v57  ;;  %v334_v57 = vld [vmem:[%s6296_s24 + $0x5e8] sm:$0xff] }
 0x122   : > { %5467 = vmatmul.msk.f32.gmra.mxu2 %vm413_vm0, %v334_v57 }
 0x124   : > { %v1247_v59 = vpop.f32.mrf.mxu0 }
 0x125   : > { %v1248_v61 = vadd.f32 %v6372_v40, %v1247_v59  ;;  %v186_v59 = vld [vmem:[%s6296_s24 + $0x148] sm:$0xff] }
 0x126   : > { %v6474_v62 = vpop.f32.mrf.mxu1 }
 0x127   : > { %v1983_v63 = vmax.f32 %v1248_v61, 0.0  ;;  %5310 = vmatmul.msk.f32.gmra.mxu0 %vm413_vm0, %v177_v60  ;;  %v6566_v0 = vpop.f32.mrf.mxu2 }
 0x129   : > { %5550 = vmatmul.msk.f32.gmra.mxu1 %vm2233_vm1, %v1983_v63 }
 0x12c   : > { %v1250_v1 = vpop.f32.mrf.mxu0 }
 0x12d   : > { %v1251_v3 = vadd.f32 %v6372_v40, %v1250_v1  ;;  %v335_v1 = vld [vmem:[%s6296_s24 + $0x5f0] sm:$0xff] }
 0x12e   : > { %v6482_v4 = vpop.f32.mrf.mxu1  ;;  %5468 = vmatmul.msk.f32.gmra.mxu2 %vm413_vm0, %v335_v1 }
 0x12f   : > { %v1984_v5 = vmax.f32 %v1251_v3, 0.0  ;;  %5311 = vmatmul.msk.f32.gmra.mxu0 %vm413_vm0, %v178_v2  ;;  %v187_v3 = vld [vmem:[%s6296_s24 + $0x150] sm:$0xff] }
 0x131   : > { %5551 = vmatmul.msk.f32.gmra.mxu1 %vm2233_vm1, %v1984_v5 }
 0x134   : > { %v1253_v8 = vpop.f32.mrf.mxu0 }
 0x135   : > { %v1254_v10 = vadd.f32 %v6372_v40, %v1253_v8 }
 0x136   : > { %v6492_v11 = vpop.f32.mrf.mxu1 }
 0x137   : > { %v1985_v12 = vmax.f32 %v1254_v10, 0.0  ;;  %5312 = vmatmul.msk.f32.gmra.mxu0 %vm413_vm0, %v179_v9  ;;  %v6576_v9 = vpop.f32.mrf.mxu2  ;;  %v336_v10 = vld [vmem:[%s6296_s24 + $0x5f8] sm:$0xff] }
 0x138   : > { %5469 = vmatmul.msk.f32.gmra.mxu2 %vm413_vm0, %v336_v10 }
 0x139   : > { %5552 = vmatmul.msk.f32.gmra.mxu1 %vm2233_vm1, %v1985_v12 }
 0x13c   : > { %v1256_v15 = vpop.f32.mrf.mxu0 }
 0x13d   : > { %v1257_v17 = vadd.f32 %v6372_v40, %v1256_v15 }
 0x13e   : > { %v6502_v18 = vpop.f32.mrf.mxu1 }
 0x13f   : > { %v1986_v19 = vmax.f32 %v1257_v17, 0.0  ;;  %5313 = vmatmul.msk.f32.gmra.mxu0 %vm413_vm0, %v180_v16 }
 0x141   : > { %5553 = vmatmul.msk.f32.gmra.mxu1 %vm2233_vm1, %v1986_v19  ;;  %v6586_v19 = vpop.f32.mrf.mxu2  ;;  %5470 = vmatmul.msk.f32.gmra.mxu2 %vm413_vm0, %v337_v21 }
 0x144   : > { %v1259_v22 = vpop.f32.mrf.mxu0 }
 0x145   : > { %v1260_v24 = vadd.f32 %v6372_v40, %v1259_v22 }
 0x146   : > { %v6512_v25 = vpop.f32.mrf.mxu1 }
 0x147   : > { %v1987_v26 = vmax.f32 %v1260_v24, 0.0  ;;  %5314 = vmatmul.msk.f32.gmra.mxu0 %vm413_vm0, %v181_v23  ;;  %v189_v23 = vld [vmem:[%s6296_s24 + $0x160] sm:$0xff] }
 0x149   : > { %5554 = vmatmul.msk.f32.gmra.mxu1 %vm2233_vm1, %v1987_v26 }
 0x14c   : > { %v1262_v29 = vpop.f32.mrf.mxu0 }
 0x14d   : > { %v1263_v31 = vadd.f32 %v6372_v40, %v1262_v29  ;;  %v6594_v29 = vpop.f32.mrf.mxu2 }
 0x14e   : > { %v6522_v32 = vpop.f32.mrf.mxu1 }
 0x14f   : > { %v1988_v33 = vmax.f32 %v1263_v31, 0.0  ;;  %5315 = vmatmul.msk.f32.gmra.mxu0 %vm413_vm0, %v182_v30  ;;  %v338_v30 = vld [vmem:[%s6296_s24 + $0x608] sm:$0xff] }
 0x150   : > { %5471 = vmatmul.msk.f32.gmra.mxu2 %vm413_vm0, %v338_v30  ;;  %v194_v30 = vld [vmem:[%s6296_s24 + $0x188] sm:$0xff] }
 0x151   : > { %5555 = vmatmul.msk.f32.gmra.mxu1 %vm2233_vm1, %v1988_v33  ;;  %v190_v33 = vld [vmem:[%s6296_s24 + $0x168] sm:$0xff] }
 0x154   : > { %v1265_v36 = vpop.f32.mrf.mxu0 }
 0x155   : > { %v1266_v38 = vadd.f32 %v6372_v40, %v1265_v36 }
 0x156   : > { %v6532_v39 = vpop.f32.mrf.mxu1 }
 0x157   : > { %v1989_v41 = vmax.f32 %v1266_v38, 0.0  ;;  %5316 = vmatmul.msk.f32.gmra.mxu0 %vm413_vm0, %v183_v37  ;;  %v6602_v38 = vpop.f32.mrf.mxu2 }
 0x159   : > { %5556 = vmatmul.msk.f32.gmra.mxu1 %vm2233_vm1, %v1989_v41  ;;  %v339_v41 = vld [vmem:[%s6296_s24 + $0x610] sm:$0xff] }
 0x15a   : > { %5472 = vmatmul.msk.f32.gmra.mxu2 %vm413_vm0, %v339_v41 }
 0x15c   : > { %v1268_v44 = vpop.f32.mrf.mxu0 }
 0x15d   : > { %v1269_v46 = vadd.f32 %v6372_v40, %v1268_v44  ;;  %v191_v44 = vld [vmem:[%s6296_s24 + $0x170] sm:$0xff] }
 0x15e   : > { %v6542_v47 = vpop.f32.mrf.mxu1 }
 0x15f   : > { %v1990_v48 = vmax.f32 %v1269_v46, 0.0  ;;  %5317 = vmatmul.msk.f32.gmra.mxu0 %vm413_vm0, %v184_v45  ;;  %v6610_v50 = vpop.f32.mrf.mxu2 }
 0x161   : > { %5557 = vmatmul.msk.f32.gmra.mxu1 %vm2233_vm1, %v1990_v48 }
 0x164   : > { %v1271_v51 = vpop.f32.mrf.mxu0 }
 0x165   : > { %v1272_v53 = vadd.f32 %v6372_v40, %v1271_v51  ;;  %v340_v51 = vld [vmem:[%s6296_s24 + $0x618] sm:$0xff] }
 0x166   : > { %v6552_v54 = vpop.f32.mrf.mxu1  ;;  %5473 = vmatmul.msk.f32.gmra.mxu2 %vm413_vm0, %v340_v51 }
 0x167   : > { %v1991_v55 = vmax.f32 %v1272_v53, 0.0  ;;  %5318 = vmatmul.msk.f32.gmra.mxu0 %vm413_vm0, %v185_v52  ;;  %v192_v53 = vld [vmem:[%s6296_s24 + $0x178] sm:$0xff] }
 0x169   : > { %5558 = vmatmul.msk.f32.gmra.mxu1 %vm2233_vm1, %v1991_v55  ;;  %v6618_v55 = vld [vmem:[%s8887_s1 + $0x98] ss:$0 sm:$0xff] }
 0x16c   : > { %v1274_v58 = vpop.f32.mrf.mxu0 }
 0x16d   : > { %v1275_v60 = vadd.f32 %v6372_v40, %v1274_v58 }
 0x16e   : > { %v6562_v61 = vpop.f32.mrf.mxu1 }
 0x16f   : > { %v1992_v63 = vmax.f32 %v1275_v60, 0.0  ;;  %5319 = vmatmul.msk.f32.gmra.mxu0 %vm413_vm0, %v186_v59 }
 0x171   : > { %5559 = vmatmul.msk.f32.gmra.mxu1 %vm2233_vm1, %v1992_v63 }
 0x174   : > { %v1277_v2 = vpop.f32.mrf.mxu0 }
 0x175   : > { %v1278_v5 = vadd.f32 %v6372_v40, %v1277_v2  ;;  %v6625_v2 = vpop.f32.mrf.mxu2 }
 0x176   : > { %v6572_v7 = vpop.f32.mrf.mxu1 }
 0x177   : > { %v1993_v8 = vmax.f32 %v1278_v5, 0.0  ;;  %5320 = vmatmul.msk.f32.gmra.mxu0 %vm413_vm0, %v187_v3  ;;  %v341_v3 = vld [vmem:[%s6296_s24 + $0x620] sm:$0xff] }
 0x178   : > { %5474 = vmatmul.msk.f32.gmra.mxu2 %vm413_vm0, %v341_v3 }
 0x179   : > { %5560 = vmatmul.msk.f32.gmra.mxu1 %vm2233_vm1, %v1993_v8  ;;  %v193_v8 = vld [vmem:[%s6296_s24 + $0x180] sm:$0xff] }
 0x17c   : > { %v1280_v12 = vpop.f32.mrf.mxu0 }
 0x17d   : > { %v1281_v15 = vadd.f32 %v6372_v40, %v1280_v12 }
 0x17e   : > { %v6582_v16 = vpop.f32.mrf.mxu1 }
 0x17f   : > { %v1994_v17 = vmax.f32 %v1281_v15, 0.0  ;;  %5321 = vmatmul.msk.f32.gmra.mxu0 %vm413_vm0, %v188_v14 }
 0x181   : > { %5561 = vmatmul.msk.f32.gmra.mxu1 %vm2233_vm1, %v1994_v17 }
 0x184   : > { %v1283_v22 = vpop.f32.mrf.mxu0 }
 0x185   : > { %v1284_v24 = vadd.f32 %v6372_v40, %v1283_v22 }
 0x186   : > { %v3055_v26 = vpop.f32.mrf.mxu1 }
 0x187   : > { %v1995_v28 = vmax.f32 %v1284_v24, 0.0  ;;  %5322 = vmatmul.msk.f32.gmra.mxu0 %vm413_vm0, %v189_v23  ;;  %v3056_v21 = vadd.f32 %v6618_v55, %v3055_v26  ;;  %v6639_v23 = vpop.f32.mrf.mxu2  ;;  %v342_v24 = vld [vmem:[%s6296_s24 + $0x628] sm:$0xff] }
 0x188   : > { %5475 = vmatmul.msk.f32.gmra.mxu2 %vm413_vm0, %v342_v24 }
 0x189   : > { %5562 = vmatmul.msk.f32.gmra.mxu1 %vm2233_vm1, %v1995_v28 }
 0x18c   : > { %v1286_v31 = vpop.f32.mrf.mxu0 }
 0x18d   : > { %v1287_v35 = vadd.f32 %v6372_v40, %v1286_v31  ;;  %v3053_v31 = vadd.f32 %v6618_v55, %v6582_v16 }
 0x18e   : > { %v3058_v36 = vpop.f32.mrf.mxu1 }
 0x18f   : > { %v1996_v37 = vmax.f32 %v1287_v35, 0.0  ;;  %5323 = vmatmul.msk.f32.gmra.mxu0 %vm413_vm0, %v190_v33  ;;  %v3059_v10 = vadd.f32 %v6618_v55, %v3058_v36  ;;  %v3799_v33 = vmax.f32 %v3056_v21, 0.0  ;;  %v3798_v41 = vmax.f32 %v3053_v31, 0.0 }
 0x190   : > { %v3035_v21 = vadd.f32 %v6618_v55, %v6522_v32 }
 0x191   : > { %5563 = vmatmul.msk.f32.gmra.mxu1 %vm2233_vm1, %v1996_v37  ;;  %v3800_v22 = vmax.f32 %v3059_v10, 0.0  ;;  %v3050_v37 = vadd.f32 %v6618_v55, %v6572_v7 }
 0x192   : > { %v3792_v31 = vmax.f32 %v3035_v21, 0.0 }
 0x194   : > { %v1289_v43 = vpop.f32.mrf.mxu0 }
 0x195   : > { %v1290_v45 = vadd.f32 %v6372_v40, %v1289_v43  ;;  %v6655_v43 = vpop.f32.mrf.mxu2 }
 0x196   : > { %v3061_v46 = vpop.f32.mrf.mxu1 }
 0x197   : > { %v1997_v48 = vmax.f32 %v1290_v45, 0.0  ;;  %5324 = vmatmul.msk.f32.gmra.mxu0 %vm413_vm0, %v191_v44  ;;  %v3062_v63 = vadd.f32 %v6618_v55, %v3061_v46  ;;  %v343_v44 = vld [vmem:[%s6296_s24 + $0x630] sm:$0xff]  ;;  %v3047_v46 = vadd.f32 %v6618_v55, %v6562_v61 }
 0x198   : > { %5476 = vmatmul.msk.f32.gmra.mxu2 %vm413_vm0, %v343_v44  ;;  %v195_v45 = vld [vmem:[%s6296_s24 + $0x190] sm:$0xff] }
 0x199   : > { %5564 = vmatmul.msk.f32.gmra.mxu1 %vm2233_vm1, %v1997_v48  ;;  %v3801_v12 = vmax.f32 %v3062_v63, 0.0  ;;  %v3797_v48 = vmax.f32 %v3050_v37, 0.0  ;;  %v3041_v63 = vadd.f32 %v6618_v55, %v6542_v47  ;;  %v3029_v37 = vadd.f32 %v6618_v55, %v6502_v18 }
 0x19b   : > { %v3794_v10 = vmax.f32 %v3041_v63, 0.0 }
 0x19c   : > { %v1292_v52 = vpop.f32.mrf.mxu0 }
 0x19d   : > { %v1293_v57 = vadd.f32 %v6372_v40, %v1292_v52 }
 0x19e   : > { %v3064_v58 = vpop.f32.mrf.mxu1 }
 0x19f   : > { %v1998_v59 = vmax.f32 %v1293_v57, 0.0  ;;  %v3065_v60 = vadd.f32 %v6618_v55, %v3064_v58  ;;  %5325 = vmatmul.msk.f32.gmra.mxu0 %vm413_vm0, %v192_v53  ;;  %v3044_v53 = vadd.f32 %v6618_v55, %v6552_v54  ;;  %v3796_v57 = vmax.f32 %v3047_v46, 0.0  ;;  %v6671_v58 = vpop.f32.mrf.mxu2 }
 0x1a0   : > { %v3790_v46 = vmax.f32 %v3029_v37, 0.0 }
 0x1a1   : > { %v3802_v1 = vmax.f32 %v3065_v60, 0.0  ;;  %5565 = vmatmul.msk.f32.gmra.mxu1 %vm2233_vm1, %v1998_v59  ;;  %v344_v59 = vld [vmem:[%s6296_s24 + $0x638] sm:$0xff] }
 0x1a2   : > { %5477 = vmatmul.msk.f32.gmra.mxu2 %vm413_vm0, %v344_v59  ;;  %v196_v60 = vld [vmem:[%s6296_s24 + $0x198] sm:$0xff] }
 0x1a3   : > { %5790 = vmatpush.xpose.msk.msrb.mxu2 %vm2233_vm1, %v3802_v1  ;;  %v3795_v1 = vmax.f32 %v3044_v53, 0.0  ;;  %v3023_v53 = vadd.f32 %v6618_v55, %v6482_v4  ;;  %v348_v4 = vld [vmem:[%s6296_s24 + $0x658] sm:$0xff] }
 0x1a4   : > { %v1295_v5 = vpop.f32.mrf.mxu0 }
 0x1a5   : > { %v1296_v14 = vadd.f32 %v6372_v40, %v1295_v5  ;;  %v3788_v63 = vmax.f32 %v3023_v53, 0.0 }
 0x1a6   : > { %v6633_v15 = vpop.f32.mrf.mxu1 }
 0x1a7   : > { %v1999_v17 = vmax.f32 %v1296_v14, 0.0  ;;  %5326 = vmatmul.msk.f32.gmra.mxu0 %vm413_vm0, %v193_v8  ;;  %5791 = vmatpush.xpose.msk.msrb.mxu2 %vm2233_vm1, %v3801_v12  ;;  %v3038_v8 = vadd.f32 %v6618_v55, %v6532_v39  ;;  %v6687_v12 = vpop.f32.mrf.mxu2  ;;  %v345_v14 = vld [vmem:[%s6296_s24 + $0x640] sm:$0xff] }
 0x1a8   : > { %8891 = vst [vmem:[#allocation5_spill] sm:$0xff] %v6687_v12 }
 0x1a9   : > { %5566 = vmatmul.msk.f32.gmra.mxu1 %vm2233_vm1, %v1999_v17  ;;  %v197_v17 = vld [vmem:[%s6296_s24 + $0x1a0] sm:$0xff] }
 0x1aa   : > { %5478 = vmatmul.msk.f32.gmra.mxu2 %vm413_vm0, %v345_v14 }
 0x1ab   : > { %5792 = vmatpush.xpose.msk.msrb.mxu2 %vm2233_vm1, %v3800_v22  ;;  %v3793_v22 = vmax.f32 %v3038_v8, 0.0 }
 0x1ac   : > { %v1298_v28 = vpop.f32.mrf.mxu0 }
 0x1ad   : > { %v1299_v26 = vadd.f32 %v6372_v40, %v1298_v28 }
 0x1ae   : > { %v6648_v35 = vpop.f32.mrf.mxu1 }
 0x1af   : > { %v2000_v36 = vmax.f32 %v1299_v26, 0.0  ;;  %5327 = vmatmul.msk.f32.gmra.mxu0 %vm413_vm0, %v194_v30  ;;  %5793 = vmatpush.xpose.msk.msrb.mxu2 %vm2233_vm1, %v3799_v33  ;;  %v3032_v30 = vadd.f32 %v6618_v55, %v6512_v25  ;;  %v6703_v33 = vpop.f32.mrf.mxu2  ;;  %v346_v26 = vld [vmem:[%s6296_s24 + $0x648] sm:$0xff] }
 0x1b0   : > { %8892 = vst [vmem:[#allocation6_spill] sm:$0xff] %v6703_v33 }
 0x1b1   : > { %5567 = vmatmul.msk.f32.gmra.mxu1 %vm2233_vm1, %v2000_v36  ;;  %v198_v36 = vld [vmem:[%s6296_s24 + $0x1a8] sm:$0xff] }
 0x1b2   : > { %5479 = vmatmul.msk.f32.gmra.mxu2 %vm413_vm0, %v346_v26  ;;  %v350_v26 = vld [vmem:[%s6296_s24 + $0x668] sm:$0xff] }
 0x1b3   : > { %5794 = vmatpush.xpose.msk.msrb.mxu2 %vm2233_vm1, %v3798_v41  ;;  %v3791_v41 = vmax.f32 %v3032_v30, 0.0 }
 0x1b4   : > { %v1301_v16 = vpop.f32.mrf.mxu0 }
 0x1b5   : > { %v1302_v7 = vadd.f32 %v6372_v40, %v1301_v16 }
 0x1b6   : > { %v6664_v51 = vpop.f32.mrf.mxu1 }
 0x1b7   : > { %v2001_v52 = vmax.f32 %v1302_v7, 0.0  ;;  %5328 = vmatmul.msk.f32.gmra.mxu0 %vm413_vm0, %v195_v45  ;;  %5795 = vmatpush.xpose.msk.msrb.mxu2 %vm2233_vm1, %v3797_v48  ;;  %v3026_v45 = vadd.f32 %v6618_v55, %v6492_v11  ;;  %v6719_v48 = vpop.f32.mrf.mxu2  ;;  %v347_v7 = vld [vmem:[%s6296_s24 + $0x650] sm:$0xff] }
 0x1b8   : > { %8893 = vst [vmem:[#allocation7_spill] sm:$0xff] %v6719_v48  ;;  %v256_v48 = vld [vmem:[%s6296_s24 + $0x378] sm:$0xff] }
 0x1b9   : > { %5568 = vmatmul.msk.f32.gmra.mxu1 %vm2233_vm1, %v2001_v52  ;;  %v199_v52 = vld [vmem:[%s6296_s24 + $0x1b0] sm:$0xff] }
 0x1ba   : > { %5480 = vmatmul.msk.f32.gmra.mxu2 %vm413_vm0, %v347_v7  ;;  %v203_v7 = vld [vmem:[%s6296_s24 + $0x1d0] sm:$0xff] }
 0x1bb   : > { %5796 = vmatpush.xpose.msk.msrb.mxu2 %vm2233_vm1, %v3796_v57  ;;  %v3789_v57 = vmax.f32 %v3026_v45, 0.0  ;;  %v351_v45 = vld [vmem:[%s6296_s24 + $0x670] sm:$0xff] }
 0x1bc   : > { %v1304_v61 = vpop.f32.mrf.mxu0 }
 0x1bd   : > { %v1305_v54 = vadd.f32 %v6372_v40, %v1304_v61 }
 0x1be   : > { %v6680_v3 = vpop.f32.mrf.mxu1 }
 0x1bf   : > { %v2002_v5 = vmax.f32 %v1305_v54, 0.0  ;;  %5329 = vmatmul.msk.f32.gmra.mxu0 %vm413_vm0, %v196_v60  ;;  %5797 = vmatpush.xpose.msk.msrb.mxu2 %vm2233_vm1, %v3795_v1  ;;  %v3020_v60 = vadd.f32 %v6618_v55, %v6474_v62  ;;  %v6735_v1 = vpop.f32.mrf.mxu2 }
 0x1c0   : > { %8894 = vst [vmem:[#allocation8_spill] sm:$0xff] %v6735_v1  ;;  %v255_v1 = vld [vmem:[%s6296_s24 + $0x370] sm:$0xff] }
 0x1c1   : > { %5569 = vmatmul.msk.f32.gmra.mxu1 %vm2233_vm1, %v2002_v5  ;;  %v200_v5 = vld [vmem:[%s6296_s24 + $0x1b8] sm:$0xff]  ;;  %v3787_v8 = vmax.f32 %v3020_v60, 0.0 }
 0x1c2   : > { %5481 = vmatmul.msk.f32.gmra.mxu2 %vm413_vm0, %v348_v4  ;;  %v204_v60 = vld [vmem:[%s6296_s24 + $0x1d8] sm:$0xff] }
 0x1c3   : > { %5798 = vmatpush.xpose.msk.msrb.mxu2 %vm2233_vm1, %v3794_v10 }
 0x1c4   : > { %v1307_v47 = vpop.f32.mrf.mxu0 }
 0x1c5   : > { %v1308_v39 = vadd.f32 %v6372_v40, %v1307_v47 }
 0x1c6   : > { %v6696_v24 = vpop.f32.mrf.mxu1 }
 0x1c7   : > { %v2003_v28 = vmax.f32 %v1308_v39, 0.0  ;;  %5330 = vmatmul.msk.f32.gmra.mxu0 %vm413_vm0, %v197_v17  ;;  %5799 = vmatpush.xpose.msk.msrb.mxu2 %vm2233_vm1, %v3793_v22  ;;  %v6747_v47 = vpop.f32.mrf.mxu2  ;;  %v349_v17 = vld [vmem:[%s6296_s24 + $0x660] sm:$0xff] }
 0x1c8   : > { %8895 = vst [vmem:[#allocation9_spill] sm:$0xff] %v6747_v47  ;;  %v201_v22 = vld [vmem:[%s6296_s24 + $0x1c0] sm:$0xff] }
 0x1c9   : > { %5570 = vmatmul.msk.f32.gmra.mxu1 %vm2233_vm1, %v2003_v28 }
 0x1ca   : > { %5482 = vmatmul.msk.f32.gmra.mxu2 %vm413_vm0, %v349_v17 }
 0x1cb   : > { %5800 = vmatpush.xpose.msk.msrb.mxu2 %vm2233_vm1, %v3792_v31 }
 0x1cc   : > { %v1310_v32 = vpop.f32.mrf.mxu0 }
 0x1cd   : > { %v1311_v25 = vadd.f32 %v6372_v40, %v1310_v32 }
 0x1ce   : > { %v6712_v44 = vpop.f32.mrf.mxu1 }
 0x1cf   : > { %v2004_v16 = vmax.f32 %v1311_v25, 0.0  ;;  %5331 = vmatmul.msk.f32.gmra.mxu0 %vm413_vm0, %v198_v36  ;;  %5801 = vmatpush.xpose.msk.msrb.mxu2 %vm2233_vm1, %v3791_v41  ;;  %v6757_v31 = vpop.f32.mrf.mxu2  ;;  %v202_v36 = vld [vmem:[%s6296_s24 + $0x1c8] sm:$0xff] }
 0x1d0   : > { %8896 = vst [vmem:[#allocation10_spill] sm:$0xff] %v6757_v31 }
 0x1d1   : > { %5571 = vmatmul.msk.f32.gmra.mxu1 %vm2233_vm1, %v2004_v16 }
 0x1d2   : > { %5483 = vmatmul.msk.f32.gmra.mxu2 %vm413_vm0, %v350_v26 }
 0x1d3   : > { %5802 = vmatpush.xpose.msk.msrb.mxu2 %vm2233_vm1, %v3790_v46 }
 0x1d4   : > { %v1313_v18 = vpop.f32.mrf.mxu0 }
 0x1d5   : > { %v1314_v11 = vadd.f32 %v6372_v40, %v1313_v18 }
 0x1d6   : > { %v6728_v59 = vpop.f32.mrf.mxu1 }
 0x1d7   : > { %v2005_v61 = vmax.f32 %v1314_v11, 0.0  ;;  %5332 = vmatmul.msk.f32.gmra.mxu0 %vm413_vm0, %v199_v52  ;;  %5803 = vmatpush.xpose.msk.msrb.mxu2 %vm2233_vm1, %v3789_v57  ;;  %v6767_v16 = vpop.f32.mrf.mxu2  ;;  %v352_v11 = vld [vmem:[%s6296_s24 + $0x678] sm:$0xff] }
 0x1d8   : > { %8897 = vst [vmem:[#allocation11_spill] sm:$0xff] %v6767_v16 }
 0x1d9   : > { %5572 = vmatmul.msk.f32.gmra.mxu1 %vm2233_vm1, %v2005_v61 }
 0x1da   : > { %5484 = vmatmul.msk.f32.gmra.mxu2 %vm413_vm0, %v351_v45 }
 0x1db   : > { %5804 = vmatpush.xpose.msk.msrb.mxu2 %vm2233_vm1, %v3788_v63 }
 0x1dc   : > { %v1316_v54 = vpop.f32.mrf.mxu0 }
 0x1dd   : > { %v1317_v10 = vadd.f32 %v6372_v40, %v1316_v54 }
 0x1de   : > { %v6742_v14 = vpop.f32.mrf.mxu1 }
 0x1df   : > { %v2006_v62 = vmax.f32 %v1317_v10, 0.0  ;;  %5333 = vmatmul.msk.f32.gmra.mxu0 %vm413_vm0, %v200_v5  ;;  %5805 = vmatpush.xpose.msk.msrb.mxu2 %vm2233_vm1, %v3787_v8  ;;  %v6777_v57 = vpop.f32.mrf.mxu2  ;;  %v353_v8 = vld [vmem:[%s6296_s24 + $0x680] sm:$0xff] }
 0x1e0   : > { %8898 = vst [vmem:[#allocation12_spill] sm:$0xff] %v6777_v57 }
 0x1e1   : > { %5573 = vmatmul.msk.f32.gmra.mxu1 %vm2233_vm1, %v2006_v62  ;;  %v205_v62 = vld [vmem:[%s6296_s24 + $0x1e0] sm:$0xff] }
 0x1e2   : > { %5485 = vmatmul.msk.f32.gmra.mxu2 %vm413_vm0, %v352_v11 }
 0x1e4   : > { %v1319_v21 = vpop.f32.mrf.mxu0 }
 0x1e5   : > { %v1320_v39 = vadd.f32 %v6372_v40, %v1319_v21 }
 0x1e6   : > { %v6753_v28 = vpop.f32.mrf.mxu1 }
 0x1e7   : > { %v2007_v30 = vmax.f32 %v1320_v39, 0.0  ;;  %5334 = vmatmul.msk.f32.gmra.mxu0 %vm413_vm0, %v201_v22  ;;  %v6787_v5 = vpop.f32.mrf.mxu2 }
 0x1e8   : > { %8899 = vst [vmem:[#allocation13_spill] sm:$0xff] %v6787_v5 }
 0x1e9   : > { %5574 = vmatmul.msk.f32.gmra.mxu1 %vm2233_vm1, %v2007_v30  ;;  %v354_v30 = vld [vmem:[%s6296_s24 + $0x688] sm:$0xff] }
 0x1ea   : > { %5486 = vmatmul.msk.f32.gmra.mxu2 %vm413_vm0, %v353_v8  ;;  %v208_v8 = vld [vmem:[%s6296_s24 + $0x1f8] sm:$0xff] }
 0x1ec   : > { %v1322_v32 = vpop.f32.mrf.mxu0 }
 0x1ed   : > { %v1323_v37 = vadd.f32 %v6372_v40, %v1322_v32  ;;  %v206_v32 = vld [vmem:[%s6296_s24 + $0x1e8] sm:$0xff] }
 0x1ee   : > { %v6763_v41 = vpop.f32.mrf.mxu1 }
 0x1ef   : > { %v2008_v25 = vmax.f32 %v1323_v37, 0.0  ;;  %5335 = vmatmul.msk.f32.gmra.mxu0 %vm413_vm0, %v202_v36  ;;  %v6795_v39 = vpop.f32.mrf.mxu2 }
 0x1f0   : > { %8900 = vst [vmem:[#allocation14_spill] sm:$0xff] %v6795_v39 }
 0x1f1   : > { %5575 = vmatmul.msk.f32.gmra.mxu1 %vm2233_vm1, %v2008_v25 }
 0x1f2   : > { %5487 = vmatmul.msk.f32.gmra.mxu2 %vm413_vm0, %v354_v30 }
 0x1f4   : > { %v1325_v46 = vpop.f32.mrf.mxu0 }
 0x1f5   : > { %v1326_v18 = vadd.f32 %v6372_v40, %v1325_v46  ;;  %v355_v46 = vld [vmem:[%s6296_s24 + $0x690] sm:$0xff] }
 0x1f6   : > { %v6773_v52 = vpop.f32.mrf.mxu1 }
 0x1f7   : > { %v2009_v53 = vmax.f32 %v1326_v18, 0.0  ;;  %5336 = vmatmul.msk.f32.gmra.mxu0 %vm413_vm0, %v203_v7  ;;  %v6803_v45 = vpop.f32.mrf.mxu2  ;;  %v207_v18 = vld [vmem:[%s6296_s24 + $0x1f0] sm:$0xff] }
 0x1f8   : > { %8901 = vst [vmem:[#allocation15_spill] sm:$0xff] %v6803_v45 }
 0x1f9   : > { %5576 = vmatmul.msk.f32.gmra.mxu1 %vm2233_vm1, %v2009_v53 }
 0x1fa   : > { %5488 = vmatmul.msk.f32.gmra.mxu2 %vm413_vm0, %v355_v46  ;;  %v209_v46 = vld [vmem:[%s6296_s24 + $0x200] sm:$0xff] }
 0x1fc   : > { %v1328_v61 = vpop.f32.mrf.mxu0 }
 0x1fd   : > { %v1329_v63 = vadd.f32 %v6372_v40, %v1328_v61 }
 0x1fe   : > { %v6783_v4 = vpop.f32.mrf.mxu1 }
 0x1ff   : > { %v2010_v54 = vmax.f32 %v1329_v63, 0.0  ;;  %5337 = vmatmul.msk.f32.gmra.mxu0 %vm413_vm0, %v204_v60  ;;  %v6811_v60 = vpop.f32.mrf.mxu2  ;;  %v356_v63 = vld [vmem:[%s6296_s24 + $0x698] sm:$0xff] }
 0x200   : > { %8902 = vst [vmem:[#allocation16_spill] sm:$0xff] %v6811_v60 }
 0x201   : > { %5577 = vmatmul.msk.f32.gmra.mxu1 %vm2233_vm1, %v2010_v54 }
 0x202   : > { %5489 = vmatmul.msk.f32.gmra.mxu2 %vm413_vm0, %v356_v63 }
 0x204   : > { %v1331_v10 = vpop.f32.mrf.mxu0 }
 0x205   : > { %v1332_v17 = vadd.f32 %v6372_v40, %v1331_v10 }
 0x206   : > { %v3103_v21 = vpop.f32.mrf.mxu1 }
 0x207   : > { %v2011_v22 = vmax.f32 %v1332_v17, 0.0  ;;  %5338 = vmatmul.msk.f32.gmra.mxu0 %vm413_vm0, %v205_v62  ;;  %v3104_v63 = vadd.f32 %v6618_v55, %v3103_v21  ;;  %v6846_v21 = vld [vmem:[%s8887_s1 + $0x50] ss:$0 sm:$0xff] }
 0x209   : > { %5578 = vmatmul.msk.f32.gmra.mxu1 %vm2233_vm1, %v2011_v22 }
 0x20c   : > { %v1334_v26 = vpop.f32.mrf.mxu0 }
 0x20d   : > { %v1335_v36 = vadd.f32 %v6372_v40, %v1334_v26 }
 0x20e   : > { %v3106_v37 = vpop.f32.mrf.mxu1 }
 0x20f   : > { %v2012_v25 = vmax.f32 %v1335_v36, 0.0  ;;  %5339 = vmatmul.msk.f32.gmra.mxu0 %vm413_vm0, %v206_v32  ;;  %v6821_v32 = vpop.f32.mrf.mxu2  ;;  %v357_v36 = vld [vmem:[%s6296_s24 + $0x6a0] sm:$0xff] }
 0x210   : > { %8903 = vst [vmem:[#allocation17_spill] sm:$0xff] %v6821_v32  ;;  %5490 = vmatmul.msk.f32.gmra.mxu2 %vm413_vm0, %v357_v36  ;;  %v3098_v36 = vadd.f32 %v6618_v55, %v6773_v52 }
 0x211   : > { %5579 = vmatmul.msk.f32.gmra.mxu1 %vm2233_vm1, %v2012_v25 }
 0x214   : > { %v1337_v7 = vpop.f32.mrf.mxu0 }
 0x215   : > { %v1338_v53 = vadd.f32 %v6372_v40, %v1337_v7  ;;  %v3107_v7 = vadd.f32 %v6618_v55, %v3106_v37  ;;  %v210_v37 = vld [vmem:[%s6296_s24 + $0x208] sm:$0xff] }
 0x216   : > { %v3109_v11 = vpop.f32.mrf.mxu1 }
 0x217   : > { %v2013_v61 = vmax.f32 %v1338_v53, 0.0  ;;  %5340 = vmatmul.msk.f32.gmra.mxu0 %vm413_vm0, %v207_v18  ;;  %v3110_v30 = vadd.f32 %v6618_v55, %v3109_v11 }
 0x219   : > { %5580 = vmatmul.msk.f32.gmra.mxu1 %vm2233_vm1, %v2013_v61  ;;  %v3817_v18 = vmax.f32 %v3110_v30, 0.0 }
 0x21c   : > { %v1340_v54 = vpop.f32.mrf.mxu0 }
 0x21d   : > { %v1341_v10 = vadd.f32 %v6372_v40, %v1340_v54  ;;  %v3816_v54 = vmax.f32 %v3107_v7, 0.0 }
 0x21e   : > { %v3112_v62 = vpop.f32.mrf.mxu1 }
 0x21f   : > { %v2014_v17 = vmax.f32 %v1341_v10, 0.0  ;;  %v3113_v22 = vadd.f32 %v6618_v55, %v3112_v62  ;;  %5341 = vmatmul.msk.f32.gmra.mxu0 %vm413_vm0, %v208_v8  ;;  %v6835_v8 = vpop.f32.mrf.mxu2  ;;  %v358_v10 = vld [vmem:[%s6296_s24 + $0x6a8] sm:$0xff]  ;;  %v3101_v62 = vadd.f32 %v6618_v55, %v6783_v4 }
 0x220   : > { %8904 = vst [vmem:[#allocation18_spill] sm:$0xff] %v6835_v8  ;;  %5491 = vmatmul.msk.f32.gmra.mxu2 %vm413_vm0, %v358_v10  ;;  %v3092_v10 = vadd.f32 %v6618_v55, %v6753_v28 }
 0x221   : > { %v3818_v26 = vmax.f32 %v3113_v22, 0.0  ;;  %5581 = vmatmul.msk.f32.gmra.mxu1 %vm2233_vm1, %v2014_v17  ;;  %v3815_v17 = vmax.f32 %v3104_v63, 0.0  ;;  %v3814_v4 = vmax.f32 %v3101_v62, 0.0  ;;  %v360_v62 = vld [vmem:[%s6296_s24 + $0x6b8] sm:$0xff] }
 0x223   : > { %5807 = vmatpush.xpose.msk.msrb.mxu3 %vm2233_vm1, %v3818_v26 }
 0x224   : > { %v1343_v25 = vpop.f32.mrf.mxu0 }
 0x225   : > { %v1344_v53 = vadd.f32 %v6372_v40, %v1343_v25 }
 0x226   : > { %v6829_v11 = vpop.f32.mrf.mxu1 }
 0x227   : > { %v2015_v61 = vmax.f32 %v1344_v53, 0.0  ;;  %5342 = vmatmul.msk.f32.gmra.mxu0 %vm413_vm0, %v209_v46  ;;  %5808 = vmatpush.xpose.msk.msrb.mxu3 %vm2233_vm1, %v3817_v18  ;;  %v6856_v25 = vpop.f32.mrf.mxu2  ;;  %v359_v46 = vld [vmem:[%s6296_s24 + $0x6b0] sm:$0xff]  ;;  %v3095_v53 = vadd.f32 %v6618_v55, %v6763_v41 }
 0x228   : > { %8905 = vst [vmem:[#allocation19_spill] sm:$0xff] %v6856_v25  ;;  %5492 = vmatmul.msk.f32.gmra.mxu2 %vm413_vm0, %v359_v46  ;;  %v211_v18 = vld [vmem:[%s6296_s24 + $0x210] sm:$0xff]  ;;  %v3086_v46 = vadd.f32 %v6618_v55, %v6728_v59 }
 0x229   : > { %5582 = vmatmul.msk.f32.gmra.mxu1 %vm2233_vm1, %v2015_v61  ;;  %v3813_v61 = vmax.f32 %v3098_v36, 0.0 }
 0x22b   : > { %5809 = vmatpush.xpose.msk.msrb.mxu3 %vm2233_vm1, %v3816_v54 }
 0x22c   : > { %v1346_v40 = vpop.f32.mrf.mxu0 }
 0x22d   : > { %v1347_v22 = vadd.f32 %v6846_v21, %v1346_v40  ;;  %v3812_v40 = vmax.f32 %v3095_v53, 0.0  ;;  %v361_v53 = vld [vmem:[%s6296_s24 + $0x6c0] sm:$0xff] }
 0x22e   : > { %v6849_v30 = vpop.f32.mrf.mxu1 }
 0x22f   : > { %v2016_v26 = vmax.f32 %v1347_v22, 0.0  ;;  %5343 = vmatmul.msk.f32.gmra.mxu0 %vm413_vm0, %v210_v37  ;;  %5810 = vmatpush.xpose.msk.msrb.mxu3 %vm2233_vm1, %v3815_v17  ;;  %v6872_v37 = vpop.f32.mrf.mxu2  ;;  %v212_v17 = vld [vmem:[%s6296_s24 + $0x218] sm:$0xff]  ;;  %v3089_v22 = vadd.f32 %v6618_v55, %v6742_v14 }
 0x230   : > { %8906 = vst [vmem:[#allocation20_spill] sm:$0xff] %v6872_v37  ;;  %5493 = vmatmul.msk.f32.gmra.mxu2 %vm413_vm0, %v360_v62  ;;  %v3080_v62 = vadd.f32 %v6618_v55, %v6696_v24 }
 0x231   : > { %5583 = vmatmul.msk.f32.gmra.mxu1 %vm2233_vm1, %v2016_v26  ;;  %v3811_v26 = vmax.f32 %v3092_v10, 0.0 }
 0x233   : > { %5811 = vmatpush.xpose.msk.msrb.mxu3 %vm2233_vm1, %v3814_v4 }
 0x234   : > { %v1349_v7 = vpop.f32.mrf.mxu0 }
 0x235   : > { %v1350_v52 = vadd.f32 %v6846_v21, %v1349_v7  ;;  %v3810_v7 = vmax.f32 %v3089_v22, 0.0  ;;  %v362_v22 = vld [vmem:[%s6296_s24 + $0x6c8] sm:$0xff] }
 0x236   : > { %v6865_v63 = vpop.f32.mrf.mxu1 }
 0x237   : > { %v2017_v54 = vmax.f32 %v1350_v52, 0.0  ;;  %5344 = vmatmul.msk.f32.gmra.mxu0 %vm413_vm0, %v211_v18  ;;  %5812 = vmatpush.xpose.msk.msrb.mxu3 %vm2233_vm1, %v3813_v61  ;;  %v6888_v18 = vpop.f32.mrf.mxu2  ;;  %v213_v61 = vld [vmem:[%s6296_s24 + $0x220] sm:$0xff]  ;;  %v3083_v52 = vadd.f32 %v6618_v55, %v6712_v44 }
 0x238   : > { %8907 = vst [vmem:[#allocation21_spill] sm:$0xff] %v6888_v18  ;;  %5494 = vmatmul.msk.f32.gmra.mxu2 %vm413_vm0, %v361_v53  ;;  %v3074_v53 = vadd.f32 %v6618_v55, %v6664_v51 }
 0x239   : > { %5584 = vmatmul.msk.f32.gmra.mxu1 %vm2233_vm1, %v2017_v54  ;;  %v3809_v54 = vmax.f32 %v3086_v46, 0.0 }
 0x23b   : > { %5813 = vmatpush.xpose.msk.msrb.mxu3 %vm2233_vm1, %v3812_v40 }
 0x23c   : > { %v1352_v41 = vpop.f32.mrf.mxu0 }
 0x23d   : > { %v1353_v28 = vadd.f32 %v6846_v21, %v1352_v41  ;;  %v3808_v41 = vmax.f32 %v3083_v52, 0.0  ;;  %v363_v52 = vld [vmem:[%s6296_s24 + $0x6d0] sm:$0xff] }
 0x23e   : > { %v6881_v36 = vpop.f32.mrf.mxu1 }
 0x23f   : > { %v2018_v4 = vmax.f32 %v1353_v28, 0.0  ;;  %5345 = vmatmul.msk.f32.gmra.mxu0 %vm413_vm0, %v212_v17  ;;  %5814 = vmatpush.xpose.msk.msrb.mxu3 %vm2233_vm1, %v3811_v26  ;;  %v6904_v17 = vpop.f32.mrf.mxu2  ;;  %v214_v26 = vld [vmem:[%s6296_s24 + $0x228] sm:$0xff]  ;;  %v3077_v28 = vadd.f32 %v6618_v55, %v6680_v3 }
 0x240   : > { %8908 = vst [vmem:[#allocation22_spill] sm:$0xff] %v6904_v17  ;;  %5495 = vmatmul.msk.f32.gmra.mxu2 %vm413_vm0, %v362_v22  ;;  %v3068_v22 = vadd.f32 %v6618_v55, %v6633_v15 }
 0x241   : > { %5585 = vmatmul.msk.f32.gmra.mxu1 %vm2233_vm1, %v2018_v4  ;;  %v3807_v4 = vmax.f32 %v3080_v62, 0.0 }
 0x243   : > { %5815 = vmatpush.xpose.msk.msrb.mxu3 %vm2233_vm1, %v3810_v7 }
 0x244   : > { %v1355_v14 = vpop.f32.mrf.mxu0 }
 0x245   : > { %v1356_v59 = vadd.f32 %v6846_v21, %v1355_v14  ;;  %v3806_v14 = vmax.f32 %v3077_v28, 0.0 }
 0x246   : > { %v6897_v10 = vpop.f32.mrf.mxu1 }
 0x247   : > { %v2019_v40 = vmax.f32 %v1356_v59, 0.0  ;;  %5346 = vmatmul.msk.f32.gmra.mxu0 %vm413_vm0, %v213_v61  ;;  %5816 = vmatpush.xpose.msk.msrb.mxu3 %vm2233_vm1, %v3809_v54  ;;  %v6920_v61 = vpop.f32.mrf.mxu2  ;;  %v215_v54 = vld [vmem:[%s6296_s24 + $0x230] sm:$0xff]  ;;  %v3071_v59 = vadd.f32 %v6618_v55, %v6648_v35  ;;  %v364_v35 = vld [vmem:[%s6296_s24 + $0x6d8] sm:$0xff] }
 0x248   : > { %8909 = vst [vmem:[#allocation23_spill] sm:$0xff] %v6920_v61  ;;  %5496 = vmatmul.msk.f32.gmra.mxu2 %vm413_vm0, %v363_v52  ;;  %v365_v52 = vld [vmem:[%s6296_s24 + $0x6e0] sm:$0xff] }
 0x249   : > { %5586 = vmatmul.msk.f32.gmra.mxu1 %vm2233_vm1, %v2019_v40  ;;  %v3805_v40 = vmax.f32 %v3074_v53, 0.0 }
 0x24b   : > { %5817 = vmatpush.xpose.msk.msrb.mxu3 %vm2233_vm1, %v3808_v41 }
 0x24c   : > { %v1358_v44 = vpop.f32.mrf.mxu0 }
 0x24d   : > { %v1359_v24 = vadd.f32 %v6846_v21, %v1358_v44  ;;  %v3804_v44 = vmax.f32 %v3071_v59, 0.0 }
 0x24e   : > { %v6913_v46 = vpop.f32.mrf.mxu1 }
 0x24f   : > { %v2020_v7 = vmax.f32 %v1359_v24, 0.0  ;;  %5347 = vmatmul.msk.f32.gmra.mxu0 %vm413_vm0, %v214_v26  ;;  %5818 = vmatpush.xpose.msk.msrb.mxu3 %vm2233_vm1, %v3807_v4  ;;  %v6936_v26 = vpop.f32.mrf.mxu2  ;;  %v216_v4 = vld [vmem:[%s6296_s24 + $0x238] sm:$0xff]  ;;  %v3803_v24 = vmax.f32 %v3068_v22, 0.0  ;;  %v366_v22 = vld [vmem:[%s6296_s24 + $0x6e8] sm:$0xff] }
 0x250   : > { %8910 = vst [vmem:[#allocation24_spill] sm:$0xff] %v6936_v26  ;;  %5497 = vmatmul.msk.f32.gmra.mxu2 %vm413_vm0, %v364_v35  ;;  %v218_v35 = vld [vmem:[%s6296_s24 + $0x248] sm:$0xff] }
 0x251   : > { %5587 = vmatmul.msk.f32.gmra.mxu1 %vm2233_vm1, %v2020_v7 }
 0x253   : > { %5819 = vmatpush.xpose.msk.msrb.mxu3 %vm2233_vm1, %v3806_v14 }
 0x254   : > { %v1361_v3 = vpop.f32.mrf.mxu0 }
 0x255   : > { %v1362_v51 = vadd.f32 %v6846_v21, %v1361_v3 }
 0x256   : > { %v6929_v62 = vpop.f32.mrf.mxu1 }
 0x257   : > { %v2021_v41 = vmax.f32 %v1362_v51, 0.0  ;;  %5348 = vmatmul.msk.f32.gmra.mxu0 %vm413_vm0, %v215_v54  ;;  %5820 = vmatpush.xpose.msk.msrb.mxu3 %vm2233_vm1, %v3805_v40  ;;  %v6948_v14 = vpop.f32.mrf.mxu2  ;;  %v217_v54 = vld [vmem:[%s6296_s24 + $0x240] sm:$0xff] }
 0x258   : > { %8911 = vst [vmem:[#allocation25_spill] sm:$0xff] %v6948_v14  ;;  %5498 = vmatmul.msk.f32.gmra.mxu2 %vm413_vm0, %v365_v52 }
 0x259   : > { %5588 = vmatmul.msk.f32.gmra.mxu1 %vm2233_vm1, %v2021_v41 }
 0x25b   : > { %5821 = vmatpush.xpose.msk.msrb.mxu3 %vm2233_vm1, %v3804_v44 }
 0x25c   : > { %v1364_v28 = vpop.f32.mrf.mxu0 }
 0x25d   : > { %v1365_v7 = vadd.f32 %v6846_v21, %v1364_v28 }
 0x25e   : > { %v6943_v53 = vpop.f32.mrf.mxu1 }
 0x25f   : > { %v2022_v15 = vmax.f32 %v1365_v7, 0.0  ;;  %5349 = vmatmul.msk.f32.gmra.mxu0 %vm413_vm0, %v216_v4  ;;  %5822 = vmatpush.xpose.msk.msrb.mxu3 %vm2233_vm1, %v3803_v24  ;;  %v6958_v41 = vpop.f32.mrf.mxu2 }
 0x260   : > { %8912 = vst [vmem:[#allocation26_spill] sm:$0xff] %v6958_v41  ;;  %5499 = vmatmul.msk.f32.gmra.mxu2 %vm413_vm0, %v366_v22 }
 0x261   : > { %5589 = vmatmul.msk.f32.gmra.mxu1 %vm2233_vm1, %v2022_v15  ;;  %v367_v15 = vld [vmem:[%s6296_s24 + $0x6f0] sm:$0xff] }
 0x264   : > { %v1367_v3 = vpop.f32.mrf.mxu0 }
 0x265   : > { %v1368_v59 = vadd.f32 %v6846_v21, %v1367_v3  ;;  %v219_v3 = vld [vmem:[%s6296_s24 + $0x250] sm:$0xff] }
 0x266   : > { %v6954_v40 = vpop.f32.mrf.mxu1 }
 0x267   : > { %v2023_v51 = vmax.f32 %v1368_v59, 0.0  ;;  %5350 = vmatmul.msk.f32.gmra.mxu0 %vm413_vm0, %v217_v54  ;;  %v6968_v7 = vpop.f32.mrf.mxu2 }
 0x268   : > { %8913 = vst [vmem:[#allocation27_spill] sm:$0xff] %v6968_v7  ;;  %5500 = vmatmul.msk.f32.gmra.mxu2 %vm413_vm0, %v367_v15 }
 0x269   : > { %5590 = vmatmul.msk.f32.gmra.mxu1 %vm2233_vm1, %v2023_v51 }
 0x26c   : > { %v1370_v44 = vpop.f32.mrf.mxu0 }
 0x26d   : > { %v1371_v28 = vadd.f32 %v6846_v21, %v1370_v44  ;;  %v368_v44 = vld [vmem:[%s6296_s24 + $0x6f8] sm:$0xff] }
 0x26e   : > { %v6964_v4 = vpop.f32.mrf.mxu1 }
 0x26f   : > { %v2024_v24 = vmax.f32 %v1371_v28, 0.0  ;;  %5351 = vmatmul.msk.f32.gmra.mxu0 %vm413_vm0, %v218_v35  ;;  %v6978_v22 = vpop.f32.mrf.mxu2  ;;  %v220_v28 = vld [vmem:[%s6296_s24 + $0x258] sm:$0xff] }
 0x270   : > { %8914 = vst [vmem:[#allocation28_spill] sm:$0xff] %v6978_v22  ;;  %5501 = vmatmul.msk.f32.gmra.mxu2 %vm413_vm0, %v368_v44  ;;  %v221_v44 = vld [vmem:[%s6296_s24 + $0x260] sm:$0xff] }
 0x271   : > { %5591 = vmatmul.msk.f32.gmra.mxu1 %vm2233_vm1, %v2024_v24 }
 0x274   : > { %v1373_v52 = vpop.f32.mrf.mxu0 }
 0x275   : > { %v1374_v54 = vadd.f32 %v6846_v21, %v1373_v52 }
 0x276   : > { %v6974_v59 = vpop.f32.mrf.mxu1 }
 0x277   : > { %v2025_v51 = vmax.f32 %v1374_v54, 0.0  ;;  %5352 = vmatmul.msk.f32.gmra.mxu0 %vm413_vm0, %v219_v3  ;;  %v6988_v3 = vpop.f32.mrf.mxu2  ;;  %v369_v54 = vld [vmem:[%s6296_s24 + $0x700] sm:$0xff] }
 0x278   : > { %8915 = vst [vmem:[#allocation29_spill] sm:$0xff] %v6988_v3  ;;  %5502 = vmatmul.msk.f32.gmra.mxu2 %vm413_vm0, %v369_v54  ;;  %v222_v3 = vld [vmem:[%s6296_s24 + $0x268] sm:$0xff] }
 0x279   : > { %5592 = vmatmul.msk.f32.gmra.mxu1 %vm2233_vm1, %v2025_v51 }
 0x27c   : > { %v1376_v35 = vpop.f32.mrf.mxu0 }
 0x27d   : > { %v1377_v24 = vadd.f32 %v6846_v21, %v1376_v35 }
 0x27e   : > { %v6984_v15 = vpop.f32.mrf.mxu1 }
 0x27f   : > { %v2026_v52 = vmax.f32 %v1377_v24, 0.0  ;;  %5353 = vmatmul.msk.f32.gmra.mxu0 %vm413_vm0, %v220_v28  ;;  %v6996_v28 = vpop.f32.mrf.mxu2  ;;  %v370_v24 = vld [vmem:[%s6296_s24 + $0x708] sm:$0xff] }
 0x280   : > { %8916 = vst [vmem:[#allocation30_spill] sm:$0xff] %v6996_v28  ;;  %5503 = vmatmul.msk.f32.gmra.mxu2 %vm413_vm0, %v370_v24  ;;  %v223_v28 = vld [vmem:[%s6296_s24 + $0x270] sm:$0xff] }
 0x281   : > { %5593 = vmatmul.msk.f32.gmra.mxu1 %vm2233_vm1, %v2026_v52 }
 0x284   : > { %v1379_v51 = vpop.f32.mrf.mxu0 }
 0x285   : > { %v1380_v22 = vadd.f32 %v6846_v21, %v1379_v51 }
 0x286   : > { %v3151_v35 = vpop.f32.mrf.mxu1 }
 0x287   : > { %v2027_v7 = vmax.f32 %v1380_v22, 0.0  ;;  %5354 = vmatmul.msk.f32.gmra.mxu0 %vm413_vm0, %v221_v44  ;;  %v7004_v22 = vpop.f32.mrf.mxu2 }
 0x288   : > { %8917 = vst [vmem:[#allocation31_spill] sm:$0xff] %v7004_v22 }
 0x289   : > { %5594 = vmatmul.msk.f32.gmra.mxu1 %vm2233_vm1, %v2027_v7  ;;  %v371_v7 = vld [vmem:[%s6296_s24 + $0x710] sm:$0xff] }
 0x28a   : > { %5504 = vmatmul.msk.f32.gmra.mxu2 %vm413_vm0, %v371_v7 }
 0x28c   : > { %v1382_v52 = vpop.f32.mrf.mxu0 }
 0x28d   : > { %v1383_v54 = vadd.f32 %v6846_v21, %v1382_v52  ;;  %v372_v52 = vld [vmem:[%s6296_s24 + $0x718] sm:$0xff] }
 0x28e   : > { %v3154_v41 = vpop.f32.mrf.mxu1 }
 0x28f   : > { %v2028_v51 = vmax.f32 %v1383_v54, 0.0  ;;  %5355 = vmatmul.msk.f32.gmra.mxu0 %vm413_vm0, %v222_v3  ;;  %v7012_v3 = vpop.f32.mrf.mxu2 }
 0x290   : > { %8918 = vst [vmem:[#allocation32_spill] sm:$0xff] %v7012_v3  ;;  %v373_v3 = vld [vmem:[%s6296_s24 + $0x720] sm:$0xff] }
 0x291   : > { %5595 = vmatmul.msk.f32.gmra.mxu1 %vm2233_vm1, %v2028_v51  ;;  %v224_v51 = vld [vmem:[%s6296_s24 + $0x278] sm:$0xff] }
 0x292   : > { %5505 = vmatmul.msk.f32.gmra.mxu2 %vm413_vm0, %v372_v52 }
 0x294   : > { %v1385_v44 = vpop.f32.mrf.mxu0 }
 0x295   : > { %v1386_v24 = vadd.f32 %v6846_v21, %v1385_v44 }
 0x296   : > { %v3157_v14 = vpop.f32.mrf.mxu1 }
 0x297   : > { %v2029_v26 = vmax.f32 %v1386_v24, 0.0  ;;  %5356 = vmatmul.msk.f32.gmra.mxu0 %vm413_vm0, %v223_v28  ;;  %v3158_v28 = vadd.f32 %v6618_v55, %v3157_v14 }
 0x299   : > { %5596 = vmatmul.msk.f32.gmra.mxu1 %vm2233_vm1, %v2029_v26  ;;  %v7022_v26 = vpop.f32.mrf.mxu2 }
 0x29a   : > { %8919 = vst [vmem:[#allocation33_spill] sm:$0xff] %v7022_v26  ;;  %5506 = vmatmul.msk.f32.gmra.mxu2 %vm413_vm0, %v373_v3  ;;  %v374_v26 = vld [vmem:[%s6296_s24 + $0x728] sm:$0xff] }
 0x29c   : > { %v1388_v54 = vpop.f32.mrf.mxu0 }
 0x29d   : > { %v1389_v7 = vadd.f32 %v6846_v21, %v1388_v54  ;;  %v225_v54 = vld [vmem:[%s6296_s24 + $0x280] sm:$0xff] }
 0x29e   : > { %v3160_v22 = vpop.f32.mrf.mxu1 }
 0x29f   : > { %v2030_v61 = vmax.f32 %v1389_v7, 0.0  ;;  %v3161_v44 = vadd.f32 %v6618_v55, %v3160_v22  ;;  %5357 = vmatmul.msk.f32.gmra.mxu0 %vm413_vm0, %v224_v51  ;;  %v3155_v22 = vadd.f32 %v6618_v55, %v3154_v41  ;;  %v3833_v7 = vmax.f32 %v3158_v28, 0.0  ;;  %v226_v28 = vld [vmem:[%s6296_s24 + $0x288] sm:$0xff] }
 0x2a1   : > { %v3834_v24 = vmax.f32 %v3161_v44, 0.0  ;;  %5597 = vmatmul.msk.f32.gmra.mxu1 %vm2233_vm1, %v2030_v61  ;;  %v3152_v61 = vadd.f32 %v6618_v55, %v3151_v35  ;;  %v3832_v3 = vmax.f32 %v3155_v22, 0.0 }
 0x2a3   : > { %5824 = vmatpush.xpose.msk.msra.mxu2 %vm2233_vm1, %v3834_v24  ;;  %v7036_v24 = vpop.f32.mrf.mxu2 }
 0x2a4   : > { %v1391_v52 = vpop.f32.mrf.mxu0  ;;  %8920 = vst [vmem:[#allocation34_spill] sm:$0xff] %v7036_v24  ;;  %5507 = vmatmul.msk.f32.gmra.mxu2 %vm413_vm0, %v374_v26  ;;  %v3146_v26 = vadd.f32 %v6618_v55, %v6974_v59 }
 0x2a5   : > { %v1392_v51 = vadd.f32 %v6846_v21, %v1391_v52  ;;  %v3149_v52 = vadd.f32 %v6618_v55, %v6984_v15 }
 0x2a6   : > { %v7030_v14 = vpop.f32.mrf.mxu1 }
 0x2a7   : > { %v2031_v44 = vmax.f32 %v1392_v51, 0.0  ;;  %5358 = vmatmul.msk.f32.gmra.mxu0 %vm413_vm0, %v225_v54  ;;  %5825 = vmatpush.xpose.msk.msra.mxu2 %vm2233_vm1, %v3833_v7  ;;  %v3831_v54 = vmax.f32 %v3152_v61, 0.0  ;;  %v3830_v51 = vmax.f32 %v3149_v52, 0.0  ;;  %v227_v61 = vld [vmem:[%s6296_s24 + $0x290] sm:$0xff] }
 0x2a9   : > { %5598 = vmatmul.msk.f32.gmra.mxu1 %vm2233_vm1, %v2031_v44 }
 0x2ab   : > { %5826 = vmatpush.xpose.msk.msra.mxu2 %vm2233_vm1, %v3832_v3  ;;  %v7052_v44 = vpop.f32.mrf.mxu2  ;;  %v375_v3 = vld [vmem:[%s6296_s24 + $0x730] sm:$0xff] }
 0x2ac   : > { %v1394_v41 = vpop.f32.mrf.mxu0  ;;  %8921 = vst [vmem:[#allocation35_spill] sm:$0xff] %v7052_v44  ;;  %5508 = vmatmul.msk.f32.gmra.mxu2 %vm413_vm0, %v375_v3  ;;  %v376_v3 = vld [vmem:[%s6296_s24 + $0x738] sm:$0xff] }
 0x2ad   : > { %v1395_v35 = vadd.f32 %v6846_v21, %v1394_v41  ;;  %v3143_v41 = vadd.f32 %v6618_v55, %v6964_v4 }
 0x2ae   : > { %v7045_v22 = vpop.f32.mrf.mxu1 }
 0x2af   : > { %v2032_v7 = vmax.f32 %v1395_v35, 0.0  ;;  %5359 = vmatmul.msk.f32.gmra.mxu0 %vm413_vm0, %v226_v28  ;;  %5827 = vmatpush.xpose.msk.msra.mxu2 %vm2233_vm1, %v3831_v54  ;;  %v3829_v28 = vmax.f32 %v3146_v26, 0.0  ;;  %v3140_v35 = vadd.f32 %v6618_v55, %v6954_v40  ;;  %v228_v26 = vld [vmem:[%s6296_s24 + $0x298] sm:$0xff] }
 0x2b1   : > { %5599 = vmatmul.msk.f32.gmra.mxu1 %vm2233_vm1, %v2032_v7  ;;  %v3828_v7 = vmax.f32 %v3143_v41, 0.0 }
 0x2b3   : > { %5828 = vmatpush.xpose.msk.msra.mxu2 %vm2233_vm1, %v3830_v51  ;;  %v7068_v51 = vpop.f32.mrf.mxu2 }
 0x2b4   : > { %v1397_v15 = vpop.f32.mrf.mxu0  ;;  %8922 = vst [vmem:[#allocation36_spill] sm:$0xff] %v7068_v51  ;;  %5509 = vmatmul.msk.f32.gmra.mxu2 %vm413_vm0, %v376_v3  ;;  %v377_v3 = vld [vmem:[%s6296_s24 + $0x740] sm:$0xff] }
 0x2b5   : > { %v1398_v59 = vadd.f32 %v6846_v21, %v1397_v15  ;;  %v3137_v15 = vadd.f32 %v6618_v55, %v6943_v53 }
 0x2b6   : > { %v7061_v52 = vpop.f32.mrf.mxu1 }
 0x2b7   : > { %v2033_v54 = vmax.f32 %v1398_v59, 0.0  ;;  %5360 = vmatmul.msk.f32.gmra.mxu0 %vm413_vm0, %v227_v61  ;;  %5829 = vmatpush.xpose.msk.msra.mxu2 %vm2233_vm1, %v3829_v28  ;;  %v3827_v61 = vmax.f32 %v3140_v35, 0.0  ;;  %v3134_v59 = vadd.f32 %v6618_v55, %v6929_v62  ;;  %v229_v35 = vld [vmem:[%s6296_s24 + $0x2a0] sm:$0xff] }
 0x2b9   : > { %5600 = vmatmul.msk.f32.gmra.mxu1 %vm2233_vm1, %v2033_v54  ;;  %v3826_v54 = vmax.f32 %v3137_v15, 0.0 }
 0x2bb   : > { %5830 = vmatpush.xpose.msk.msra.mxu2 %vm2233_vm1, %v3828_v7  ;;  %v7084_v7 = vpop.f32.mrf.mxu2 }
 0x2bc   : > { %v1400_v4 = vpop.f32.mrf.mxu0  ;;  %8923 = vst [vmem:[#allocation37_spill] sm:$0xff] %v7084_v7  ;;  %5510 = vmatmul.msk.f32.gmra.mxu2 %vm413_vm0, %v377_v3  ;;  %v378_v3 = vld [vmem:[%s6296_s24 + $0x748] sm:$0xff] }
 0x2bd   : > { %v1401_v40 = vadd.f32 %v6846_v21, %v1400_v4  ;;  %v3131_v4 = vadd.f32 %v6618_v55, %v6913_v46 }
 0x2be   : > { %v7077_v41 = vpop.f32.mrf.mxu1 }
 0x2bf   : > { %v2034_v28 = vmax.f32 %v1401_v40, 0.0  ;;  %5361 = vmatmul.msk.f32.gmra.mxu0 %vm413_vm0, %v228_v26  ;;  %5831 = vmatpush.xpose.msk.msra.mxu2 %vm2233_vm1, %v3827_v61  ;;  %v3825_v26 = vmax.f32 %v3134_v59, 0.0  ;;  %v3128_v40 = vadd.f32 %v6618_v55, %v6897_v10  ;;  %v230_v59 = vld [vmem:[%s6296_s24 + $0x2a8] sm:$0xff] }
 0x2c1   : > { %5601 = vmatmul.msk.f32.gmra.mxu1 %vm2233_vm1, %v2034_v28  ;;  %v3824_v28 = vmax.f32 %v3131_v4, 0.0 }
 0x2c3   : > { %5832 = vmatpush.xpose.msk.msra.mxu2 %vm2233_vm1, %v3826_v54  ;;  %v7100_v54 = vpop.f32.mrf.mxu2 }
 0x2c4   : > { %v1403_v53 = vpop.f32.mrf.mxu0  ;;  %8924 = vst [vmem:[#allocation38_spill] sm:$0xff] %v7100_v54  ;;  %5511 = vmatmul.msk.f32.gmra.mxu2 %vm413_vm0, %v378_v3  ;;  %v231_v3 = vld [vmem:[%s6296_s24 + $0x2b0] sm:$0xff] }
 0x2c5   : > { %v1404_v62 = vadd.f32 %v6846_v21, %v1403_v53  ;;  %v3125_v53 = vadd.f32 %v6618_v55, %v6881_v36 }
 0x2c6   : > { %v7093_v15 = vpop.f32.mrf.mxu1 }
 0x2c7   : > { %v2035_v61 = vmax.f32 %v1404_v62, 0.0  ;;  %5362 = vmatmul.msk.f32.gmra.mxu0 %vm413_vm0, %v229_v35  ;;  %5833 = vmatpush.xpose.msk.msra.mxu2 %vm2233_vm1, %v3825_v26  ;;  %v3823_v35 = vmax.f32 %v3128_v40, 0.0  ;;  %v7116_v62 = vld [vmem:[%s8887_s1 + $0x98] ss:$0 sm:$0xff]  ;;  %v3822_v55 = vmax.f32 %v3125_v53, 0.0  ;;  %v379_v40 = vld [vmem:[%s6296_s24 + $0x750] sm:$0xff] }
 0x2c9   : > { %5602 = vmatmul.msk.f32.gmra.mxu1 %vm2233_vm1, %v2035_v61  ;;  %v3122_v61 = vadd.f32 %v7116_v62, %v6865_v63 }
 0x2cb   : > { %5834 = vmatpush.xpose.msk.msra.mxu2 %vm2233_vm1, %v3824_v28  ;;  %v7121_v36 = vpop.f32.mrf.mxu2 }
 0x2cc   : > { %v1406_v46 = vpop.f32.mrf.mxu0  ;;  %8925 = vst [vmem:[#allocation39_spill] sm:$0xff] %v7121_v36  ;;  %5512 = vmatmul.msk.f32.gmra.mxu2 %vm413_vm0, %v379_v40  ;;  %v232_v40 = vld [vmem:[%s6296_s24 + $0x2b8] sm:$0xff] }
 0x2cd   : > { %v1407_v10 = vadd.f32 %v6846_v21, %v1406_v46  ;;  %v3119_v46 = vadd.f32 %v7116_v62, %v6849_v30  ;;  %v380_v30 = vld [vmem:[%s6296_s24 + $0x758] sm:$0xff] }
 0x2ce   : > { %v7109_v4 = vpop.f32.mrf.mxu1 }
 0x2cf   : > { %v2036_v26 = vmax.f32 %v1407_v10, 0.0  ;;  %5363 = vmatmul.msk.f32.gmra.mxu0 %vm413_vm0, %v230_v59  ;;  %5835 = vmatpush.xpose.msk.msra.mxu2 %vm2233_vm1, %v3823_v35  ;;  %v3821_v59 = vmax.f32 %v3122_v61, 0.0  ;;  %v3116_v10 = vadd.f32 %v7116_v62, %v6829_v11 }
 0x2d1   : > { %5603 = vmatmul.msk.f32.gmra.mxu1 %vm2233_vm1, %v2036_v26  ;;  %v3820_v26 = vmax.f32 %v3119_v46, 0.0 }
 0x2d3   : > { %5836 = vmatpush.xpose.msk.msra.mxu2 %vm2233_vm1, %v3822_v55  ;;  %v7137_v55 = vpop.f32.mrf.mxu2 }
 0x2d4   : > { %v1409_v28 = vpop.f32.mrf.mxu0  ;;  %8926 = vst [vmem:[#allocation40_spill] sm:$0xff] %v7137_v55  ;;  %5513 = vmatmul.msk.f32.gmra.mxu2 %vm413_vm0, %v380_v30 }
 0x2d5   : > { %v1410_v63 = vadd.f32 %v6846_v21, %v1409_v28  ;;  %v3819_v28 = vmax.f32 %v3116_v10, 0.0  ;;  %v233_v10 = vld [vmem:[%s6296_s24 + $0x2c0] sm:$0xff] }
 0x2d6   : > { %v7130_v53 = vpop.f32.mrf.mxu1 }
 0x2d7   : > { %v2037_v35 = vmax.f32 %v1410_v63, 0.0  ;;  %5364 = vmatmul.msk.f32.gmra.mxu0 %vm413_vm0, %v231_v3  ;;  %5837 = vmatpush.xpose.msk.msra.mxu2 %vm2233_vm1, %v3821_v59  ;;  %v381_v63 = vld [vmem:[%s6296_s24 + $0x760] sm:$0xff] }
 0x2d9   : > { %5604 = vmatmul.msk.f32.gmra.mxu1 %vm2233_vm1, %v2037_v35 }
 0x2db   : > { %5838 = vmatpush.xpose.msk.msra.mxu2 %vm2233_vm1, %v3820_v26  ;;  %v7149_v46 = vpop.f32.mrf.mxu2 }
 0x2dc   : > { %v1412_v61 = vpop.f32.mrf.mxu0  ;;  %8927 = vst [vmem:[#allocation41_spill] sm:$0xff] %v7149_v46  ;;  %5514 = vmatmul.msk.f32.gmra.mxu2 %vm413_vm0, %v381_v63 }
 0x2dd   : > { %v1413_v3 = vadd.f32 %v6846_v21, %v1412_v61 }
 0x2de   : > { %v7144_v59 = vpop.f32.mrf.mxu1 }
 0x2df   : > { %v2038_v11 = vmax.f32 %v1413_v3, 0.0  ;;  %5365 = vmatmul.msk.f32.gmra.mxu0 %vm413_vm0, %v232_v40  ;;  %5839 = vmatpush.xpose.msk.msra.mxu2 %vm2233_vm1, %v3819_v28  ;;  %v382_v28 = vld [vmem:[%s6296_s24 + $0x768] sm:$0xff] }
 0x2e1   : > { %5605 = vmatmul.msk.f32.gmra.mxu1 %vm2233_vm1, %v2038_v11  ;;  %v234_v11 = vld [vmem:[%s6296_s24 + $0x2c8] sm:$0xff] }
 0x2e3   : > { %v7159_v40 = vpop.f32.mrf.mxu2 }
 0x2e4   : > { %v1415_v35 = vpop.f32.mrf.mxu0  ;;  %8928 = vst [vmem:[#allocation42_spill] sm:$0xff] %v7159_v40  ;;  %5515 = vmatmul.msk.f32.gmra.mxu2 %vm413_vm0, %v382_v28  ;;  %v235_v28 = vld [vmem:[%s6296_s24 + $0x2d0] sm:$0xff] }
 0x2e5   : > { %v1416_v26 = vadd.f32 %v6846_v21, %v1415_v35 }
 0x2e6   : > { %v7155_v30 = vpop.f32.mrf.mxu1 }
 0x2e7   : > { %v2039_v61 = vmax.f32 %v1416_v26, 0.0  ;;  %5366 = vmatmul.msk.f32.gmra.mxu0 %vm413_vm0, %v233_v10  ;;  %v383_v26 = vld [vmem:[%s6296_s24 + $0x770] sm:$0xff] }
 0x2e9   : > { %5606 = vmatmul.msk.f32.gmra.mxu1 %vm2233_vm1, %v2039_v61 }
 0x2eb   : > { %v7169_v10 = vpop.f32.mrf.mxu2 }
 0x2ec   : > { %v1418_v3 = vpop.f32.mrf.mxu0  ;;  %8929 = vst [vmem:[#allocation43_spill] sm:$0xff] %v7169_v10  ;;  %5516 = vmatmul.msk.f32.gmra.mxu2 %vm413_vm0, %v383_v26  ;;  %v236_v26 = vld [vmem:[%s6296_s24 + $0x2d8] sm:$0xff] }
 0x2ed   : > { %v1419_v63 = vadd.f32 %v6846_v21, %v1418_v3 }
 0x2ee   : > { %v7165_v35 = vpop.f32.mrf.mxu1 }
 0x2ef   : > { %v2040_v46 = vmax.f32 %v1419_v63, 0.0  ;;  %5367 = vmatmul.msk.f32.gmra.mxu0 %vm413_vm0, %v234_v11 }
 0x2f1   : > { %5607 = vmatmul.msk.f32.gmra.mxu1 %vm2233_vm1, %v2040_v46  ;;  %v384_v46 = vld [vmem:[%s6296_s24 + $0x778] sm:$0xff] }
 0x2f3   : > { %v7179_v11 = vpop.f32.mrf.mxu2 }
 0x2f4   : > { %v1421_v61 = vpop.f32.mrf.mxu0  ;;  %8930 = vst [vmem:[#allocation44_spill] sm:$0xff] %v7179_v11  ;;  %5517 = vmatmul.msk.f32.gmra.mxu2 %vm413_vm0, %v384_v46  ;;  %v237_v46 = vld [vmem:[%s6296_s24 + $0x2e0] sm:$0xff] }
 0x2f5   : > { %v1422_v40 = vadd.f32 %v6846_v21, %v1421_v61 }
 0x2f6   : > { %v7175_v3 = vpop.f32.mrf.mxu1 }
 0x2f7   : > { %v2041_v55 = vmax.f32 %v1422_v40, 0.0  ;;  %5368 = vmatmul.msk.f32.gmra.mxu0 %vm413_vm0, %v235_v28 }
 0x2f9   : > { %5608 = vmatmul.msk.f32.gmra.mxu1 %vm2233_vm1, %v2041_v55  ;;  %v385_v55 = vld [vmem:[%s6296_s24 + $0x780] sm:$0xff] }
 0x2fb   : > { %v7189_v40 = vpop.f32.mrf.mxu2 }
 0x2fc   : > { %v1424_v63 = vpop.f32.mrf.mxu0  ;;  %8931 = vst [vmem:[#allocation45_spill] sm:$0xff] %v7189_v40  ;;  %5518 = vmatmul.msk.f32.gmra.mxu2 %vm413_vm0, %v385_v55  ;;  %v238_v55 = vld [vmem:[%s6296_s24 + $0x2e8] sm:$0xff] }
 0x2fd   : > { %v1425_v10 = vadd.f32 %v6846_v21, %v1424_v63 }
 0x2fe   : > { %v7185_v61 = vpop.f32.mrf.mxu1 }
 0x2ff   : > { %v2042_v36 = vmax.f32 %v1425_v10, 0.0  ;;  %5369 = vmatmul.msk.f32.gmra.mxu0 %vm413_vm0, %v236_v26 }
 0x301   : > { %5609 = vmatmul.msk.f32.gmra.mxu1 %vm2233_vm1, %v2042_v36  ;;  %v386_v36 = vld [vmem:[%s6296_s24 + $0x788] sm:$0xff] }
 0x303   : > { %v7199_v10 = vpop.f32.mrf.mxu2 }
 0x304   : > { %v1427_v28 = vpop.f32.mrf.mxu0  ;;  %8932 = vst [vmem:[#allocation46_spill] sm:$0xff] %v7199_v10  ;;  %5519 = vmatmul.msk.f32.gmra.mxu2 %vm413_vm0, %v386_v36  ;;  %v239_v36 = vld [vmem:[%s6296_s24 + $0x2f0] sm:$0xff] }
 0x305   : > { %v1428_v11 = vadd.f32 %v6846_v21, %v1427_v28 }
 0x306   : > { %v7195_v63 = vpop.f32.mrf.mxu1 }
 0x307   : > { %v2043_v54 = vmax.f32 %v1428_v11, 0.0  ;;  %5370 = vmatmul.msk.f32.gmra.mxu0 %vm413_vm0, %v237_v46 }
 0x309   : > { %5610 = vmatmul.msk.f32.gmra.mxu1 %vm2233_vm1, %v2043_v54  ;;  %v387_v54 = vld [vmem:[%s6296_s24 + $0x790] sm:$0xff] }
 0x30b   : > { %v7209_v11 = vpop.f32.mrf.mxu2 }
 0x30c   : > { %v1430_v26 = vpop.f32.mrf.mxu0  ;;  %8933 = vst [vmem:[#allocation47_spill] sm:$0xff] %v7209_v11  ;;  %5520 = vmatmul.msk.f32.gmra.mxu2 %vm413_vm0, %v387_v54  ;;  %v240_v54 = vld [vmem:[%s6296_s24 + $0x2f8] sm:$0xff] }
 0x30d   : > { %v1431_v40 = vadd.f32 %v6846_v21, %v1430_v26 }
 0x30e   : > { %v7205_v28 = vpop.f32.mrf.mxu1 }
 0x30f   : > { %v2044_v7 = vmax.f32 %v1431_v40, 0.0  ;;  %5371 = vmatmul.msk.f32.gmra.mxu0 %vm413_vm0, %v238_v55 }
 0x311   : > { %5611 = vmatmul.msk.f32.gmra.mxu1 %vm2233_vm1, %v2044_v7  ;;  %v388_v7 = vld [vmem:[%s6296_s24 + $0x798] sm:$0xff] }
 0x313   : > { %v7219_v40 = vpop.f32.mrf.mxu2 }
 0x314   : > { %v1433_v46 = vpop.f32.mrf.mxu0  ;;  %8934 = vst [vmem:[#allocation48_spill] sm:$0xff] %v7219_v40  ;;  %5521 = vmatmul.msk.f32.gmra.mxu2 %vm413_vm0, %v388_v7  ;;  %v241_v7 = vld [vmem:[%s6296_s24 + $0x300] sm:$0xff] }
 0x315   : > { %v1434_v10 = vadd.f32 %v6846_v21, %v1433_v46 }
 0x316   : > { %v7215_v26 = vpop.f32.mrf.mxu1 }
 0x317   : > { %v2045_v51 = vmax.f32 %v1434_v10, 0.0  ;;  %5372 = vmatmul.msk.f32.gmra.mxu0 %vm413_vm0, %v239_v36 }
 0x319   : > { %5612 = vmatmul.msk.f32.gmra.mxu1 %vm2233_vm1, %v2045_v51  ;;  %v389_v51 = vld [vmem:[%s6296_s24 + $0x7a0] sm:$0xff] }
 0x31b   : > { %v7229_v10 = vpop.f32.mrf.mxu2 }
 0x31c   : > { %v1436_v55 = vpop.f32.mrf.mxu0  ;;  %8935 = vst [vmem:[#allocation49_spill] sm:$0xff] %v7229_v10  ;;  %5522 = vmatmul.msk.f32.gmra.mxu2 %vm413_vm0, %v389_v51  ;;  %v242_v51 = vld [vmem:[%s6296_s24 + $0x308] sm:$0xff] }
 0x31d   : > { %v1437_v11 = vadd.f32 %v6846_v21, %v1436_v55 }
 0x31e   : > { %v7225_v46 = vpop.f32.mrf.mxu1 }
 0x31f   : > { %v2046_v44 = vmax.f32 %v1437_v11, 0.0  ;;  %5373 = vmatmul.msk.f32.gmra.mxu0 %vm413_vm0, %v240_v54 }
 0x321   : > { %5613 = vmatmul.msk.f32.gmra.mxu1 %vm2233_vm1, %v2046_v44  ;;  %v390_v44 = vld [vmem:[%s6296_s24 + $0x7a8] sm:$0xff] }
 0x323   : > { %v7239_v11 = vpop.f32.mrf.mxu2 }
 0x324   : > { %v1439_v36 = vpop.f32.mrf.mxu0  ;;  %8936 = vst [vmem:[#allocation50_spill] sm:$0xff] %v7239_v11  ;;  %5523 = vmatmul.msk.f32.gmra.mxu2 %vm413_vm0, %v390_v44  ;;  %v243_v44 = vld [vmem:[%s6296_s24 + $0x310] sm:$0xff] }
 0x325   : > { %v1440_v40 = vadd.f32 %v6846_v21, %v1439_v36 }
 0x326   : > { %v7235_v55 = vpop.f32.mrf.mxu1 }
 0x327   : > { %v2047_v24 = vmax.f32 %v1440_v40, 0.0  ;;  %5374 = vmatmul.msk.f32.gmra.mxu0 %vm413_vm0, %v241_v7 }
 0x329   : > { %5614 = vmatmul.msk.f32.gmra.mxu1 %vm2233_vm1, %v2047_v24  ;;  %v391_v24 = vld [vmem:[%s6296_s24 + $0x7b0] sm:$0xff] }
 0x32b   : > { %v7249_v40 = vpop.f32.mrf.mxu2 }
 0x32c   : > { %v1442_v54 = vpop.f32.mrf.mxu0  ;;  %8937 = vst [vmem:[#allocation51_spill] sm:$0xff] %v7249_v40  ;;  %5524 = vmatmul.msk.f32.gmra.mxu2 %vm413_vm0, %v391_v24  ;;  %v244_v24 = vld [vmem:[%s6296_s24 + $0x318] sm:$0xff] }
 0x32d   : > { %v1443_v10 = vadd.f32 %v6846_v21, %v1442_v54 }
 0x32e   : > { %v7245_v36 = vpop.f32.mrf.mxu1 }
 0x32f   : > { %v2048_v17 = vmax.f32 %v1443_v10, 0.0  ;;  %5375 = vmatmul.msk.f32.gmra.mxu0 %vm413_vm0, %v242_v51 }
 0x331   : > { %5615 = vmatmul.msk.f32.gmra.mxu1 %vm2233_vm1, %v2048_v17  ;;  %v392_v17 = vld [vmem:[%s6296_s24 + $0x7b8] sm:$0xff] }
 0x333   : > { %v7259_v10 = vpop.f32.mrf.mxu2 }
 0x334   : > { %v1445_v7 = vpop.f32.mrf.mxu0  ;;  %8938 = vst [vmem:[#allocation52_spill] sm:$0xff] %v7259_v10  ;;  %5525 = vmatmul.msk.f32.gmra.mxu2 %vm413_vm0, %v392_v17  ;;  %v245_v17 = vld [vmem:[%s6296_s24 + $0x320] sm:$0xff] }
 0x335   : > { %v1446_v11 = vadd.f32 %v6846_v21, %v1445_v7 }
 0x336   : > { %v7255_v54 = vpop.f32.mrf.mxu1 }
 0x337   : > { %v2049_v18 = vmax.f32 %v1446_v11, 0.0  ;;  %5376 = vmatmul.msk.f32.gmra.mxu0 %vm413_vm0, %v243_v44 }
 0x339   : > { %5616 = vmatmul.msk.f32.gmra.mxu1 %vm2233_vm1, %v2049_v18  ;;  %v393_v18 = vld [vmem:[%s6296_s24 + $0x7c0] sm:$0xff] }
 0x33b   : > { %v7269_v11 = vpop.f32.mrf.mxu2 }
 0x33c   : > { %v1448_v51 = vpop.f32.mrf.mxu0  ;;  %8939 = vst [vmem:[#allocation53_spill] sm:$0xff] %v7269_v11  ;;  %5526 = vmatmul.msk.f32.gmra.mxu2 %vm413_vm0, %v393_v18  ;;  %v246_v18 = vld [vmem:[%s6296_s24 + $0x328] sm:$0xff] }
 0x33d   : > { %v1449_v40 = vadd.f32 %v6846_v21, %v1448_v51 }
 0x33e   : > { %v7265_v7 = vpop.f32.mrf.mxu1 }
 0x33f   : > { %v2050_v37 = vmax.f32 %v1449_v40, 0.0  ;;  %5377 = vmatmul.msk.f32.gmra.mxu0 %vm413_vm0, %v244_v24 }
 0x341   : > { %5617 = vmatmul.msk.f32.gmra.mxu1 %vm2233_vm1, %v2050_v37  ;;  %v394_v37 = vld [vmem:[%s6296_s24 + $0x7c8] sm:$0xff] }
 0x343   : > { %v7279_v40 = vpop.f32.mrf.mxu2 }
 0x344   : > { %v1451_v44 = vpop.f32.mrf.mxu0  ;;  %8940 = vst [vmem:[#allocation54_spill] sm:$0xff] %v7279_v40  ;;  %5527 = vmatmul.msk.f32.gmra.mxu2 %vm413_vm0, %v394_v37  ;;  %v247_v37 = vld [vmem:[%s6296_s24 + $0x330] sm:$0xff] }
 0x345   : > { %v1452_v10 = vadd.f32 %v6846_v21, %v1451_v44 }
 0x346   : > { %v7275_v51 = vpop.f32.mrf.mxu1 }
 0x347   : > { %v2051_v25 = vmax.f32 %v1452_v10, 0.0  ;;  %5378 = vmatmul.msk.f32.gmra.mxu0 %vm413_vm0, %v245_v17 }
 0x349   : > { %5618 = vmatmul.msk.f32.gmra.mxu1 %vm2233_vm1, %v2051_v25  ;;  %v395_v25 = vld [vmem:[%s6296_s24 + $0x7d0] sm:$0xff] }
 0x34b   : > { %v7289_v10 = vpop.f32.mrf.mxu2 }
 0x34c   : > { %v1454_v24 = vpop.f32.mrf.mxu0  ;;  %8941 = vst [vmem:[#allocation55_spill] sm:$0xff] %v7289_v10  ;;  %5528 = vmatmul.msk.f32.gmra.mxu2 %vm413_vm0, %v395_v25  ;;  %v248_v25 = vld [vmem:[%s6296_s24 + $0x338] sm:$0xff] }
 0x34d   : > { %v1455_v11 = vadd.f32 %v6846_v21, %v1454_v24 }
 0x34e   : > { %v7285_v44 = vpop.f32.mrf.mxu1 }
 0x34f   : > { %v2052_v8 = vmax.f32 %v1455_v11, 0.0  ;;  %5379 = vmatmul.msk.f32.gmra.mxu0 %vm413_vm0, %v246_v18 }
 0x351   : > { %5619 = vmatmul.msk.f32.gmra.mxu1 %vm2233_vm1, %v2052_v8  ;;  %v396_v8 = vld [vmem:[%s6296_s24 + $0x7d8] sm:$0xff] }
 0x353   : > { %v7299_v11 = vpop.f32.mrf.mxu2 }
 0x354   : > { %v1457_v17 = vpop.f32.mrf.mxu0  ;;  %8942 = vst [vmem:[#allocation56_spill] sm:$0xff] %v7299_v11  ;;  %5529 = vmatmul.msk.f32.gmra.mxu2 %vm413_vm0, %v396_v8  ;;  %v249_v8 = vld [vmem:[%s6296_s24 + $0x340] sm:$0xff] }
 0x355   : > { %v1458_v40 = vadd.f32 %v6846_v21, %v1457_v17 }
 0x356   : > { %v7295_v24 = vpop.f32.mrf.mxu1 }
 0x357   : > { %v2053_v32 = vmax.f32 %v1458_v40, 0.0  ;;  %5380 = vmatmul.msk.f32.gmra.mxu0 %vm413_vm0, %v247_v37 }
 0x359   : > { %5620 = vmatmul.msk.f32.gmra.mxu1 %vm2233_vm1, %v2053_v32  ;;  %v397_v32 = vld [vmem:[%s6296_s24 + $0x7e0] sm:$0xff] }
 0x35b   : > { %v7309_v40 = vpop.f32.mrf.mxu2 }
 0x35c   : > { %v1460_v18 = vpop.f32.mrf.mxu0  ;;  %8943 = vst [vmem:[#allocation57_spill] sm:$0xff] %v7309_v40  ;;  %5530 = vmatmul.msk.f32.gmra.mxu2 %vm413_vm0, %v397_v32  ;;  %v250_v32 = vld [vmem:[%s6296_s24 + $0x348] sm:$0xff] }
 0x35d   : > { %v1461_v10 = vadd.f32 %v6846_v21, %v1460_v18 }
 0x35e   : > { %v7305_v17 = vpop.f32.mrf.mxu1 }
 0x35f   : > { %v2054_v60 = vmax.f32 %v1461_v10, 0.0  ;;  %5381 = vmatmul.msk.f32.gmra.mxu0 %vm413_vm0, %v248_v25 }
 0x361   : > { %5621 = vmatmul.msk.f32.gmra.mxu1 %vm2233_vm1, %v2054_v60  ;;  %v398_v60 = vld [vmem:[%s6296_s24 + $0x7e8] sm:$0xff] }
 0x363   : > { %v7319_v10 = vpop.f32.mrf.mxu2 }
 0x364   : > { %v1463_v37 = vpop.f32.mrf.mxu0  ;;  %8944 = vst [vmem:[#allocation58_spill] sm:$0xff] %v7319_v10  ;;  %5531 = vmatmul.msk.f32.gmra.mxu2 %vm413_vm0, %v398_v60  ;;  %v251_v60 = vld [vmem:[%s6296_s24 + $0x350] sm:$0xff] }
 0x365   : > { %v1464_v11 = vadd.f32 %v6846_v21, %v1463_v37 }
 0x366   : > { %v7315_v18 = vpop.f32.mrf.mxu1 }
 0x367   : > { %v2055_v45 = vmax.f32 %v1464_v11, 0.0  ;;  %5382 = vmatmul.msk.f32.gmra.mxu0 %vm413_vm0, %v249_v8 }
 0x369   : > { %5622 = vmatmul.msk.f32.gmra.mxu1 %vm2233_vm1, %v2055_v45  ;;  %v399_v45 = vld [vmem:[%s6296_s24 + $0x7f0] sm:$0xff] }
 0x36b   : > { %v7329_v11 = vpop.f32.mrf.mxu2 }
 0x36c   : > { %v1466_v25 = vpop.f32.mrf.mxu0  ;;  %8945 = vst [vmem:[#allocation59_spill] sm:$0xff] %v7329_v11  ;;  %5532 = vmatmul.msk.f32.gmra.mxu2 %vm413_vm0, %v399_v45  ;;  %v252_v11 = vld [vmem:[%s6296_s24 + $0x358] sm:$0xff] }
 0x36d   : > { %v1467_v40 = vadd.f32 %v6846_v21, %v1466_v25 }
 0x36e   : > { %v7325_v37 = vpop.f32.mrf.mxu1 }
 0x36f   : > { %v2056_v39 = vmax.f32 %v1467_v40, 0.0  ;;  %5383 = vmatmul.msk.f32.gmra.mxu0 %vm413_vm0, %v250_v32 }
 0x371   : > { %5623 = vmatmul.msk.f32.gmra.mxu1 %vm2233_vm1, %v2056_v39  ;;  %v400_v39 = vld [vmem:[%s6296_s24 + $0x7f8] sm:$0xff] }
 0x373   : > { %v7339_v40 = vpop.f32.mrf.mxu2 }
 0x374   : > { %v1469_v8 = vpop.f32.mrf.mxu0  ;;  %8946 = vst [vmem:[#allocation60_spill] sm:$0xff] %v7339_v40  ;;  %5533 = vmatmul.msk.f32.gmra.mxu2 %vm413_vm0, %v400_v39  ;;  %v7360_v39 = vld [vmem:[%s8887_s1 + $0x50] ss:$0 sm:$0xff] }
 0x375   : > { %v1470_v10 = vadd.f32 %v6846_v21, %v1469_v8 }
 0x376   : > { %v7335_v5 = vpop.f32.mrf.mxu1 }
 0x377   : > { %v2057_v25 = vmax.f32 %v1470_v10, 0.0  ;;  %5384 = vmatmul.msk.f32.gmra.mxu0 %vm413_vm0, %v251_v60  ;;  %v7352_v60 = vld [vmem:[%s8887_s1 + $0xa0] sm:$0x1] }
 0x379   : > { %5624 = vmatmul.msk.f32.gmra.mxu1 %vm2233_vm1, %v2057_v25 }
 0x37b   : > { %v7347_v10 = vpop.f32.mrf.mxu2 }
 0x37c   : > { %v1472_v32 = vpop.f32.mrf.mxu0  ;;  %8947 = vst [vmem:[#allocation61_spill] sm:$0xff] %v7347_v10  ;;  %5806 = vmatmul.msk.f32.vlgmr.msrb.gmra.mxu2 %vm2233_vm1, %v7352_v60  ;;  %v254_v10 = vld [vmem:[%s6296_s24 + $0x368] sm:$0xff] }
 0x37d   : > { %v1473_v45 = vadd.f32 %v6846_v21, %v1472_v32  ;;  %v253_v21 = vld [vmem:[%s6296_s24 + $0x360] sm:$0xff] }
 0x37e   : > { %v3244_v57 = vpop.f32.mrf.mxu1 }
 0x37f   : > { %v2058_v8 = vmax.f32 %v1473_v45, 0.0  ;;  %5385 = vmatmul.msk.f32.gmra.mxu0 %vm413_vm0, %v252_v11 }
 0x381   : > { %5625 = vmatmul.msk.f32.gmra.mxu1 %vm2233_vm1, %v2058_v8 }
 0x384   : > { %v1475_v25 = vpop.f32.mrf.mxu0 }
 0x385   : > { %v1476_v11 = vadd.f32 %v7360_v39, %v1475_v25 }
 0x386   : > { %v3247_v32 = vpop.f32.mrf.mxu1 }
 0x387   : > { %v2059_v45 = vmax.f32 %v1476_v11, 0.0  ;;  %5386 = vmatmul.msk.f32.gmra.mxu0 %vm413_vm0, %v253_v21 }
 0x389   : > { %5626 = vmatmul.msk.f32.gmra.mxu1 %vm2233_vm1, %v2059_v45 }
 0x38c   : > { %v1478_v8 = vpop.f32.mrf.mxu0 }
 0x38d   : > { %v1479_v40 = vadd.f32 %v7360_v39, %v1478_v8 }
 0x38e   : > { %v3250_v16 = vpop.f32.mrf.mxu1 }
 0x38f   : > { %v2060_v31 = vmax.f32 %v1479_v40, 0.0  ;;  %5387 = vmatmul.msk.f32.gmra.mxu0 %vm413_vm0, %v254_v10 }
 0x391   : > { %5627 = vmatmul.msk.f32.gmra.mxu1 %vm2233_vm1, %v2060_v31 }
 0x394   : > { %v1481_v47 = vpop.f32.mrf.mxu0 }
 0x395   : > { %v1482_v25 = vadd.f32 %v7360_v39, %v1481_v47 }
 0x396   : > { %v3253_v11 = vpop.f32.mrf.mxu1 }
 0x397   : > { %v2061_v21 = vmax.f32 %v1482_v25, 0.0  ;;  %5388 = vmatmul.msk.f32.gmra.mxu0 %vm413_vm0, %v255_v1  ;;  %v3254_v31 = vadd.f32 %v7116_v62, %v3253_v11  ;;  %v257_v25 = vld [vmem:[%s6296_s24 + $0x380] sm:$0xff] }
 0x399   : > { %5628 = vmatmul.msk.f32.gmra.mxu1 %vm2233_vm1, %v2061_v21  ;;  %v3251_v21 = vadd.f32 %v7116_v62, %v3250_v16  ;;  %v3865_v12 = vmax.f32 %v3254_v31, 0.0  ;;  %v258_v16 = vld [vmem:[%s6296_s24 + $0x388] sm:$0xff] }
 0x39c   : > { %v1484_v45 = vpop.f32.mrf.mxu0 }
 0x39d   : > { %v1485_v8 = vadd.f32 %v7360_v39, %v1484_v45 }
 0x39e   : > { %v3256_v40 = vpop.f32.mrf.mxu1 }
 0x39f   : > { %v2062_v33 = vmax.f32 %v1485_v8, 0.0  ;;  %v3257_v10 = vadd.f32 %v7116_v62, %v3256_v40  ;;  %5389 = vmatmul.msk.f32.gmra.mxu0 %vm413_vm0, %v256_v48  ;;  %v3248_v48 = vadd.f32 %v7116_v62, %v3247_v32 }
 0x3a1   : > { %v3866_v47 = vmax.f32 %v3257_v10, 0.0  ;;  %5629 = vmatmul.msk.f32.gmra.mxu1 %vm2233_vm1, %v2062_v33  ;;  %v3864_v33 = vmax.f32 %v3251_v21, 0.0  ;;  %v3245_v10 = vadd.f32 %v7116_v62, %v3244_v57  ;;  %v3863_v31 = vmax.f32 %v3248_v48, 0.0  ;;  %v259_v21 = vld [vmem:[%s6296_s24 + $0x390] sm:$0xff] }
 0x3a3   : > { %5858 = vmatpush.xpose.msk.msrb.mxu2 %vm2233_vm1, %v3866_v47  ;;  %v3862_v32 = vmax.f32 %v3245_v10, 0.0  ;;  %v260_v10 = vld [vmem:[%s6296_s24 + $0x398] sm:$0xff] }
 0x3a4   : > { %v1487_v1 = vpop.f32.mrf.mxu0 }
 0x3a5   : > { %v1488_v45 = vadd.f32 %v7360_v39, %v1487_v1 }
 0x3a6   : > { %v7383_v8 = vpop.f32.mrf.mxu1 }
 0x3a7   : > { %8948 = vst [vmem:[#allocation62_spill] sm:$0xff] %v7383_v8  ;;  %v2063_v40 = vmax.f32 %v1488_v45, 0.0  ;;  %5390 = vmatmul.msk.f32.gmra.mxu0 %vm413_vm0, %v257_v25  ;;  %5859 = vmatpush.xpose.msk.msrb.mxu2 %vm2233_vm1, %v3865_v12  ;;  %v3242_v12 = vadd.f32 %v7116_v62, %v7335_v5  ;;  %v3239_v45 = vadd.f32 %v7116_v62, %v7325_v37  ;;  %v277_v8 = vld [vmem:[%s6296_s24 + $0x420] sm:$0xff] }
 0x3a8   : > { %v3236_v5 = vadd.f32 %v7116_v62, %v7315_v18  ;;  %v3230_v18 = vadd.f32 %v7116_v62, %v7295_v24  ;;  %v3224_v24 = vadd.f32 %v7116_v62, %v7275_v51  ;;  %v3218_v51 = vadd.f32 %v7116_v62, %v7255_v54 }
 0x3a9   : > { %5630 = vmatmul.msk.f32.gmra.mxu1 %vm2233_vm1, %v2063_v40  ;;  %v3861_v40 = vmax.f32 %v3242_v12, 0.0  ;;  %v3212_v54 = vadd.f32 %v7116_v62, %v7235_v55  ;;  %v265_v55 = vld [vmem:[%s6296_s24 + $0x3c0] sm:$0xff] }
 0x3ab   : > { %5860 = vmatpush.xpose.msk.msrb.mxu2 %vm2233_vm1, %v3864_v33 }
 0x3ac   : > { %v1490_v11 = vpop.f32.mrf.mxu0 }
 0x3ad   : > { %v1491_v47 = vadd.f32 %v7360_v39, %v1490_v11 }
 0x3ae   : > { %v7393_v1 = vpop.f32.mrf.mxu1 }
 0x3af   : > { %8949 = vst [vmem:[#allocation63_spill] sm:$0xff] %v7393_v1  ;;  %v2064_v25 = vmax.f32 %v1491_v47, 0.0  ;;  %5391 = vmatmul.msk.f32.gmra.mxu0 %vm413_vm0, %v258_v16  ;;  %5861 = vmatpush.xpose.msk.msrb.mxu2 %vm2233_vm1, %v3863_v31  ;;  %v3860_v16 = vmax.f32 %v3239_v45, 0.0  ;;  %v3233_v31 = vadd.f32 %v7116_v62, %v7305_v17  ;;  %v3859_v47 = vmax.f32 %v3236_v5, 0.0  ;;  %v278_v1 = vld [vmem:[%s6296_s24 + $0x428] sm:$0xff] }
 0x3b0   : > { %v3227_v45 = vadd.f32 %v7116_v62, %v7285_v44 }
 0x3b1   : > { %5631 = vmatmul.msk.f32.gmra.mxu1 %vm2233_vm1, %v2064_v25 }
 0x3b3   : > { %5862 = vmatpush.xpose.msk.msrb.mxu2 %vm2233_vm1, %v3862_v32 }
 0x3b4   : > { %v1493_v57 = vpop.f32.mrf.mxu0 }
 0x3b5   : > { %v1494_v48 = vadd.f32 %v7360_v39, %v1493_v57  ;;  %v3858_v57 = vmax.f32 %v3233_v31, 0.0  ;;  %v3855_v31 = vmax.f32 %v3224_v24, 0.0  ;;  %v264_v24 = vld [vmem:[%s6296_s24 + $0x3b8] sm:$0xff] }
 0x3b6   : > { %v7405_v33 = vpop.f32.mrf.mxu1 }
 0x3b7   : > { %8950 = vst [vmem:[#allocation64_spill] sm:$0xff] %v7405_v33  ;;  %v2065_v11 = vmax.f32 %v1494_v48, 0.0  ;;  %5392 = vmatmul.msk.f32.gmra.mxu0 %vm413_vm0, %v259_v21  ;;  %5863 = vmatpush.xpose.msk.msrb.mxu2 %vm2233_vm1, %v3861_v40  ;;  %v261_v21 = vld [vmem:[%s6296_s24 + $0x3a0] sm:$0xff]  ;;  %v3857_v40 = vmax.f32 %v3230_v18, 0.0  ;;  %v279_v33 = vld [vmem:[%s6296_s24 + $0x430] sm:$0xff] }
 0x3b9   : > { %5632 = vmatmul.msk.f32.gmra.mxu1 %vm2233_vm1, %v2065_v11 }
 0x3bb   : > { %5864 = vmatpush.xpose.msk.msrb.mxu2 %vm2233_vm1, %v3860_v16  ;;  %v3856_v16 = vmax.f32 %v3227_v45, 0.0 }
 0x3bc   : > { %v1496_v37 = vpop.f32.mrf.mxu0 }
 0x3bd   : > { %v1497_v25 = vadd.f32 %v7360_v39, %v1496_v37  ;;  %v262_v37 = vld [vmem:[%s6296_s24 + $0x3a8] sm:$0xff] }
 0x3be   : > { %v7417_v12 = vpop.f32.mrf.mxu1 }
 0x3bf   : > { %8951 = vst [vmem:[#allocation65_spill] sm:$0xff] %v7417_v12  ;;  %v2066_v32 = vmax.f32 %v1497_v25, 0.0  ;;  %5393 = vmatmul.msk.f32.gmra.mxu0 %vm413_vm0, %v260_v10  ;;  %5865 = vmatpush.xpose.msk.msrb.mxu2 %vm2233_vm1, %v3859_v47  ;;  %v3221_v10 = vadd.f32 %v7116_v62, %v7265_v7  ;;  %v280_v12 = vld [vmem:[%s6296_s24 + $0x438] sm:$0xff] }
 0x3c1   : > { %5633 = vmatmul.msk.f32.gmra.mxu1 %vm2233_vm1, %v2066_v32  ;;  %v3854_v18 = vmax.f32 %v3221_v10, 0.0 }
 0x3c3   : > { %5866 = vmatpush.xpose.msk.msrb.mxu2 %vm2233_vm1, %v3858_v57  ;;  %v263_v57 = vld [vmem:[%s6296_s24 + $0x3b0] sm:$0xff] }
 0x3c4   : > { %v1499_v17 = vpop.f32.mrf.mxu0 }
 0x3c5   : > { %v1500_v48 = vadd.f32 %v7360_v39, %v1499_v17  ;;  %v3215_v17 = vadd.f32 %v7116_v62, %v7245_v36 }
 0x3c6   : > { %v7429_v11 = vpop.f32.mrf.mxu1 }
 0x3c7   : > { %8952 = vst [vmem:[#allocation66_spill] sm:$0xff] %v7429_v11  ;;  %v2067_v5 = vmax.f32 %v1500_v48, 0.0  ;;  %5394 = vmatmul.msk.f32.gmra.mxu0 %vm413_vm0, %v261_v21  ;;  %5867 = vmatpush.xpose.msk.msrb.mxu2 %vm2233_vm1, %v3857_v40  ;;  %v3853_v21 = vmax.f32 %v3218_v51, 0.0  ;;  %v281_v11 = vld [vmem:[%s6296_s24 + $0x440] sm:$0xff] }
 0x3c9   : > { %5634 = vmatmul.msk.f32.gmra.mxu1 %vm2233_vm1, %v2067_v5  ;;  %v3852_v5 = vmax.f32 %v3215_v17, 0.0 }
 0x3cb   : > { %5868 = vmatpush.xpose.msk.msrb.mxu2 %vm2233_vm1, %v3856_v16  ;;  %v3851_v16 = vmax.f32 %v3212_v54, 0.0 }
 0x3cc   : > { %v1502_v44 = vpop.f32.mrf.mxu0 }
 0x3cd   : > { %v1503_v47 = vadd.f32 %v7360_v39, %v1502_v44 }
 0x3ce   : > { %v7441_v25 = vpop.f32.mrf.mxu1 }
 0x3cf   : > { %8953 = vst [vmem:[#allocation67_spill] sm:$0xff] %v7441_v25  ;;  %v2068_v32 = vmax.f32 %v1503_v47, 0.0  ;;  %5395 = vmatmul.msk.f32.gmra.mxu0 %vm413_vm0, %v262_v37  ;;  %5869 = vmatpush.xpose.msk.msrb.mxu2 %vm2233_vm1, %v3855_v31  ;;  %v282_v25 = vld [vmem:[%s6296_s24 + $0x448] sm:$0xff] }
 0x3d1   : > { %5635 = vmatmul.msk.f32.gmra.mxu1 %vm2233_vm1, %v2068_v32 }
 0x3d3   : > { %5870 = vmatpush.xpose.msk.msrb.mxu2 %vm2233_vm1, %v3854_v18  ;;  %v266_v18 = vld [vmem:[%s6296_s24 + $0x3c8] sm:$0xff] }
 0x3d4   : > { %v1505_v7 = vpop.f32.mrf.mxu0 }
 0x3d5   : > { %v1506_v45 = vadd.f32 %v7360_v39, %v1505_v7 }
 0x3d6   : > { %v7453_v40 = vpop.f32.mrf.mxu1 }
 0x3d7   : > { %8954 = vst [vmem:[#allocation68_spill] sm:$0xff] %v7453_v40  ;;  %v2069_v48 = vmax.f32 %v1506_v45, 0.0  ;;  %5396 = vmatmul.msk.f32.gmra.mxu0 %vm413_vm0, %v263_v57  ;;  %5871 = vmatpush.xpose.msk.msrb.mxu2 %vm2233_vm1, %v3853_v21  ;;  %v267_v45 = vld [vmem:[%s6296_s24 + $0x3d0] sm:$0xff] }
 0x3d8   : > { %v283_v40 = vld [vmem:[%s6296_s24 + $0x450] sm:$0xff] }
 0x3d9   : > { %5636 = vmatmul.msk.f32.gmra.mxu1 %vm2233_vm1, %v2069_v48 }
 0x3db   : > { %5872 = vmatpush.xpose.msk.msrb.mxu2 %vm2233_vm1, %v3852_v5 }
 0x3dc   : > { %v1508_v36 = vpop.f32.mrf.mxu0 }
 0x3dd   : > { %v1509_v44 = vadd.f32 %v7360_v39, %v1508_v36 }
 0x3de   : > { %v7463_v37 = vpop.f32.mrf.mxu1 }
 0x3df   : > { %8955 = vst [vmem:[#allocation69_spill] sm:$0xff] %v7463_v37  ;;  %v2070_v10 = vmax.f32 %v1509_v44, 0.0  ;;  %5397 = vmatmul.msk.f32.gmra.mxu0 %vm413_vm0, %v264_v24  ;;  %5873 = vmatpush.xpose.msk.msrb.mxu2 %vm2233_vm1, %v3851_v16  ;;  %v268_v24 = vld [vmem:[%s6296_s24 + $0x3d8] sm:$0xff] }
 0x3e0   : > { %v284_v37 = vld [vmem:[%s6296_s24 + $0x458] sm:$0xff] }
 0x3e1   : > { %5637 = vmatmul.msk.f32.gmra.mxu1 %vm2233_vm1, %v2070_v10 }
 0x3e4   : > { %v1511_v62 = vpop.f32.mrf.mxu0 }
 0x3e5   : > { %v1512_v31 = vadd.f32 %v7360_v39, %v1511_v62 }
 0x3e6   : > { %v7470_v47 = vpop.f32.mrf.mxu1 }
 0x3e7   : > { %8956 = vst [vmem:[#allocation70_spill] sm:$0xff] %v7470_v47  ;;  %v2071_v32 = vmax.f32 %v1512_v31, 0.0  ;;  %5398 = vmatmul.msk.f32.gmra.mxu0 %vm413_vm0, %v265_v55  ;;  %v269_v55 = vld [vmem:[%s6296_s24 + $0x3e0] sm:$0xff] }
 0x3e9   : > { %5638 = vmatmul.msk.f32.gmra.mxu1 %vm2233_vm1, %v2071_v32 }
 0x3ec   : > { %v1514_v51 = vpop.f32.mrf.mxu0 }
 0x3ed   : > { %v1515_v7 = vadd.f32 %v7360_v39, %v1514_v51 }
 0x3ee   : > { %v7476_v57 = vpop.f32.mrf.mxu1 }
 0x3ef   : > { %8957 = vst [vmem:[#allocation71_spill] sm:$0xff] %v7476_v57  ;;  %v2072_v17 = vmax.f32 %v1515_v7, 0.0  ;;  %5399 = vmatmul.msk.f32.gmra.mxu0 %vm413_vm0, %v266_v18  ;;  %v270_v7 = vld [vmem:[%s6296_s24 + $0x3e8] sm:$0xff] }
 0x3f1   : > { %5639 = vmatmul.msk.f32.gmra.mxu1 %vm2233_vm1, %v2072_v17 }
 0x3f4   : > { %v1517_v21 = vpop.f32.mrf.mxu0 }
 0x3f5   : > { %v1518_v48 = vadd.f32 %v7360_v39, %v1517_v21 }
 0x3f6   : > { %v7482_v54 = vpop.f32.mrf.mxu1 }
 0x3f7   : > { %8958 = vst [vmem:[#allocation72_spill] sm:$0xff] %v7482_v54  ;;  %v2073_v5 = vmax.f32 %v1518_v48, 0.0  ;;  %5400 = vmatmul.msk.f32.gmra.mxu0 %vm413_vm0, %v267_v45 }
 0x3f9   : > { %5640 = vmatmul.msk.f32.gmra.mxu1 %vm2233_vm1, %v2073_v5  ;;  %v271_v5 = vld [vmem:[%s6296_s24 + $0x3f0] sm:$0xff] }
 0x3fc   : > { %v1520_v36 = vpop.f32.mrf.mxu0 }
 0x3fd   : > { %v1521_v16 = vadd.f32 %v7360_v39, %v1520_v36 }
 0x3fe   : > { %v7488_v44 = vpop.f32.mrf.mxu1 }
 0x3ff   : > { %8959 = vst [vmem:[#allocation73_spill] sm:$0xff] %v7488_v44  ;;  %v2074_v10 = vmax.f32 %v1521_v16, 0.0  ;;  %5401 = vmatmul.msk.f32.gmra.mxu0 %vm413_vm0, %v268_v24  ;;  %v287_v44 = vld [vmem:[%s6296_s24 + $0x470] sm:$0xff] }
 0x401   : > { %5641 = vmatmul.msk.f32.gmra.mxu1 %vm2233_vm1, %v2074_v10 }
 0x404   : > { %v1523_v62 = vpop.f32.mrf.mxu0 }
 0x405   : > { %v1524_v31 = vadd.f32 %v7360_v39, %v1523_v62  ;;  %v272_v62 = vld [vmem:[%s6296_s24 + $0x3f8] sm:$0xff] }
 0x406   : > { %v7494_v32 = vpop.f32.mrf.mxu1 }
 0x407   : > { %8960 = vst [vmem:[#allocation74_spill] sm:$0xff] %v7494_v32  ;;  %v2075_v51 = vmax.f32 %v1524_v31, 0.0  ;;  %5402 = vmatmul.msk.f32.gmra.mxu0 %vm413_vm0, %v269_v55 }
 0x409   : > { %5642 = vmatmul.msk.f32.gmra.mxu1 %vm2233_vm1, %v2075_v51 }
 0x40c   : > { %v1526_v18 = vpop.f32.mrf.mxu0 }
 0x40d   : > { %v1527_v17 = vadd.f32 %v7360_v39, %v1526_v18 }
 0x40e   : > { %v7500_v21 = vpop.f32.mrf.mxu1 }
 0x40f   : > { %8961 = vst [vmem:[#allocation75_spill] sm:$0xff] %v7500_v21  ;;  %v2076_v45 = vmax.f32 %v1527_v17, 0.0  ;;  %5403 = vmatmul.msk.f32.gmra.mxu0 %vm413_vm0, %v270_v7  ;;  %v273_v7 = vld [vmem:[%s6296_s24 + $0x400] sm:$0xff] }
 0x411   : > { %5643 = vmatmul.msk.f32.gmra.mxu1 %vm2233_vm1, %v2076_v45 }
 0x414   : > { %v1529_v48 = vpop.f32.mrf.mxu0 }
 0x415   : > { %v1530_v36 = vadd.f32 %v7360_v39, %v1529_v48 }
 0x416   : > { %v7506_v24 = vpop.f32.mrf.mxu1 }
 0x417   : > { %8962 = vst [vmem:[#allocation76_spill] sm:$0xff] %v7506_v24  ;;  %v2077_v16 = vmax.f32 %v1530_v36, 0.0  ;;  %5404 = vmatmul.msk.f32.gmra.mxu0 %vm413_vm0, %v271_v5  ;;  %v274_v36 = vld [vmem:[%s6296_s24 + $0x408] sm:$0xff] }
 0x419   : > { %5644 = vmatmul.msk.f32.gmra.mxu1 %vm2233_vm1, %v2077_v16 }
 0x41c   : > { %v1532_v10 = vpop.f32.mrf.mxu0 }
 0x41d   : > { %v1533_v55 = vadd.f32 %v7360_v39, %v1532_v10 }
 0x41e   : > { %v7512_v31 = vpop.f32.mrf.mxu1 }
 0x41f   : > { %8963 = vst [vmem:[#allocation77_spill] sm:$0xff] %v7512_v31  ;;  %v2078_v51 = vmax.f32 %v1533_v55, 0.0  ;;  %5405 = vmatmul.msk.f32.gmra.mxu0 %vm413_vm0, %v272_v62 }
 0x421   : > { %5645 = vmatmul.msk.f32.gmra.mxu1 %vm2233_vm1, %v2078_v51  ;;  %v275_v51 = vld [vmem:[%s6296_s24 + $0x410] sm:$0xff] }
 0x424   : > { %v1535_v18 = vpop.f32.mrf.mxu0 }
 0x425   : > { %v1536_v17 = vadd.f32 %v7360_v39, %v1535_v18 }
 0x426   : > { %v7518_v45 = vpop.f32.mrf.mxu1 }
 0x427   : > { %v2079_v48 = vmax.f32 %v1536_v17, 0.0  ;;  %5406 = vmatmul.msk.f32.gmra.mxu0 %vm413_vm0, %v273_v7 }
 0x429   : > { %5646 = vmatmul.msk.f32.gmra.mxu1 %vm2233_vm1, %v2079_v48 }
 0x42c   : > { %v1538_v5 = vpop.f32.mrf.mxu0 }
 0x42d   : > { %v1539_v16 = vadd.f32 %v7360_v39, %v1538_v5  ;;  %v276_v5 = vld [vmem:[%s6296_s24 + $0x418] sm:$0xff] }
 0x42e   : > { %v7524_v10 = vpop.f32.mrf.mxu1 }
 0x42f   : > { %v2080_v62 = vmax.f32 %v1539_v16, 0.0  ;;  %5407 = vmatmul.msk.f32.gmra.mxu0 %vm413_vm0, %v274_v36 }
 0x431   : > { %5647 = vmatmul.msk.f32.gmra.mxu1 %vm2233_vm1, %v2080_v62 }
 0x434   : > { %v1541_v55 = vpop.f32.mrf.mxu0 }
 0x435   : > { %v1542_v18 = vadd.f32 %v7360_v39, %v1541_v55 }
 0x436   : > { %v7530_v7 = vpop.f32.mrf.mxu1 }
 0x437   : > { %v2081_v17 = vmax.f32 %v1542_v18, 0.0  ;;  %5408 = vmatmul.msk.f32.gmra.mxu0 %vm413_vm0, %v275_v51 }
 0x439   : > { %5648 = vmatmul.msk.f32.gmra.mxu1 %vm2233_vm1, %v2081_v17 }
 0x43c   : > { %v1544_v48 = vpop.f32.mrf.mxu0 }
 0x43d   : > { %v1545_v16 = vadd.f32 %v7360_v39, %v1544_v48 }
 0x43e   : > { %v7536_v36 = vpop.f32.mrf.mxu1 }
 0x43f   : > { %v2082_v62 = vmax.f32 %v1545_v16, 0.0  ;;  %5409 = vmatmul.msk.f32.gmra.mxu0 %vm413_vm0, %v276_v5 }
 0x441   : > { %5649 = vmatmul.msk.f32.gmra.mxu1 %vm2233_vm1, %v2082_v62 }
 0x444   : > { %v1547_v55 = vpop.f32.mrf.mxu0 }
 0x445   : > { %v1548_v18 = vadd.f32 %v7360_v39, %v1547_v55 }
 0x446   : > { %v7542_v51 = vpop.f32.mrf.mxu1 }
 0x447   : > { %v2083_v17 = vmax.f32 %v1548_v18, 0.0  ;;  %5410 = vmatmul.msk.f32.gmra.mxu0 %vm413_vm0, %v277_v8 }
 0x449   : > { %5650 = vmatmul.msk.f32.gmra.mxu1 %vm2233_vm1, %v2083_v17 }
 0x44c   : > { %v1550_v48 = vpop.f32.mrf.mxu0 }
 0x44d   : > { %v1551_v16 = vadd.f32 %v7360_v39, %v1550_v48 }
 0x44e   : > { %v7548_v5 = vpop.f32.mrf.mxu1 }
 0x44f   : > { %v2084_v62 = vmax.f32 %v1551_v16, 0.0  ;;  %5411 = vmatmul.msk.f32.gmra.mxu0 %vm413_vm0, %v278_v1 }
 0x451   : > { %5651 = vmatmul.msk.f32.gmra.mxu1 %vm2233_vm1, %v2084_v62 }
 0x454   : > { %v1553_v55 = vpop.f32.mrf.mxu0 }
 0x455   : > { %v1554_v18 = vadd.f32 %v7360_v39, %v1553_v55 }
 0x456   : > { %v7554_v8 = vpop.f32.mrf.mxu1 }
 0x457   : > { %v2085_v17 = vmax.f32 %v1554_v18, 0.0  ;;  %5412 = vmatmul.msk.f32.gmra.mxu0 %vm413_vm0, %v279_v33 }
 0x459   : > { %5652 = vmatmul.msk.f32.gmra.mxu1 %vm2233_vm1, %v2085_v17 }
 0x45c   : > { %v1556_v48 = vpop.f32.mrf.mxu0 }
 0x45d   : > { %v1557_v16 = vadd.f32 %v7360_v39, %v1556_v48 }
 0x45e   : > { %v7560_v1 = vpop.f32.mrf.mxu1 }
 0x45f   : > { %v2086_v62 = vmax.f32 %v1557_v16, 0.0  ;;  %5413 = vmatmul.msk.f32.gmra.mxu0 %vm413_vm0, %v280_v12 }
 0x461   : > { %5653 = vmatmul.msk.f32.gmra.mxu1 %vm2233_vm1, %v2086_v62 }
 0x464   : > { %v1559_v55 = vpop.f32.mrf.mxu0 }
 0x465   : > { %v1560_v18 = vadd.f32 %v7360_v39, %v1559_v55 }
 0x466   : > { %v7566_v33 = vpop.f32.mrf.mxu1 }
 0x467   : > { %v2087_v17 = vmax.f32 %v1560_v18, 0.0  ;;  %5414 = vmatmul.msk.f32.gmra.mxu0 %vm413_vm0, %v281_v11 }
 0x469   : > { %5654 = vmatmul.msk.f32.gmra.mxu1 %vm2233_vm1, %v2087_v17 }
 0x46c   : > { %v1562_v48 = vpop.f32.mrf.mxu0 }
 0x46d   : > { %v1563_v16 = vadd.f32 %v7360_v39, %v1562_v48 }
 0x46e   : > { %v7572_v12 = vpop.f32.mrf.mxu1 }
 0x46f   : > { %v2088_v62 = vmax.f32 %v1563_v16, 0.0  ;;  %5415 = vmatmul.msk.f32.gmra.mxu0 %vm413_vm0, %v282_v25 }
 0x471   : > { %5655 = vmatmul.msk.f32.gmra.mxu1 %vm2233_vm1, %v2088_v62  ;;  %v7586_v62 = vpop.f32.mrf.mxu2  ;;  %5840 = vmatmul.msk.f32.vlgmr.msra.gmra.mxu2 %vm2233_vm1, %v7352_v60 }
 0x474   : > { %v1565_v55 = vpop.f32.mrf.mxu0 }
 0x475   : > { %v1566_v18 = vadd.f32 %v7360_v39, %v1565_v55  ;;  %v285_v55 = vld [vmem:[%s6296_s24 + $0x460] sm:$0xff] }
 0x476   : > { %v7578_v11 = vpop.f32.mrf.mxu1 }
 0x477   : > { %v2089_v17 = vmax.f32 %v1566_v18, 0.0  ;;  %5416 = vmatmul.msk.f32.gmra.mxu0 %vm413_vm0, %v283_v40 }
 0x479   : > { %5656 = vmatmul.msk.f32.gmra.mxu1 %vm2233_vm1, %v2089_v17 }
 0x47c   : > { %v1568_v48 = vpop.f32.mrf.mxu0 }
 0x47d   : > { %v1569_v16 = vadd.f32 %v7360_v39, %v1568_v48  ;;  %v286_v48 = vld [vmem:[%s6296_s24 + $0x468] sm:$0xff] }
 0x47e   : > { %v3340_v25 = vpop.f32.mrf.mxu1 }
 0x47f   : > { %v2090_v47 = vmax.f32 %v1569_v16, 0.0  ;;  %5417 = vmatmul.msk.f32.gmra.mxu0 %vm413_vm0, %v284_v37 }
 0x481   : > { %5657 = vmatmul.msk.f32.gmra.mxu1 %vm2233_vm1, %v2090_v47 }
 0x484   : > { %v1571_v40 = vpop.f32.mrf.mxu0 }
 0x485   : > { %v1572_v18 = vadd.f32 %v7360_v39, %v1571_v40 }
 0x486   : > { %v3343_v17 = vpop.f32.mrf.mxu1 }
 0x487   : > { %v2091_v57 = vmax.f32 %v1572_v18, 0.0  ;;  %5418 = vmatmul.msk.f32.gmra.mxu0 %vm413_vm0, %v285_v55  ;;  %v288_v55 = vld [vmem:[%s6296_s24 + $0x478] sm:$0xff] }
 0x489   : > { %5658 = vmatmul.msk.f32.gmra.mxu1 %vm2233_vm1, %v2091_v57 }
 0x48c   : > { %v1574_v37 = vpop.f32.mrf.mxu0 }
 0x48d   : > { %v1575_v47 = vadd.f32 %v7360_v39, %v1574_v37 }
 0x48e   : > { %v3346_v16 = vpop.f32.mrf.mxu1 }
 0x48f   : > { %v2092_v54 = vmax.f32 %v1575_v47, 0.0  ;;  %5419 = vmatmul.msk.f32.gmra.mxu0 %vm413_vm0, %v286_v48 }
 0x491   : > { %5659 = vmatmul.msk.f32.gmra.mxu1 %vm2233_vm1, %v2092_v54  ;;  %v7607_v54 = vld [vmem:[%s8887_s1 + $0x98] ss:$0 sm:$0xff] }
 0x494   : > { %v1577_v60 = vpop.f32.mrf.mxu0 }
 0x495   : > { %v1578_v40 = vadd.f32 %v7360_v39, %v1577_v60 }
 0x496   : > { %v3349_v18 = vpop.f32.mrf.mxu1 }
 0x497   : > { %v2093_v32 = vmax.f32 %v1578_v40, 0.0  ;;  %5420 = vmatmul.msk.f32.gmra.mxu0 %vm413_vm0, %v287_v44  ;;  %v3350_v60 = vadd.f32 %v7607_v54, %v3349_v18  ;;  %v289_v40 = vld [vmem:[%s6296_s24 + $0x480] sm:$0xff]  ;;  %v3344_v18 = vadd.f32 %v7607_v54, %v3343_v17  ;;  %v3338_v17 = vadd.f32 %v7607_v54, %v7578_v11 }
 0x498   : > { %v3332_v11 = vadd.f32 %v7607_v54, %v7566_v33  ;;  %v3326_v33 = vadd.f32 %v7607_v54, %v7554_v8  ;;  %v3320_v8 = vadd.f32 %v7607_v54, %v7542_v51  ;;  %v3314_v51 = vadd.f32 %v7607_v54, %v7530_v7 }
 0x499   : > { %5660 = vmatmul.msk.f32.gmra.mxu1 %vm2233_vm1, %v2093_v32  ;;  %v3308_v7 = vadd.f32 %v7607_v54, %v7518_v45 }
 0x49c   : > { %v1580_v57 = vpop.f32.mrf.mxu0 }
 0x49d   : > { %v1581_v37 = vadd.f32 %v7360_v39, %v1580_v57  ;;  %v3347_v57 = vadd.f32 %v7607_v54, %v3346_v16  ;;  %v290_v16 = vld [vmem:[%s6296_s24 + $0x488] sm:$0xff] }
 0x49e   : > { %v3352_v47 = vpop.f32.mrf.mxu1 }
 0x49f   : > { %v2094_v21 = vmax.f32 %v1581_v37, 0.0  ;;  %v3353_v48 = vadd.f32 %v7607_v54, %v3352_v47  ;;  %5421 = vmatmul.msk.f32.gmra.mxu0 %vm413_vm0, %v288_v55  ;;  %v3897_v37 = vmax.f32 %v3350_v60, 0.0  ;;  %v3895_v60 = vmax.f32 %v3344_v18, 0.0 }
 0x4a1   : > { %v3898_v44 = vmax.f32 %v3353_v48, 0.0  ;;  %5661 = vmatmul.msk.f32.gmra.mxu1 %vm2233_vm1, %v2094_v21  ;;  %v3896_v21 = vmax.f32 %v3347_v57, 0.0  ;;  %v3341_v48 = vadd.f32 %v7607_v54, %v3340_v25  ;;  %v291_v57 = vld [vmem:[%s6296_s24 + $0x490] sm:$0xff] }
 0x4a3   : > { %5892 = vmatpush.xpose.msk.msra.mxu2 %vm2233_vm1, %v3898_v44 }
 0x4a4   : > { %v1583_v32 = vpop.f32.mrf.mxu0 }
 0x4a5   : > { %v1584_v24 = vadd.f32 %v7360_v39, %v1583_v32 }
 0x4a6   : > { %v7617_v31 = vpop.f32.mrf.mxu1 }
 0x4a7   : > { %8964 = vst [vmem:[#allocation78_spill] sm:$0xff] %v7617_v31  ;;  %v2095_v47 = vmax.f32 %v1584_v24, 0.0  ;;  %5422 = vmatmul.msk.f32.gmra.mxu0 %vm413_vm0, %v289_v40  ;;  %5893 = vmatpush.xpose.msk.msra.mxu2 %vm2233_vm1, %v3897_v37  ;;  %v3894_v40 = vmax.f32 %v3341_v48, 0.0  ;;  %v3335_v37 = vadd.f32 %v7607_v54, %v7572_v12  ;;  %v292_v48 = vld [vmem:[%s6296_s24 + $0x498] sm:$0xff] }
 0x4a9   : > { %5662 = vmatmul.msk.f32.gmra.mxu1 %vm2233_vm1, %v2095_v47  ;;  %v3893_v47 = vmax.f32 %v3338_v17, 0.0 }
 0x4ab   : > { %5894 = vmatpush.xpose.msk.msra.mxu2 %vm2233_vm1, %v3896_v21 }
 0x4ac   : > { %v1586_v55 = vpop.f32.mrf.mxu0 }
 0x4ad   : > { %v1587_v44 = vadd.f32 %v7360_v39, %v1586_v55 }
 0x4ae   : > { %v7627_v24 = vpop.f32.mrf.mxu1 }
 0x4af   : > { %8965 = vst [vmem:[#allocation79_spill] sm:$0xff] %v7627_v24  ;;  %v2096_v32 = vmax.f32 %v1587_v44, 0.0  ;;  %5423 = vmatmul.msk.f32.gmra.mxu0 %vm413_vm0, %v290_v16  ;;  %5895 = vmatpush.xpose.msk.msra.mxu2 %vm2233_vm1, %v3895_v60  ;;  %v3892_v16 = vmax.f32 %v3335_v37, 0.0  ;;  %v3329_v60 = vadd.f32 %v7607_v54, %v7560_v1  ;;  %v3891_v44 = vmax.f32 %v3332_v11, 0.0 }
 0x4b0   : > { %v3323_v37 = vadd.f32 %v7607_v54, %v7548_v5 }
 0x4b1   : > { %5663 = vmatmul.msk.f32.gmra.mxu1 %vm2233_vm1, %v2096_v32 }
 0x4b3   : > { %5896 = vmatpush.xpose.msk.msra.mxu2 %vm2233_vm1, %v3894_v40 }
 0x4b4   : > { %v1589_v25 = vpop.f32.mrf.mxu0 }
 0x4b5   : > { %v1590_v18 = vadd.f32 %v7360_v39, %v1589_v25  ;;  %v3890_v25 = vmax.f32 %v3329_v60, 0.0  ;;  %v3887_v60 = vmax.f32 %v3320_v8, 0.0  ;;  %v296_v8 = vld [vmem:[%s6296_s24 + $0x4b8] sm:$0xff] }
 0x4b6   : > { %v7639_v21 = vpop.f32.mrf.mxu1 }
 0x4b7   : > { %8966 = vst [vmem:[#allocation80_spill] sm:$0xff] %v7639_v21  ;;  %v2097_v55 = vmax.f32 %v1590_v18, 0.0  ;;  %5424 = vmatmul.msk.f32.gmra.mxu0 %vm413_vm0, %v291_v57  ;;  %5897 = vmatpush.xpose.msk.msra.mxu2 %vm2233_vm1, %v3893_v47  ;;  %v293_v57 = vld [vmem:[%s6296_s24 + $0x4a0] sm:$0xff]  ;;  %v3889_v47 = vmax.f32 %v3326_v33, 0.0 }
 0x4b9   : > { %5664 = vmatmul.msk.f32.gmra.mxu1 %vm2233_vm1, %v2097_v55 }
 0x4bb   : > { %5898 = vmatpush.xpose.msk.msra.mxu2 %vm2233_vm1, %v3892_v16  ;;  %v3888_v16 = vmax.f32 %v3323_v37, 0.0 }
 0x4bc   : > { %v1592_v12 = vpop.f32.mrf.mxu0 }
 0x4bd   : > { %v1593_v32 = vadd.f32 %v7360_v39, %v1592_v12  ;;  %v294_v12 = vld [vmem:[%s6296_s24 + $0x4a8] sm:$0xff] }
 0x4be   : > { %v7651_v17 = vpop.f32.mrf.mxu1 }
 0x4bf   : > { %8967 = vst [vmem:[#allocation81_spill] sm:$0xff] %v7651_v17  ;;  %v2098_v40 = vmax.f32 %v1593_v32, 0.0  ;;  %5425 = vmatmul.msk.f32.gmra.mxu0 %vm413_vm0, %v292_v48  ;;  %5899 = vmatpush.xpose.msk.msra.mxu2 %vm2233_vm1, %v3891_v44  ;;  %v3317_v48 = vadd.f32 %v7607_v54, %v7536_v36 }
 0x4c1   : > { %5665 = vmatmul.msk.f32.gmra.mxu1 %vm2233_vm1, %v2098_v40  ;;  %v3886_v33 = vmax.f32 %v3317_v48, 0.0 }
 0x4c3   : > { %5900 = vmatpush.xpose.msk.msra.mxu2 %vm2233_vm1, %v3890_v25  ;;  %v295_v25 = vld [vmem:[%s6296_s24 + $0x4b0] sm:$0xff] }
 0x4c4   : > { %v1595_v1 = vpop.f32.mrf.mxu0 }
 0x4c5   : > { %v1596_v18 = vadd.f32 %v7360_v39, %v1595_v1  ;;  %v3311_v1 = vadd.f32 %v7607_v54, %v7524_v10 }
 0x4c6   : > { %v7663_v55 = vpop.f32.mrf.mxu1 }
 0x4c7   : > { %8968 = vst [vmem:[#allocation82_spill] sm:$0xff] %v7663_v55  ;;  %v2099_v11 = vmax.f32 %v1596_v18, 0.0  ;;  %5426 = vmatmul.msk.f32.gmra.mxu0 %vm413_vm0, %v293_v57  ;;  %5901 = vmatpush.xpose.msk.msra.mxu2 %vm2233_vm1, %v3889_v47  ;;  %v3885_v57 = vmax.f32 %v3314_v51, 0.0 }
 0x4c9   : > { %5666 = vmatmul.msk.f32.gmra.mxu1 %vm2233_vm1, %v2099_v11  ;;  %v3884_v11 = vmax.f32 %v3311_v1, 0.0 }
 0x4cb   : > { %5902 = vmatpush.xpose.msk.msra.mxu2 %vm2233_vm1, %v3888_v16  ;;  %v3883_v16 = vmax.f32 %v3308_v7, 0.0 }
 0x4cc   : > { %v1598_v5 = vpop.f32.mrf.mxu0 }
 0x4cd   : > { %v1599_v44 = vadd.f32 %v7360_v39, %v1598_v5 }
 0x4ce   : > { %v7675_v32 = vpop.f32.mrf.mxu1 }
 0x4cf   : > { %8969 = vst [vmem:[#allocation83_spill] sm:$0xff] %v7675_v32  ;;  %v2100_v40 = vmax.f32 %v1599_v44, 0.0  ;;  %5427 = vmatmul.msk.f32.gmra.mxu0 %vm413_vm0, %v294_v12  ;;  %5903 = vmatpush.xpose.msk.msra.mxu2 %vm2233_vm1, %v3887_v60  ;;  %v297_v60 = vld [vmem:[%s6296_s24 + $0x4c0] sm:$0xff] }
 0x4d1   : > { %5667 = vmatmul.msk.f32.gmra.mxu1 %vm2233_vm1, %v2100_v40 }
 0x4d3   : > { %5904 = vmatpush.xpose.msk.msra.mxu2 %vm2233_vm1, %v3886_v33 }
 0x4d4   : > { %v1601_v36 = vpop.f32.mrf.mxu0 }
 0x4d5   : > { %v1602_v37 = vadd.f32 %v7360_v39, %v1601_v36  ;;  %v298_v36 = vld [vmem:[%s6296_s24 + $0x4c8] sm:$0xff] }
 0x4d6   : > { %v7687_v47 = vpop.f32.mrf.mxu1 }
 0x4d7   : > { %8970 = vst [vmem:[#allocation84_spill] sm:$0xff] %v7687_v47  ;;  %v2101_v18 = vmax.f32 %v1602_v37, 0.0  ;;  %5428 = vmatmul.msk.f32.gmra.mxu0 %vm413_vm0, %v295_v25  ;;  %5905 = vmatpush.xpose.msk.msra.mxu2 %vm2233_vm1, %v3885_v57 }
 0x4d9   : > { %5668 = vmatmul.msk.f32.gmra.mxu1 %vm2233_vm1, %v2101_v18  ;;  %v299_v18 = vld [vmem:[%s6296_s24 + $0x4d0] sm:$0xff] }
 0x4db   : > { %5906 = vmatpush.xpose.msk.msra.mxu2 %vm2233_vm1, %v3884_v11 }
 0x4dc   : > { %v1604_v10 = vpop.f32.mrf.mxu0 }
 0x4dd   : > { %v1605_v5 = vadd.f32 %v7360_v39, %v1604_v10 }
 0x4de   : > { %v7697_v12 = vpop.f32.mrf.mxu1 }
 0x4df   : > { %8971 = vst [vmem:[#allocation85_spill] sm:$0xff] %v7697_v12  ;;  %v2102_v48 = vmax.f32 %v1605_v5, 0.0  ;;  %5429 = vmatmul.msk.f32.gmra.mxu0 %vm413_vm0, %v296_v8  ;;  %5907 = vmatpush.xpose.msk.msra.mxu2 %vm2233_vm1, %v3883_v16  ;;  %v300_v16 = vld [vmem:[%s6296_s24 + $0x4d8] sm:$0xff] }
 0x4e1   : > { %5669 = vmatmul.msk.f32.gmra.mxu1 %vm2233_vm1, %v2102_v48 }
 0x4e4   : > { %v1607_v45 = vpop.f32.mrf.mxu0 }
 0x4e5   : > { %v1608_v44 = vadd.f32 %v7360_v39, %v1607_v45 }
 0x4e6   : > { %v7704_v40 = vpop.f32.mrf.mxu1 }
 0x4e7   : > { %8972 = vst [vmem:[#allocation86_spill] sm:$0xff] %v7704_v40  ;;  %v2103_v51 = vmax.f32 %v1608_v44, 0.0  ;;  %5430 = vmatmul.msk.f32.gmra.mxu0 %vm413_vm0, %v297_v60  ;;  %v301_v44 = vld [vmem:[%s6296_s24 + $0x4e0] sm:$0xff] }
 0x4e9   : > { %5670 = vmatmul.msk.f32.gmra.mxu1 %vm2233_vm1, %v2103_v51 }
 0x4ec   : > { %v1610_v33 = vpop.f32.mrf.mxu0 }
 0x4ed   : > { %v1611_v25 = vadd.f32 %v7360_v39, %v1610_v33 }
 0x4ee   : > { %v7710_v1 = vpop.f32.mrf.mxu1 }
 0x4ef   : > { %8973 = vst [vmem:[#allocation87_spill] sm:$0xff] %v7710_v1  ;;  %v2104_v57 = vmax.f32 %v1611_v25, 0.0  ;;  %5431 = vmatmul.msk.f32.gmra.mxu0 %vm413_vm0, %v298_v36 }
 0x4f1   : > { %5671 = vmatmul.msk.f32.gmra.mxu1 %vm2233_vm1, %v2104_v57  ;;  %v302_v57 = vld [vmem:[%s6296_s24 + $0x4e8] sm:$0xff] }
 0x4f4   : > { %v1613_v37 = vpop.f32.mrf.mxu0 }
 0x4f5   : > { %v1614_v7 = vadd.f32 %v7360_v39, %v1613_v37 }
 0x4f6   : > { %v7716_v11 = vpop.f32.mrf.mxu1 }
 0x4f7   : > { %8974 = vst [vmem:[#allocation88_spill] sm:$0xff] %v7716_v11  ;;  %v2105_v10 = vmax.f32 %v1614_v7, 0.0  ;;  %5432 = vmatmul.msk.f32.gmra.mxu0 %vm413_vm0, %v299_v18 }
 0x4f9   : > { %5672 = vmatmul.msk.f32.gmra.mxu1 %vm2233_vm1, %v2105_v10 }
 0x4fc   : > { %v1616_v8 = vpop.f32.mrf.mxu0 }
 0x4fd   : > { %v1617_v5 = vadd.f32 %v7360_v39, %v1616_v8 }
 0x4fe   : > { %v7722_v48 = vpop.f32.mrf.mxu1 }
 0x4ff   : > { %8975 = vst [vmem:[#allocation89_spill] sm:$0xff] %v7722_v48  ;;  %v2106_v45 = vmax.f32 %v1617_v5, 0.0  ;;  %5433 = vmatmul.msk.f32.gmra.mxu0 %vm413_vm0, %v300_v16 }
 0x501   : > { %5673 = vmatmul.msk.f32.gmra.mxu1 %vm2233_vm1, %v2106_v45 }
 0x504   : > { %v1619_v60 = vpop.f32.mrf.mxu0 }
 0x505   : > { %v1620_v51 = vadd.f32 %v7360_v39, %v1619_v60 }
 0x506   : > { %v7728_v33 = vpop.f32.mrf.mxu1 }
 0x507   : > { %8976 = vst [vmem:[#allocation90_spill] sm:$0xff] %v7728_v33  ;;  %v2107_v36 = vmax.f32 %v1620_v51, 0.0  ;;  %5434 = vmatmul.msk.f32.gmra.mxu0 %vm413_vm0, %v301_v44  ;;  %v3206_v33 = vadd.f32 %v7607_v54, %v7215_v26 }
 0x509   : > { %5674 = vmatmul.msk.f32.gmra.mxu1 %vm2233_vm1, %v2107_v36 }
 0x50c   : > { %v1622_v25 = vpop.f32.mrf.mxu0 }
 0x50d   : > { %v1623_v37 = vadd.f32 %v7360_v39, %v1622_v25 }
 0x50e   : > { %v7734_v18 = vpop.f32.mrf.mxu1 }
 0x50f   : > { %8977 = vst [vmem:[#allocation91_spill] sm:$0xff] %v7734_v18  ;;  %v2108_v7 = vmax.f32 %v1623_v37, 0.0  ;;  %5435 = vmatmul.msk.f32.gmra.mxu0 %vm413_vm0, %v302_v57 }
 0x511   : > { %5675 = vmatmul.msk.f32.gmra.mxu1 %vm2233_vm1, %v2108_v7 }
 0x514   : > { %v1625_v10 = vpop.f32.mrf.mxu0 }
 0x515   : > { %v1626_v8 = vadd.f32 %v7360_v39, %v1625_v10 }
 0x516   : > { %v7739_v16 = vpop.f32.mrf.mxu1 }
 0x517   : > { %8978 = vst [vmem:[#allocation92_spill] sm:$0xff] %v7739_v16  ;;  %v2109_v5 = vmax.f32 %v1626_v8, 0.0 }
 0x519   : > { %5676 = vmatmul.msk.f32.gmra.mxu1 %vm2233_vm1, %v2109_v5 }
 0x51c   : > { %v1628_v45 = vpop.f32.mrf.mxu0 }
 0x51d   : > { %v1629_v60 = vadd.f32 %v7360_v39, %v1628_v45 }
 0x51e   : > { %v7743_v44 = vpop.f32.mrf.mxu1 }
 0x51f   : > { %v2110_v51 = vmax.f32 %v1629_v60, 0.0 }
 0x521   : > { %5677 = vmatmul.msk.f32.gmra.mxu1 %vm2233_vm1, %v2110_v51 }
 0x524   : > { %v1631_v36 = vpop.f32.mrf.mxu0 }
 0x525   : > { %v1632_v25 = vadd.f32 %v7360_v39, %v1631_v36 }
 0x526   : > { %v7747_v57 = vpop.f32.mrf.mxu1 }
 0x527   : > { %v2111_v37 = vmax.f32 %v1632_v25, 0.0 }
 0x529   : > { %5678 = vmatmul.msk.f32.gmra.mxu1 %vm2233_vm1, %v2111_v37 }
 0x52c   : > { %v1634_v7 = vpop.f32.mrf.mxu0 }
 0x52d   : > { %v1635_v10 = vadd.f32 %v7360_v39, %v1634_v7 }
 0x52e   : > { %v7751_v8 = vpop.f32.mrf.mxu1 }
 0x52f   : > { %v2112_v5 = vmax.f32 %v1635_v10, 0.0 }
 0x531   : > { %5679 = vmatmul.msk.f32.gmra.mxu1 %vm2233_vm1, %v2112_v5 }
 0x534   : > { %v1637_v45 = vpop.f32.mrf.mxu0 }
 0x535   : > { %v1638_v60 = vadd.f32 %v7360_v39, %v1637_v45 }
 0x536   : > { %v7755_v51 = vpop.f32.mrf.mxu1 }
 0x537   : > { %v2113_v31 = vmax.f32 %v1638_v60, 0.0 }
 0x539   : > { %5680 = vmatmul.msk.f32.gmra.mxu1 %vm2233_vm1, %v2113_v31 }
 0x53c   : > { %v1640_v36 = vpop.f32.mrf.mxu0 }
 0x53d   : > { %v1641_v25 = vadd.f32 %v7360_v39, %v1640_v36 }
 0x53e   : > { %v7759_v37 = vpop.f32.mrf.mxu1 }
 0x53f   : > { %v2114_v24 = vmax.f32 %v1641_v25, 0.0 }
 0x541   : > { %5681 = vmatmul.msk.f32.gmra.mxu1 %vm2233_vm1, %v2114_v24 }
 0x544   : > { %v1643_v7 = vpop.f32.mrf.mxu0 }
 0x545   : > { %v1644_v10 = vadd.f32 %v7360_v39, %v1643_v7 }
 0x546   : > { %v7763_v5 = vpop.f32.mrf.mxu1 }
 0x547   : > { %v2115_v21 = vmax.f32 %v1644_v10, 0.0 }
 0x549   : > { %5682 = vmatmul.msk.f32.gmra.mxu1 %vm2233_vm1, %v2115_v21 }
 0x54c   : > { %v1646_v45 = vpop.f32.mrf.mxu0 }
 0x54d   : > { %v1647_v60 = vadd.f32 %v7360_v39, %v1646_v45 }
 0x54e   : > { %v7767_v31 = vpop.f32.mrf.mxu1 }
 0x54f   : > { %v2116_v17 = vmax.f32 %v1647_v60, 0.0 }
 0x551   : > { %5683 = vmatmul.msk.f32.gmra.mxu1 %vm2233_vm1, %v2116_v17 }
 0x554   : > { %v1649_v36 = vpop.f32.mrf.mxu0 }
 0x555   : > { %v1650_v25 = vadd.f32 %v7360_v39, %v1649_v36 }
 0x556   : > { %v7771_v24 = vpop.f32.mrf.mxu1 }
 0x557   : > { %v2117_v55 = vmax.f32 %v1650_v25, 0.0 }
 0x559   : > { %5684 = vmatmul.msk.f32.gmra.mxu1 %vm2233_vm1, %v2117_v55 }
 0x55c   : > { %v1652_v7 = vpop.f32.mrf.mxu0 }
 0x55d   : > { %v1653_v10 = vadd.f32 %v7360_v39, %v1652_v7 }
 0x55e   : > { %v7775_v21 = vpop.f32.mrf.mxu1 }
 0x55f   : > { %v2118_v32 = vmax.f32 %v1653_v10, 0.0 }
 0x561   : > { %5685 = vmatmul.msk.f32.gmra.mxu1 %vm2233_vm1, %v2118_v32 }
 0x564   : > { %v1655_v45 = vpop.f32.mrf.mxu0 }
 0x565   : > { %v1656_v60 = vadd.f32 %v7360_v39, %v1655_v45 }
 0x566   : > { %v7779_v17 = vpop.f32.mrf.mxu1 }
 0x567   : > { %v2119_v47 = vmax.f32 %v1656_v60, 0.0 }
 0x569   : > { %5686 = vmatmul.msk.f32.gmra.mxu1 %vm2233_vm1, %v2119_v47  ;;  %v7793_v47 = vld [vmem:[%s8887_s1 + $0x50] ss:$0 sm:$0xff] }
 0x56a   : > { %v1674_v16 = vadd.f32 %v7793_v47, %v6486_v6  ;;  %v3197_v6 = vadd.f32 %v7607_v54, %v7185_v61  ;;  %v3191_v61 = vadd.f32 %v7607_v54, %v7165_v35  ;;  %v3185_v35 = vadd.f32 %v7607_v54, %v7144_v59 }
 0x56c   : > { %v1658_v36 = vpop.f32.mrf.mxu0 }
 0x56d   : > { %v1659_v25 = vadd.f32 %v7360_v39, %v1658_v36 }
 0x56e   : > { %v7783_v55 = vpop.f32.mrf.mxu1 }
 0x56f   : > { %v2120_v12 = vmax.f32 %v1659_v25, 0.0 }
 0x571   : > { %5687 = vmatmul.msk.f32.gmra.mxu1 %vm2233_vm1, %v2120_v12  ;;  %v7799_v12 = vpop.f32.mrf.mxu2 }
 0x574   : > { %v1661_v7 = vpop.f32.mrf.mxu0 }
 0x575   : > { %v1662_v10 = vadd.f32 %v7360_v39, %v1661_v7  ;;  %v7804_v39 = vld [vmem:[%s8887_s1 + $0xa0] sm:$0x1] }
 0x576   : > { %v7787_v32 = vpop.f32.mrf.mxu1  ;;  %5874 = vmatmul.msk.f32.vlgmr.msrb.gmra.mxu2 %vm2233_vm1, %v7804_v39 }
 0x577   : > { %v2121_v40 = vmax.f32 %v1662_v10, 0.0  ;;  %v3434_v59 = vadd.f32 %v7607_v54, %v7787_v32 }
 0x579   : > { %5688 = vmatmul.msk.f32.gmra.mxu1 %vm2233_vm1, %v2121_v40 }
 0x57c   : > { %v1664_v45 = vpop.f32.mrf.mxu0 }
 0x57d   : > { %v1665_v60 = vadd.f32 %v7793_v47, %v1664_v45 }
 0x57e   : > { %v7796_v36 = vpop.f32.mrf.mxu1 }
 0x57f   : > { %v2122_v25 = vmax.f32 %v1665_v60, 0.0  ;;  %v3209_v60 = vadd.f32 %v7607_v54, %v7225_v46  ;;  %v3849_v46 = vmax.f32 %v3206_v33, 0.0 }
 0x581   : > { %5689 = vmatmul.msk.f32.gmra.mxu1 %vm2233_vm1, %v2122_v25  ;;  %v3850_v18 = vmax.f32 %v3209_v60, 0.0  ;;  %v1677_v60 = vadd.f32 %v7793_v47, %v6496_v13  ;;  %v1680_v13 = vadd.f32 %v7793_v47, %v6506_v20  ;;  %v3188_v20 = vadd.f32 %v7607_v54, %v7155_v30 }
 0x582   : > { %v3437_v30 = vadd.f32 %v7607_v54, %v7796_v36  ;;  %v3179_v36 = vadd.f32 %v7607_v54, %v7109_v4  ;;  %v3428_v4 = vadd.f32 %v7607_v54, %v7779_v17 }
 0x584   : > { %v1667_v40 = vpop.f32.mrf.mxu0  ;;  %v3840_v32 = vmax.f32 %v3179_v36, 0.0 }
 0x585   : > { %v1668_v7 = vadd.f32 %v7793_v47, %v1667_v40  ;;  %v3203_v40 = vadd.f32 %v7607_v54, %v7205_v28 }
 0x586   : > { %v3439_v10 = vpop.f32.mrf.mxu1 }
 0x587   : > { %v2123_v45 = vmax.f32 %v1668_v7, 0.0  ;;  %v2125_v7 = vmax.f32 %v1674_v16, 0.0  ;;  %v3848_v26 = vmax.f32 %v3203_v40, 0.0  ;;  %v3846_v16 = vmax.f32 %v3197_v6, 0.0 }
 0x589   : > { %5690 = vmatmul.msk.f32.gmra.mxu1 %vm2233_vm1, %v2123_v45 }
 0x58c   : > { %v1670_v25 = vpop.f32.mrf.mxu0 }
 0x58d   : > { %v1671_v1 = vadd.f32 %v7793_v47, %v1670_v25 }
 0x58e   : > { %v3442_v11 = vpop.f32.mrf.mxu1 }
 0x58f   : > { %v2124_v48 = vmax.f32 %v1671_v1, 0.0  ;;  %v3200_v1 = vadd.f32 %v7607_v54, %v7195_v63  ;;  %v3194_v63 = vadd.f32 %v7607_v54, %v7175_v3  ;;  %v3443_v3 = vadd.f32 %v7607_v54, %v3442_v11 }
 0x590   : > { %v3843_v11 = vmax.f32 %v3188_v20, 0.0 }
 0x591   : > { %5691 = vmatmul.msk.f32.vlgmr.msra.gmra.mxu3 %vm2233_vm1, %v2124_v48  ;;  %v3847_v28 = vmax.f32 %v3200_v1, 0.0  ;;  %v2126_v48 = vmax.f32 %v1677_v60, 0.0  ;;  %v3440_v60 = vadd.f32 %v7607_v54, %v3439_v10  ;;  %v3928_v6 = vmax.f32 %v3443_v3, 0.0 }
 0x592   : > { %5841 = vmatpush.xpose.msk.msra.mxu3 %vm2233_vm1, %v3850_v18  ;;  %v3842_v10 = vmax.f32 %v3185_v35, 0.0  ;;  %v1692_v3 = vadd.f32 %v7793_v47, %v6546_v49  ;;  %v3164_v49 = vadd.f32 %v7607_v54, %v7030_v14 }
 0x596   : > { %5842 = vmatpush.xpose.msk.msra.mxu3 %vm2233_vm1, %v3849_v46  ;;  %v3445_v45 = vpop.f32.mrf.mxu1  ;;  %v3845_v46 = vmax.f32 %v3194_v63, 0.0 }
 0x597   : > { %v3446_v25 = vadd.f32 %v7607_v54, %v3445_v45  ;;  %v3844_v45 = vmax.f32 %v3191_v61, 0.0 }
 0x599   : > { %5692 = vmatmul.msk.f32.gmra.mxu3 %vm2233_vm1, %v2125_v7  ;;  %v2127_v7 = vmax.f32 %v1680_v13, 0.0  ;;  %v3929_v1 = vmax.f32 %v3446_v25, 0.0  ;;  %v3925_v13 = vmax.f32 %v3434_v59, 0.0  ;;  %v1689_v25 = vadd.f32 %v7793_v47, %v6536_v42 }
 0x59a   : > { %5843 = vmatpush.xpose.msk.msra.mxu3 %vm2233_vm1, %v3848_v26  ;;  %v1683_v26 = vadd.f32 %v7793_v47, %v6516_v27  ;;  %v3182_v27 = vadd.f32 %v7607_v54, %v7130_v53  ;;  %v3431_v53 = vadd.f32 %v7607_v54, %v7783_v55  ;;  %v3173_v55 = vadd.f32 %v7607_v54, %v7077_v41 }
 0x59b   : > { %v3170_v42 = vadd.f32 %v7607_v54, %v7061_v52  ;;  %v3422_v41 = vadd.f32 %v7607_v54, %v7771_v24  ;;  %v3419_v52 = vadd.f32 %v7607_v54, %v7767_v31  ;;  %v3835_v31 = vmax.f32 %v3164_v49, 0.0  ;;  %v8984_v49 = vld [vmem:[#allocation10_spill] sm:$0xff] }
 0x59c   : > { %v3841_v63 = vmax.f32 %v3182_v27, 0.0  ;;  %v3838_v17 = vmax.f32 %v3173_v55, 0.0  ;;  %v1701_v27 = vadd.f32 %v7793_v47, %v6576_v9  ;;  %v1707_v9 = vadd.f32 %v7793_v47, %v6594_v29  ;;  %v8980_v55 = vld [vmem:[#allocation6_spill] sm:$0xff] }
 0x59d   : > { %v3837_v20 = vmax.f32 %v3170_v42, 0.0 }
 0x59e   : > { %5844 = vmatpush.xpose.msk.msra.mxu3 %vm2233_vm1, %v3847_v28  ;;  %v3448_v33 = vpop.f32.mrf.mxu1  ;;  %v2128_v28 = vmax.f32 %v1683_v26, 0.0  ;;  %v3921_v26 = vmax.f32 %v3422_v41, 0.0 }
 0x59f   : > { %v3449_v18 = vadd.f32 %v7607_v54, %v3448_v33  ;;  %v1686_v33 = vadd.f32 %v7793_v47, %v6526_v34  ;;  %v3176_v34 = vadd.f32 %v7607_v54, %v7093_v15  ;;  %v3425_v15 = vadd.f32 %v7607_v54, %v7775_v21 }
 0x5a0   : > { %v3167_v21 = vadd.f32 %v7607_v54, %v7045_v22  ;;  %v3416_v22 = vadd.f32 %v7607_v54, %v7763_v5  ;;  %v3410_v5 = vadd.f32 %v7607_v54, %v7755_v51  ;;  %v2134_v51 = vmax.f32 %v1701_v27, 0.0 }
 0x5a1   : > { %v3930_v40 = vmax.f32 %v3449_v18, 0.0  ;;  %5693 = vmatmul.msk.f32.gmra.mxu3 %vm2233_vm1, %v2126_v48  ;;  %v3927_v48 = vmax.f32 %v3440_v60, 0.0  ;;  %v3926_v18 = vmax.f32 %v3437_v30, 0.0  ;;  %v3839_v61 = vmax.f32 %v3176_v34, 0.0 }
 0x5a2   : > { %5845 = vmatpush.xpose.msk.msra.mxu3 %vm2233_vm1, %v3846_v16  ;;  %v2129_v16 = vmax.f32 %v1686_v33, 0.0  ;;  %v3836_v24 = vmax.f32 %v3167_v21, 0.0  ;;  %v1695_v60 = vadd.f32 %v7793_v47, %v6556_v56  ;;  %v3919_v14 = vmax.f32 %v3416_v22, 0.0 }
 0x5a3   : > { %5926 = vmatpush.xpose.msk.msrb.mxu2 %vm2233_vm1, %v3930_v40  ;;  %v3924_v40 = vmax.f32 %v3431_v53, 0.0  ;;  %v1698_v56 = vadd.f32 %v7793_v47, %v6566_v0  ;;  %v3404_v0 = vadd.f32 %v7607_v54, %v7747_v57  ;;  %v2136_v57 = vmax.f32 %v1707_v9, 0.0 }
 0x5a4   : > { %v2132_v35 = vmax.f32 %v1695_v60, 0.0  ;;  %v1719_v53 = vadd.f32 %v7793_v47, %v6639_v23  ;;  %v8979_v23 = vld [vmem:[#allocation5_spill] sm:$0xff] }
 0x5a5   : > { %v2133_v30 = vmax.f32 %v1698_v56, 0.0  ;;  %v3915_v33 = vmax.f32 %v3404_v0, 0.0  ;;  %v8988_v0 = vld [vmem:[#allocation14_spill] sm:$0xff] }
 0x5a6   : > { %5846 = vmatpush.xpose.msk.msra.mxu3 %vm2233_vm1, %v3845_v46  ;;  %v2130_v46 = vmax.f32 %v1689_v25, 0.0 }
 0x5a7   : > { %5927 = vmatpush.xpose.msk.msrb.mxu2 %vm2233_vm1, %v3929_v1  ;;  %v3922_v1 = vmax.f32 %v3425_v15, 0.0  ;;  %v8981_v15 = vld [vmem:[#allocation7_spill] sm:$0xff] }
 0x5a9   : > { %5694 = vmatmul.msk.f32.gmra.mxu3 %vm2233_vm1, %v2127_v7  ;;  %v3923_v7 = vmax.f32 %v3428_v4, 0.0  ;;  %v1728_v4 = vadd.f32 %v7793_v47, %v8979_v23 }
 0x5aa   : > { %5847 = vmatpush.xpose.msk.msra.mxu3 %vm2233_vm1, %v3844_v45  ;;  %v2131_v45 = vmax.f32 %v1692_v3, 0.0  ;;  %v8982_v3 = vld [vmem:[#allocation8_spill] sm:$0xff] }
 0x5ab   : > { %5928 = vmatpush.xpose.msk.msrb.mxu2 %vm2233_vm1, %v3928_v6  ;;  %v3920_v6 = vmax.f32 %v3419_v52, 0.0  ;;  %v1737_v41 = vadd.f32 %v7793_v47, %v8982_v3  ;;  %v8995_v3 = vld [vmem:[#allocation21_spill] sm:$0xff] }
 0x5ad   : > { %v2146_v21 = vmax.f32 %v1737_v41, 0.0  ;;  %v1776_v41 = vadd.f32 %v7793_v47, %v8995_v3 }
 0x5ae   : > { %5848 = vmatpush.xpose.msk.msra.mxu3 %vm2233_vm1, %v3843_v11  ;;  %v3413_v11 = vadd.f32 %v7607_v54, %v7759_v37  ;;  %v3407_v37 = vadd.f32 %v7607_v54, %v7751_v8  ;;  %v1704_v8 = vadd.f32 %v7793_v47, %v6586_v19 }
 0x5af   : > { %5929 = vmatpush.xpose.msk.msrb.mxu2 %vm2233_vm1, %v3927_v48  ;;  %v3917_v48 = vmax.f32 %v3410_v5, 0.0 }
 0x5b0   : > { %v2135_v59 = vmax.f32 %v1704_v8, 0.0  ;;  %v8989_v8 = vld [vmem:[#allocation15_spill] sm:$0xff] }
 0x5b1   : > { %5695 = vmatmul.msk.f32.gmra.mxu3 %vm2233_vm1, %v2128_v28  ;;  %v3918_v28 = vmax.f32 %v3413_v11, 0.0 }
 0x5b2   : > { %5849 = vmatpush.xpose.msk.msra.mxu3 %vm2233_vm1, %v3842_v10  ;;  %v3916_v10 = vmax.f32 %v3407_v37, 0.0 }
 0x5b3   : > { %5930 = vmatpush.xpose.msk.msrb.mxu2 %vm2233_vm1, %v3926_v18  ;;  %v1710_v18 = vadd.f32 %v7793_v47, %v6602_v38  ;;  %v2140_v38 = vmax.f32 %v1719_v53, 0.0 }
 0x5b5   : > { %v2137_v36 = vmax.f32 %v1710_v18, 0.0  ;;  %v8990_v18 = vld [vmem:[#allocation16_spill] sm:$0xff] }
 0x5b6   : > { %5850 = vmatpush.xpose.msk.msra.mxu3 %vm2233_vm1, %v3841_v63  ;;  %v1713_v63 = vadd.f32 %v7793_v47, %v6610_v50 }
 0x5b7   : > { %5931 = vmatpush.xpose.msk.msrb.mxu2 %vm2233_vm1, %v3925_v13  ;;  %v1722_v13 = vadd.f32 %v7793_v47, %v6655_v43  ;;  %v2143_v43 = vmax.f32 %v1728_v4, 0.0  ;;  %v8993_v4 = vld [vmem:[#allocation19_spill] sm:$0xff] }
 0x5b8   : > { %v2138_v19 = vmax.f32 %v1713_v63, 0.0 }
 0x5b9   : > { %5696 = vmatmul.msk.f32.gmra.mxu3 %vm2233_vm1, %v2129_v16  ;;  %v1716_v16 = vadd.f32 %v7793_v47, %v6625_v2  ;;  %v2141_v34 = vmax.f32 %v1722_v13, 0.0  ;;  %v1725_v2 = vadd.f32 %v7793_v47, %v6671_v58  ;;  %v8020_v13 = vpop.f32.mrf.mxu2  ;;  %5908 = vmatmul.msk.f32.vlgmr.msra.gmra.mxu2 %vm2233_vm1, %v7804_v39 }
 0x5ba   : > { %5851 = vmatpush.xpose.msk.msra.mxu3 %vm2233_vm1, %v3840_v32 }
 0x5bb   : > { %5932 = vmatpush.xpose.msk.msrb.mxu2 %vm2233_vm1, %v3924_v40  ;;  %v2139_v29 = vmax.f32 %v1716_v16, 0.0  ;;  %v2142_v25 = vmax.f32 %v1725_v2, 0.0  ;;  %v8991_v16 = vld [vmem:[#allocation17_spill] sm:$0xff] }
 0x5be   : > { %5852 = vmatpush.xpose.msk.msra.mxu3 %vm2233_vm1, %v3839_v61  ;;  %v1731_v61 = vadd.f32 %v7793_v47, %v8980_v55 }
 0x5bf   : > { %5933 = vmatpush.xpose.msk.msrb.mxu2 %vm2233_vm1, %v3923_v7  ;;  %v1734_v7 = vadd.f32 %v7793_v47, %v8981_v15 }
 0x5c0   : > { %v2144_v58 = vmax.f32 %v1731_v61, 0.0 }
 0x5c1   : > { %5697 = vmatmul.msk.f32.gmra.mxu3 %vm2233_vm1, %v2130_v46 }
 0x5c2   : > { %5853 = vmatpush.xpose.msk.msra.mxu3 %vm2233_vm1, %v3838_v17  ;;  %v2145_v17 = vmax.f32 %v1734_v7, 0.0 }
 0x5c3   : > { %5934 = vmatpush.xpose.msk.msrb.mxu2 %vm2233_vm1, %v3922_v1 }
 0x5c6   : > { %5854 = vmatpush.xpose.msk.msra.mxu3 %vm2233_vm1, %v3837_v20  ;;  %v8983_v20 = vld [vmem:[#allocation9_spill] sm:$0xff] }
 0x5c7   : > { %5935 = vmatpush.xpose.msk.msrb.mxu2 %vm2233_vm1, %v3921_v26 }
 0x5c9   : > { %5698 = vmatmul.msk.f32.gmra.mxu3 %vm2233_vm1, %v2131_v45  ;;  %v1740_v45 = vadd.f32 %v7793_v47, %v8983_v20  ;;  %v2159_v20 = vmax.f32 %v1776_v41, 0.0 }
 0x5ca   : > { %5855 = vmatpush.xpose.msk.msra.mxu3 %vm2233_vm1, %v3836_v24  ;;  %v1743_v24 = vadd.f32 %v7793_v47, %v8984_v49 }
 0x5cb   : > { %5936 = vmatpush.xpose.msk.msrb.mxu2 %vm2233_vm1, %v3920_v6  ;;  %v2147_v26 = vmax.f32 %v1740_v45, 0.0  ;;  %v8985_v6 = vld [vmem:[#allocation11_spill] sm:$0xff] }
 0x5cc   : > { %v2148_v22 = vmax.f32 %v1743_v24, 0.0  ;;  %v8996_v24 = vld [vmem:[#allocation22_spill] sm:$0xff] }
 0x5ce   : > { %5856 = vmatpush.xpose.msk.msra.mxu3 %vm2233_vm1, %v3835_v31  ;;  %v1746_v31 = vadd.f32 %v7793_v47, %v8985_v6 }
 0x5cf   : > { %5937 = vmatpush.xpose.msk.msrb.mxu2 %vm2233_vm1, %v3919_v14  ;;  %v8986_v14 = vld [vmem:[#allocation12_spill] sm:$0xff] }
 0x5d0   : > { %v2149_v11 = vmax.f32 %v1746_v31, 0.0  ;;  %v1749_v56 = vadd.f32 %v7793_v47, %v8986_v14 }
 0x5d1   : > { %5699 = vmatmul.msk.f32.gmra.mxu3 %vm2233_vm1, %v2132_v35 }
 0x5d3   : > { %5938 = vmatpush.xpose.msk.msrb.mxu2 %vm2233_vm1, %v3918_v28  ;;  %v2150_v28 = vmax.f32 %v1749_v56, 0.0 }
 0x5d7   : > { %5939 = vmatpush.xpose.msk.msrb.mxu2 %vm2233_vm1, %v3917_v48 }
 0x5d9   : > { %5700 = vmatmul.msk.f32.gmra.mxu3 %vm2233_vm1, %v2133_v30  ;;  %v8987_v30 = vld [vmem:[#allocation13_spill] sm:$0xff] }
 0x5da   : > { %v1752_v37 = vadd.f32 %v7793_v47, %v8987_v30  ;;  %v8997_v30 = vld [vmem:[#allocation23_spill] sm:$0xff] }
 0x5db   : > { %5940 = vmatpush.xpose.msk.msrb.mxu2 %vm2233_vm1, %v3916_v10  ;;  %v1755_v10 = vadd.f32 %v7793_v47, %v8988_v0 }
 0x5dc   : > { %v2151_v27 = vmax.f32 %v1752_v37, 0.0  ;;  %v1782_v37 = vadd.f32 %v7793_v47, %v8997_v30 }
 0x5df   : > { %5941 = vmatpush.xpose.msk.msrb.mxu2 %vm2233_vm1, %v3915_v33  ;;  %v2152_v33 = vmax.f32 %v1755_v10, 0.0 }
 0x5e1   : > { %5701 = vmatmul.msk.f32.gmra.mxu3 %vm2233_vm1, %v2134_v51 }
 0x5e9   : > { %5702 = vmatmul.msk.f32.gmra.mxu3 %vm2233_vm1, %v2135_v59  ;;  %v1758_v59 = vadd.f32 %v7793_v47, %v8989_v8 }
 0x5f1   : > { %5703 = vmatmul.msk.f32.gmra.mxu3 %vm2233_vm1, %v2136_v57  ;;  %v2153_v57 = vmax.f32 %v1758_v59, 0.0 }
 0x5f9   : > { %5704 = vmatmul.msk.f32.gmra.mxu3 %vm2233_vm1, %v2137_v36  ;;  %v1761_v36 = vadd.f32 %v7793_v47, %v8990_v18 }
 0x601   : > { %5705 = vmatmul.msk.f32.gmra.mxu3 %vm2233_vm1, %v2138_v19  ;;  %v2154_v19 = vmax.f32 %v1761_v36, 0.0 }
 0x609   : > { %5706 = vmatmul.msk.f32.gmra.mxu3 %vm2233_vm1, %v2139_v29  ;;  %v1764_v29 = vadd.f32 %v7793_v47, %v8991_v16 }
 0x611   : > { %5707 = vmatmul.msk.f32.gmra.mxu3 %vm2233_vm1, %v2140_v38  ;;  %v2155_v38 = vmax.f32 %v1764_v29, 0.0 }
 0x614   : > { %v7954_v50 = vpop.f32.mrf.mxu3 }
 0x619   : > { %5708 = vmatmul.msk.f32.gmra.mxu3 %vm2233_vm1, %v2141_v34  ;;  %v8992_v34 = vld [vmem:[#allocation18_spill] sm:$0xff] }
 0x61a   : > { %v1767_v2 = vadd.f32 %v7793_v47, %v8992_v34 }
 0x61c   : > { %v7959_v32 = vpop.f32.mrf.mxu3  ;;  %v2156_v23 = vmax.f32 %v1767_v2, 0.0 }
 0x621   : > { %5709 = vmatmul.msk.f32.gmra.mxu3 %vm2233_vm1, %v2142_v25 }
 0x624   : > { %v7964_v40 = vpop.f32.mrf.mxu3 }
 0x629   : > { %5710 = vmatmul.msk.f32.gmra.mxu3 %vm2233_vm1, %v2143_v43  ;;  %v1770_v43 = vadd.f32 %v7793_v47, %v8993_v4 }
 0x62b   : > { %v2157_v61 = vmax.f32 %v1770_v43, 0.0  ;;  %v9000_v43 = vld [vmem:[#allocation26_spill] sm:$0xff] }
 0x62c   : > { %v7969_v46 = vpop.f32.mrf.mxu3 }
 0x631   : > { %5711 = vmatmul.msk.f32.gmra.mxu3 %vm2233_vm1, %v2144_v58  ;;  %v8994_v58 = vld [vmem:[#allocation20_spill] sm:$0xff] }
 0x632   : > { %v1773_v15 = vadd.f32 %v7793_v47, %v8994_v58 }
 0x634   : > { %v7974_v42 = vpop.f32.mrf.mxu3 }
 0x639   : > { %5712 = vmatmul.msk.f32.gmra.mxu3 %vm2233_vm1, %v2145_v17  ;;  %v2158_v17 = vmax.f32 %v1773_v15, 0.0 }
 0x63c   : > { %v7979_v1 = vpop.f32.mrf.mxu3 }
 0x641   : > { %5713 = vmatmul.msk.f32.gmra.mxu3 %vm2233_vm1, %v2146_v21 }
 0x644   : > { %v7984_v52 = vpop.f32.mrf.mxu3 }
 0x649   : > { %5714 = vmatmul.msk.f32.gmra.mxu3 %vm2233_vm1, %v2147_v26 }
 0x64c   : > { %v7989_v60 = vpop.f32.mrf.mxu3 }
 0x651   : > { %5715 = vmatmul.msk.f32.gmra.mxu3 %vm2233_vm1, %v2148_v22  ;;  %v1779_v22 = vadd.f32 %v7793_v47, %v8996_v24 }
 0x653   : > { %v2160_v14 = vmax.f32 %v1779_v22, 0.0 }
 0x654   : > { %v7994_v35 = vpop.f32.mrf.mxu3 }
 0x659   : > { %5716 = vmatmul.msk.f32.gmra.mxu3 %vm2233_vm1, %v2149_v11 }
 0x65c   : > { %v7999_v5 = vpop.f32.mrf.mxu3 }
 0x661   : > { %5717 = vmatmul.msk.f32.gmra.mxu3 %vm2233_vm1, %v2150_v28 }
 0x664   : > { %v8004_v48 = vpop.f32.mrf.mxu3 }
 0x669   : > { %5718 = vmatmul.msk.f32.gmra.mxu3 %vm2233_vm1, %v2151_v27 }
 0x66c   : > { %v8009_v51 = vpop.f32.mrf.mxu3 }
 0x671   : > { %5719 = vmatmul.msk.f32.gmra.mxu3 %vm2233_vm1, %v2152_v33  ;;  %v2161_v33 = vmax.f32 %v1782_v37, 0.0  ;;  %v9004_v37 = vld [vmem:[#allocation30_spill] sm:$0xff] }
 0x674   : > { %v3526_v9 = vpop.f32.mrf.mxu3 }
 0x675   : > { %v3527_v36 = vadd.f32 %v7607_v54, %v3526_v9  ;;  %v3521_v9 = vadd.f32 %v7607_v54, %v8004_v48  ;;  %v3515_v48 = vadd.f32 %v7607_v54, %v7994_v35  ;;  %v3509_v35 = vadd.f32 %v7607_v54, %v7984_v52 }
 0x677   : > { %v3954_v4 = vmax.f32 %v3521_v9, 0.0  ;;  %v9008_v9 = vld [vmem:[#allocation34_spill] sm:$0xff] }
 0x679   : > { %5720 = vmatmul.msk.f32.gmra.mxu3 %vm2233_vm1, %v2153_v57  ;;  %v8998_v57 = vld [vmem:[#allocation24_spill] sm:$0xff] }
 0x67a   : > { %v1785_v18 = vadd.f32 %v7793_v47, %v8998_v57 }
 0x67c   : > { %v3529_v63 = vpop.f32.mrf.mxu3  ;;  %v2162_v29 = vmax.f32 %v1785_v18, 0.0  ;;  %v9006_v18 = vld [vmem:[#allocation32_spill] sm:$0xff] }
 0x67d   : > { %v3530_v8 = vadd.f32 %v7607_v54, %v3529_v63  ;;  %v3956_v63 = vmax.f32 %v3527_v36, 0.0  ;;  %v1809_v36 = vadd.f32 %v7793_v47, %v9006_v18  ;;  %v9017_v18 = vld [vmem:[#allocation43_spill] sm:$0xff] }
 0x681   : > { %5721 = vmatmul.msk.f32.gmra.mxu3 %vm2233_vm1, %v2154_v19  ;;  %v3957_v19 = vmax.f32 %v3530_v8, 0.0 }
 0x684   : > { %v3532_v53 = vpop.f32.mrf.mxu3 }
 0x685   : > { %v3533_v27 = vadd.f32 %v7607_v54, %v3532_v53  ;;  %v3524_v53 = vadd.f32 %v7607_v54, %v8009_v51  ;;  %v3518_v51 = vadd.f32 %v7607_v54, %v7999_v5  ;;  %v3512_v5 = vadd.f32 %v7607_v54, %v7989_v60  ;;  %v8100_v60 = vld [vmem:[%s8887_s1 + $0x98] ss:$0 sm:$0xff] }
 0x687   : > { %v3958_v59 = vmax.f32 %v3533_v27, 0.0  ;;  %v3955_v2 = vmax.f32 %v3524_v53, 0.0  ;;  %v3951_v41 = vmax.f32 %v3512_v5, 0.0  ;;  %v1803_v27 = vadd.f32 %v7793_v47, %v9004_v37  ;;  %v9007_v53 = vld [vmem:[#allocation33_spill] sm:$0xff] }
 0x689   : > { %5722 = vmatmul.msk.f32.gmra.mxu3 %vm2233_vm1, %v2155_v38  ;;  %v8999_v38 = vld [vmem:[#allocation25_spill] sm:$0xff] }
 0x68a   : > { %v1788_v34 = vadd.f32 %v7793_v47, %v8999_v38 }
 0x68c   : > { %v3535_v25 = vpop.f32.mrf.mxu3 }
 0x68d   : > { %v3536_v56 = vadd.f32 %v7607_v54, %v3535_v25 }
 0x68f   : > { %v3959_v0 = vmax.f32 %v3536_v56, 0.0 }
 0x691   : > { %5723 = vmatmul.msk.f32.gmra.mxu3 %vm2233_vm1, %v2156_v23  ;;  %v2163_v23 = vmax.f32 %v1788_v34, 0.0 }
 0x694   : > { %v3538_v55 = vpop.f32.mrf.mxu3 }
 0x695   : > { %v3539_v6 = vadd.f32 %v7607_v54, %v3538_v55  ;;  %v1791_v55 = vadd.f32 %v7793_v47, %v9000_v43 }
 0x697   : > { %v3960_v28 = vmax.f32 %v3539_v6, 0.0  ;;  %v2164_v15 = vmax.f32 %v1791_v55, 0.0 }
 0x699   : > { %5724 = vmatmul.msk.f32.gmra.mxu3 %vm2233_vm1, %v2157_v61  ;;  %v3953_v61 = vmax.f32 %v3518_v51, 0.0 }
 0x69c   : > { %v3541_v7 = vpop.f32.mrf.mxu3 }
 0x69d   : > { %v3542_v26 = vadd.f32 %v7607_v54, %v3541_v7  ;;  %v3952_v7 = vmax.f32 %v3515_v48, 0.0 }
 0x69f   : > { %v3961_v31 = vmax.f32 %v3542_v26, 0.0  ;;  %v3950_v26 = vmax.f32 %v3509_v35, 0.0 }
 0x6a1   : > { %5725 = vmatmul.msk.f32.gmra.mxu3 %vm2233_vm1, %v2158_v17  ;;  %v9001_v17 = vld [vmem:[#allocation27_spill] sm:$0xff] }
 0x6a2   : > { %v1794_v3 = vadd.f32 %v7793_v47, %v9001_v17  ;;  %v9011_v17 = vld [vmem:[#allocation37_spill] sm:$0xff] }
 0x6a4   : > { %v3544_v21 = vpop.f32.mrf.mxu3 }
 0x6a5   : > { %v3545_v45 = vadd.f32 %v7607_v54, %v3544_v21  ;;  %v3503_v54 = vadd.f32 %v8100_v60, %v7974_v42 }
 0x6a7   : > { %v3962_v49 = vmax.f32 %v3545_v45, 0.0  ;;  %v3506_v45 = vadd.f32 %v8100_v60, %v7979_v1  ;;  %v3500_v1 = vadd.f32 %v8100_v60, %v7969_v46 }
 0x6a9   : > { %5726 = vmatmul.msk.f32.gmra.mxu3 %vm2233_vm1, %v2159_v20  ;;  %5960 = vmatpush.xpose.msk.msra.mxu2 %vm2233_vm1, %v3962_v49  ;;  %v2165_v20 = vmax.f32 %v1794_v3, 0.0  ;;  %v9002_v49 = vld [vmem:[#allocation28_spill] sm:$0xff]  ;;  %v3949_v52 = vmax.f32 %v3506_v45, 0.0  ;;  %v1824_v3 = vadd.f32 %v7793_v47, %v9011_v17 }
 0x6aa   : > { %v1797_v24 = vadd.f32 %v7793_v47, %v9002_v49 }
 0x6ac   : > { %v8043_v11 = vpop.f32.mrf.mxu3  ;;  %v2166_v6 = vmax.f32 %v1797_v24, 0.0  ;;  %v9013_v24 = vld [vmem:[#allocation39_spill] sm:$0xff] }
 0x6ad   : > { %5961 = vmatpush.xpose.msk.msra.mxu2 %vm2233_vm1, %v3961_v31  ;;  %v3948_v31 = vmax.f32 %v3503_v54, 0.0  ;;  %v1830_v54 = vadd.f32 %v7793_v47, %v9013_v24 }
 0x6b1   : > { %5727 = vmatmul.msk.f32.gmra.mxu3 %vm2233_vm1, %v2160_v14  ;;  %5962 = vmatpush.xpose.msk.msra.mxu2 %vm2233_vm1, %v3960_v28  ;;  %v9003_v14 = vld [vmem:[#allocation29_spill] sm:$0xff]  ;;  %v3947_v28 = vmax.f32 %v3500_v1, 0.0  ;;  %v9014_v1 = vld [vmem:[#allocation40_spill] sm:$0xff] }
 0x6b2   : > { %v1800_v56 = vadd.f32 %v7793_v47, %v9003_v14 }
 0x6b4   : > { %v8052_v10 = vpop.f32.mrf.mxu3  ;;  %v2167_v42 = vmax.f32 %v1800_v56, 0.0 }
 0x6b5   : > { %5963 = vmatpush.xpose.msk.msra.mxu2 %vm2233_vm1, %v3959_v0  ;;  %v2168_v0 = vmax.f32 %v1803_v27, 0.0 }
 0x6b9   : > { %5728 = vmatmul.msk.f32.gmra.mxu3 %vm2233_vm1, %v2161_v33  ;;  %5964 = vmatpush.xpose.msk.msra.mxu2 %vm2233_vm1, %v3958_v59  ;;  %v9005_v33 = vld [vmem:[#allocation31_spill] sm:$0xff] }
 0x6ba   : > { %v1806_v8 = vadd.f32 %v7793_v47, %v9005_v33 }
 0x6bc   : > { %v8061_v16 = vpop.f32.mrf.mxu3  ;;  %v2169_v57 = vmax.f32 %v1806_v8, 0.0 }
 0x6bd   : > { %5965 = vmatpush.xpose.msk.msra.mxu2 %vm2233_vm1, %v3957_v19 }
 0x6c1   : > { %5729 = vmatmul.msk.f32.gmra.mxu3 %vm2233_vm1, %v2162_v29  ;;  %5966 = vmatpush.xpose.msk.msra.mxu2 %vm2233_vm1, %v3956_v63  ;;  %v2170_v29 = vmax.f32 %v1809_v36, 0.0  ;;  %v1812_v63 = vadd.f32 %v7793_v47, %v9007_v53  ;;  %v1842_v36 = vadd.f32 %v7793_v47, %v9017_v18  ;;  %v9025_v18 = vld [vmem:[#allocation51_spill] sm:$0xff] }
 0x6c3   : > { %v2171_v34 = vmax.f32 %v1812_v63, 0.0  ;;  %v2181_v53 = vmax.f32 %v1842_v36, 0.0  ;;  %v9018_v63 = vld [vmem:[#allocation44_spill] sm:$0xff]  ;;  %v1866_v36 = vadd.f32 %v7793_v47, %v9025_v18 }
 0x6c4   : > { %v8072_v25 = vpop.f32.mrf.mxu3 }
 0x6c5   : > { %5967 = vmatpush.xpose.msk.msra.mxu2 %vm2233_vm1, %v3955_v2  ;;  %v1815_v2 = vadd.f32 %v7793_v47, %v9008_v9 }
 0x6c7   : > { %v2172_v51 = vmax.f32 %v1815_v2, 0.0 }
 0x6c9   : > { %5730 = vmatmul.msk.f32.gmra.mxu3 %vm2233_vm1, %v2163_v23  ;;  %5968 = vmatpush.xpose.msk.msra.mxu2 %vm2233_vm1, %v3954_v4  ;;  %v9009_v4 = vld [vmem:[#allocation35_spill] sm:$0xff] }
 0x6ca   : > { %v1818_v43 = vadd.f32 %v7793_v47, %v9009_v4 }
 0x6cc   : > { %v8083_v58 = vpop.f32.mrf.mxu3  ;;  %v2173_v48 = vmax.f32 %v1818_v43, 0.0 }
 0x6cd   : > { %5969 = vmatpush.xpose.msk.msra.mxu2 %vm2233_vm1, %v3953_v61  ;;  %v9010_v61 = vld [vmem:[#allocation36_spill] sm:$0xff] }
 0x6d1   : > { %5731 = vmatmul.msk.f32.gmra.mxu3 %vm2233_vm1, %v2164_v15  ;;  %5970 = vmatpush.xpose.msk.msra.mxu2 %vm2233_vm1, %v3952_v7  ;;  %v1821_v15 = vadd.f32 %v7793_v47, %v9010_v61  ;;  %v9020_v61 = vld [vmem:[#allocation46_spill] sm:$0xff] }
 0x6d3   : > { %v2174_v7 = vmax.f32 %v1821_v15, 0.0  ;;  %v1851_v15 = vadd.f32 %v7793_v47, %v9020_v61 }
 0x6d4   : > { %v8094_v21 = vpop.f32.mrf.mxu3 }
 0x6d5   : > { %5971 = vmatpush.xpose.msk.msra.mxu2 %vm2233_vm1, %v3951_v41  ;;  %v2175_v41 = vmax.f32 %v1824_v3, 0.0  ;;  %v2184_v17 = vmax.f32 %v1851_v15, 0.0  ;;  %v9021_v3 = vld [vmem:[#allocation47_spill] sm:$0xff] }
 0x6d9   : > { %5732 = vmatmul.msk.f32.gmra.mxu3 %vm2233_vm1, %v2165_v20  ;;  %5972 = vmatpush.xpose.msk.msra.mxu2 %vm2233_vm1, %v3950_v26  ;;  %v9012_v20 = vld [vmem:[#allocation38_spill] sm:$0xff] }
 0x6da   : > { %v1827_v45 = vadd.f32 %v7793_v47, %v9012_v20 }
 0x6dc   : > { %v8110_v22 = vpop.f32.mrf.mxu3  ;;  %v2176_v49 = vmax.f32 %v1827_v45, 0.0 }
 0x6dd   : > { %5973 = vmatpush.xpose.msk.msra.mxu2 %vm2233_vm1, %v3949_v52 }
 0x6e1   : > { %5733 = vmatmul.msk.f32.gmra.mxu3 %vm2233_vm1, %v2166_v6  ;;  %5974 = vmatpush.xpose.msk.msra.mxu2 %vm2233_vm1, %v3948_v31  ;;  %v2177_v6 = vmax.f32 %v1830_v54, 0.0  ;;  %v1833_v31 = vadd.f32 %v7793_v47, %v9014_v1  ;;  %v9023_v1 = vld [vmem:[#allocation49_spill] sm:$0xff] }
 0x6e3   : > { %v2178_v56 = vmax.f32 %v1833_v31, 0.0  ;;  %v1860_v31 = vadd.f32 %v7793_v47, %v9023_v1 }
 0x6e4   : > { %v8119_v30 = vpop.f32.mrf.mxu3 }
 0x6e5   : > { %5975 = vmatpush.xpose.msk.msra.mxu2 %vm2233_vm1, %v3947_v28  ;;  %v9015_v28 = vld [vmem:[#allocation41_spill] sm:$0xff] }
 0x6e9   : > { %5734 = vmatmul.msk.f32.gmra.mxu3 %vm2233_vm1, %v2167_v42  ;;  %v1836_v42 = vadd.f32 %v7793_v47, %v9015_v28  ;;  %v2187_v28 = vmax.f32 %v1860_v31, 0.0 }
 0x6eb   : > { %v2179_v27 = vmax.f32 %v1836_v42, 0.0  ;;  %v8216_v42 = vpop.f32.mrf.mxu2  ;;  %5942 = vmatmul.msk.f32.vlgmr.msrb.gmra.mxu2 %vm2233_vm1, %v7804_v39 }
 0x6ec   : > { %v8125_v46 = vpop.f32.mrf.mxu3 }
 0x6f1   : > { %5735 = vmatmul.msk.f32.gmra.mxu3 %vm2233_vm1, %v2168_v0  ;;  %v9016_v0 = vld [vmem:[#allocation42_spill] sm:$0xff] }
 0x6f2   : > { %v1839_v33 = vadd.f32 %v7793_v47, %v9016_v0 }
 0x6f4   : > { %v8130_v59 = vpop.f32.mrf.mxu3 }
 0x6f9   : > { %5736 = vmatmul.msk.f32.gmra.mxu3 %vm2233_vm1, %v2169_v57  ;;  %v2180_v57 = vmax.f32 %v1839_v33, 0.0 }
 0x6fc   : > { %v8135_v19 = vpop.f32.mrf.mxu3 }
 0x701   : > { %5737 = vmatmul.msk.f32.gmra.mxu3 %vm2233_vm1, %v2170_v29 }
 0x704   : > { %v8140_v38 = vpop.f32.mrf.mxu3 }
 0x709   : > { %5738 = vmatmul.msk.f32.gmra.mxu3 %vm2233_vm1, %v2171_v34  ;;  %v1845_v34 = vadd.f32 %v7793_v47, %v9018_v63  ;;  %v2189_v63 = vmax.f32 %v1866_v36, 0.0 }
 0x70b   : > { %v2182_v2 = vmax.f32 %v1845_v34, 0.0  ;;  %v9026_v34 = vld [vmem:[#allocation52_spill] sm:$0xff] }
 0x70c   : > { %v8145_v23 = vpop.f32.mrf.mxu3 }
 0x711   : > { %5739 = vmatmul.msk.f32.gmra.mxu3 %vm2233_vm1, %v2172_v51  ;;  %v9019_v51 = vld [vmem:[#allocation45_spill] sm:$0xff] }
 0x712   : > { %v1848_v4 = vadd.f32 %v7793_v47, %v9019_v51 }
 0x714   : > { %v8150_v55 = vpop.f32.mrf.mxu3 }
 0x719   : > { %5740 = vmatmul.msk.f32.gmra.mxu3 %vm2233_vm1, %v2173_v48  ;;  %v2183_v48 = vmax.f32 %v1848_v4, 0.0 }
 0x71c   : > { %v8155_v5 = vpop.f32.mrf.mxu3 }
 0x721   : > { %5741 = vmatmul.msk.f32.gmra.mxu3 %vm2233_vm1, %v2174_v7 }
 0x724   : > { %v8160_v35 = vpop.f32.mrf.mxu3 }
 0x729   : > { %5742 = vmatmul.msk.f32.gmra.mxu3 %vm2233_vm1, %v2175_v41  ;;  %v1854_v41 = vadd.f32 %v7793_v47, %v9021_v3 }
 0x72b   : > { %v2185_v45 = vmax.f32 %v1854_v41, 0.0 }
 0x72c   : > { %v8165_v26 = vpop.f32.mrf.mxu3 }
 0x731   : > { %5743 = vmatmul.msk.f32.gmra.mxu3 %vm2233_vm1, %v2176_v49  ;;  %v9022_v49 = vld [vmem:[#allocation48_spill] sm:$0xff] }
 0x732   : > { %v1857_v24 = vadd.f32 %v7793_v47, %v9022_v49  ;;  %v9028_v49 = vld [vmem:[#allocation54_spill] sm:$0xff] }
 0x734   : > { %v8170_v52 = vpop.f32.mrf.mxu3 }
 0x739   : > { %5744 = vmatmul.msk.f32.gmra.mxu3 %vm2233_vm1, %v2177_v6  ;;  %v2186_v6 = vmax.f32 %v1857_v24, 0.0  ;;  %v1875_v24 = vadd.f32 %v7793_v47, %v9028_v49 }
 0x73c   : > { %v8175_v14 = vpop.f32.mrf.mxu3 }
 0x741   : > { %5745 = vmatmul.msk.f32.gmra.mxu3 %vm2233_vm1, %v2178_v56 }
 0x744   : > { %v8180_v37 = vpop.f32.mrf.mxu3 }
 0x749   : > { %5746 = vmatmul.msk.f32.gmra.mxu3 %vm2233_vm1, %v2179_v27  ;;  %v9024_v27 = vld [vmem:[#allocation50_spill] sm:$0xff] }
 0x74a   : > { %v1863_v0 = vadd.f32 %v7793_v47, %v9024_v27 }
 0x74c   : > { %v8185_v8 = vpop.f32.mrf.mxu3 }
 0x751   : > { %5747 = vmatmul.msk.f32.gmra.mxu3 %vm2233_vm1, %v2180_v57  ;;  %v2188_v57 = vmax.f32 %v1863_v0, 0.0 }
 0x754   : > { %v8190_v29 = vpop.f32.mrf.mxu3 }
 0x759   : > { %5748 = vmatmul.msk.f32.gmra.mxu3 %vm2233_vm1, %v2181_v53 }
 0x75c   : > { %v8195_v9 = vpop.f32.mrf.mxu3 }
 0x761   : > { %5749 = vmatmul.msk.f32.gmra.mxu3 %vm2233_vm1, %v2182_v2  ;;  %v1869_v2 = vadd.f32 %v7793_v47, %v9026_v34 }
 0x763   : > { %v2190_v4 = vmax.f32 %v1869_v2, 0.0 }
 0x764   : > { %v8200_v43 = vpop.f32.mrf.mxu3 }
 0x769   : > { %5750 = vmatmul.msk.f32.gmra.mxu3 %vm2233_vm1, %v2183_v48  ;;  %v9027_v48 = vld [vmem:[#allocation53_spill] sm:$0xff] }
 0x76a   : > { %v1872_v61 = vadd.f32 %v7793_v47, %v9027_v48 }
 0x76c   : > { %v8205_v7 = vpop.f32.mrf.mxu3 }
 0x771   : > { %5751 = vmatmul.msk.f32.gmra.mxu3 %vm2233_vm1, %v2184_v17  ;;  %v2191_v17 = vmax.f32 %v1872_v61, 0.0 }
 0x774   : > { %v3622_v20 = vpop.f32.mrf.mxu3 }
 0x775   : > { %v3623_v48 = vadd.f32 %v8100_v60, %v3622_v20  ;;  %v3617_v20 = vadd.f32 %v8100_v60, %v8200_v43  ;;  %v3611_v43 = vadd.f32 %v8100_v60, %v8190_v29  ;;  %v3605_v29 = vadd.f32 %v8100_v60, %v8180_v37 }
 0x776   : > { %v3599_v37 = vadd.f32 %v8100_v60, %v8170_v52 }
 0x779   : > { %5752 = vmatmul.msk.f32.gmra.mxu3 %vm2233_vm1, %v2185_v45 }
 0x77c   : > { %v3625_v54 = vpop.f32.mrf.mxu3 }
 0x77d   : > { %v3626_v2 = vadd.f32 %v8100_v60, %v3625_v54  ;;  %v3988_v54 = vmax.f32 %v3623_v48, 0.0 }
 0x77f   : > { %v3989_v61 = vmax.f32 %v3626_v2, 0.0 }
 0x781   : > { %5753 = vmatmul.msk.f32.gmra.mxu3 %vm2233_vm1, %v2186_v6 }
 0x784   : > { %v3628_v56 = vpop.f32.mrf.mxu3 }
 0x785   : > { %v3629_v36 = vadd.f32 %v8100_v60, %v3628_v56 }
 0x789   : > { %5754 = vmatmul.msk.f32.gmra.mxu3 %vm2233_vm1, %v2187_v28  ;;  %v2192_v28 = vmax.f32 %v1875_v24, 0.0 }
 0x78c   : > { %v3631_v33 = vpop.f32.mrf.mxu3 }
 0x78d   : > { %v3632_v27 = vadd.f32 %v8100_v60, %v3631_v33  ;;  %v9031_v33 = vld [vmem:[#allocation56_spill] sm:$0xff] }
 0x791   : > { %5755 = vmatmul.msk.f32.gmra.mxu3 %vm2233_vm1, %v2188_v57  ;;  %v9030_v57 = vld [vmem:[#allocation55_spill] sm:$0xff] }
 0x792   : > { %v1878_v18 = vadd.f32 %v7793_v47, %v9030_v57 }
 0x794   : > { %v3634_v53 = vpop.f32.mrf.mxu3  ;;  %v2193_v34 = vmax.f32 %v1878_v18, 0.0  ;;  %v3984_v18 = vmax.f32 %v3611_v43, 0.0 }
 0x795   : > { %v3635_v6 = vadd.f32 %v8100_v60, %v3634_v53 }
 0x797   : > { %v3992_v0 = vmax.f32 %v3635_v6, 0.0  ;;  %v3986_v6 = vmax.f32 %v3617_v20, 0.0 }
 0x799   : > { %5756 = vmatmul.msk.f32.gmra.mxu3 %vm2233_vm1, %v2189_v63  ;;  %v3991_v63 = vmax.f32 %v3632_v27, 0.0 }
 0x79c   : > { %v3637_v51 = vpop.f32.mrf.mxu3 }
 0x79d   : > { %v3638_v41 = vadd.f32 %v8100_v60, %v3637_v51  ;;  %v3990_v51 = vmax.f32 %v3629_v36, 0.0  ;;  %v9034_v36 = vld [vmem:[#allocation59_spill] sm:$0xff] }
 0x79f   : > { %v3993_v1 = vmax.f32 %v3638_v41, 0.0 }
 0x7a1   : > { %5757 = vmatmul.msk.f32.gmra.mxu3 %vm2233_vm1, %v2190_v4  ;;  %v1881_v4 = vadd.f32 %v7793_v47, %v9031_v33  ;;  %v3982_v33 = vmax.f32 %v3605_v29, 0.0 }
 0x7a4   : > { %v3640_v15 = vpop.f32.mrf.mxu3 }
 0x7a5   : > { %v3641_v3 = vadd.f32 %v8100_v60, %v3640_v15  ;;  %v2194_v15 = vmax.f32 %v1881_v4, 0.0  ;;  %v9035_v4 = vld [vmem:[#allocation60_spill] sm:$0xff] }
 0x7a6   : > { %v1893_v48 = vadd.f32 %v7793_v47, %v9035_v4 }
 0x7a7   : > { %v3994_v45 = vmax.f32 %v3641_v3, 0.0  ;;  %v9032_v3 = vld [vmem:[#allocation57_spill] sm:$0xff] }
 0x7a8   : > { %v1884_v41 = vadd.f32 %v7793_v47, %v9032_v3  ;;  %v9036_v3 = vld [vmem:[#allocation61_spill] sm:$0xff] }
 0x7a9   : > { %5758 = vmatmul.msk.f32.gmra.mxu3 %vm2233_vm1, %v2191_v17  ;;  %5994 = vmatpush.xpose.msk.msrb.mxu2 %vm2233_vm1, %v3994_v45  ;;  %v3620_v17 = vadd.f32 %v8100_v60, %v8205_v7  ;;  %v3614_v7 = vadd.f32 %v8100_v60, %v8195_v9  ;;  %v3608_v9 = vadd.f32 %v8100_v60, %v8185_v8 }
 0x7aa   : > { %v2195_v24 = vmax.f32 %v1884_v41, 0.0  ;;  %v3602_v8 = vadd.f32 %v8100_v60, %v8175_v14  ;;  %v3596_v14 = vadd.f32 %v8100_v60, %v8165_v26  ;;  %v1896_v41 = vadd.f32 %v7793_v47, %v9036_v3  ;;  %v1910_v26 = vpop.f32.mrf.mxu2  ;;  %5976 = vmatmul.msk.f32.vlgmr.msra.gmra.mxu2 %vm2233_vm1, %v7804_v39 }
 0x7ab   : > { %v3987_v45 = vmax.f32 %v3620_v17, 0.0  ;;  %v3985_v27 = vmax.f32 %v3614_v7, 0.0  ;;  %v2198_v17 = vmax.f32 %v1893_v48, 0.0 }
 0x7ac   : > { %v8239_v31 = vpop.f32.mrf.mxu3  ;;  %v3979_v20 = vmax.f32 %v3596_v14, 0.0  ;;  %v2199_v52 = vmax.f32 %v1896_v41, 0.0 }
 0x7ad   : > { %9029 = vst [vmem:[#allocation5_spill] sm:$0xff] %v8239_v31  ;;  %5995 = vmatpush.xpose.msk.msrb.mxu2 %vm2233_vm1, %v3993_v1  ;;  %v9033_v1 = vld [vmem:[#allocation58_spill] sm:$0xff] }
 0x7ae   : > { %v9040_v31 = vld [vmem:[#allocation74_spill] sm:$0xff] }
 0x7b1   : > { %5759 = vmatmul.msk.f32.gmra.mxu3 %vm2233_vm1, %v2192_v28  ;;  %5996 = vmatpush.xpose.msk.msrb.mxu2 %vm2233_vm1, %v3992_v0  ;;  %v1887_v28 = vadd.f32 %v7793_v47, %v9033_v1  ;;  %v1902_v1 = vadd.f32 %v7793_v47, %v7799_v12  ;;  %v8335_v12 = vld [vmem:[%s8887_s1 + $0x50] ss:$0 sm:$0xff] }
 0x7b3   : > { %v2196_v57 = vmax.f32 %v1887_v28, 0.0  ;;  %v1913_v28 = vpop.f32.mrf.mxu2 }
 0x7b4   : > { %v8248_v53 = vpop.f32.mrf.mxu3 }
 0x7b5   : > { %5997 = vmatpush.xpose.msk.msrb.mxu2 %vm2233_vm1, %v3991_v63  ;;  %v1890_v63 = vadd.f32 %v7793_v47, %v9034_v36 }
 0x7b9   : > { %5760 = vmatmul.msk.f32.gmra.mxu3 %vm2233_vm1, %v2193_v34  ;;  %5998 = vmatpush.xpose.msk.msrb.mxu2 %vm2233_vm1, %v3990_v51  ;;  %v3983_v34 = vmax.f32 %v3608_v9, 0.0  ;;  %v2197_v51 = vmax.f32 %v1890_v63, 0.0 }
 0x7bc   : > { %v8257_v56 = vpop.f32.mrf.mxu3 }
 0x7bd   : > { %5999 = vmatpush.xpose.msk.msrb.mxu2 %vm2233_vm1, %v3989_v61  ;;  %v3981_v61 = vmax.f32 %v3602_v8, 0.0  ;;  %v1914_v8 = vadd.f32 %v8335_v12, %v1913_v28 }
 0x7bf   : > { %v2205_v4 = vmax.f32 %v1914_v8, 0.0 }
 0x7c1   : > { %5761 = vmatmul.msk.f32.gmra.mxu3 %vm2233_vm1, %v2194_v15  ;;  %6000 = vmatpush.xpose.msk.msrb.mxu2 %vm2233_vm1, %v3988_v54  ;;  %v3980_v54 = vmax.f32 %v3599_v37, 0.0 }
 0x7c4   : > { %v8268_v49 = vpop.f32.mrf.mxu3 }
 0x7c5   : > { %6001 = vmatpush.xpose.msk.msrb.mxu2 %vm2233_vm1, %v3987_v45 }
 0x7c9   : > { %5762 = vmatmul.msk.f32.gmra.mxu3 %vm2233_vm1, %v2195_v24  ;;  %6002 = vmatpush.xpose.msk.msrb.mxu2 %vm2233_vm1, %v3986_v6  ;;  %v1899_v24 = vadd.f32 %v7793_v47, %v7586_v62  ;;  %v2201_v62 = vmax.f32 %v1902_v1, 0.0 }
 0x7cb   : > { %v2200_v6 = vmax.f32 %v1899_v24, 0.0 }
 0x7cc   : > { %v8279_v0 = vpop.f32.mrf.mxu3 }
 0x7cd   : > { %6003 = vmatpush.xpose.msk.msrb.mxu2 %vm2233_vm1, %v3985_v27  ;;  %v1905_v27 = vadd.f32 %v7793_v47, %v8020_v13  ;;  %v1911_v13 = vadd.f32 %v8335_v12, %v1910_v26 }
 0x7d1   : > { %5763 = vmatmul.msk.f32.gmra.mxu3 %vm2233_vm1, %v2196_v57  ;;  %6004 = vmatpush.xpose.msk.msrb.mxu2 %vm2233_vm1, %v3984_v18  ;;  %v1916_v57 = vpop.f32.mrf.mxu2  ;;  %v2202_v18 = vmax.f32 %v1905_v27, 0.0 }
 0x7d2   : > { %v1917_v48 = vadd.f32 %v8335_v12, %v1916_v57 }
 0x7d4   : > { %v8290_v2 = vpop.f32.mrf.mxu3 }
 0x7d5   : > { %6005 = vmatpush.xpose.msk.msrb.mxu2 %vm2233_vm1, %v3983_v34 }
 0x7d9   : > { %5764 = vmatmul.msk.f32.gmra.mxu3 %vm2233_vm1, %v2197_v51  ;;  %6006 = vmatpush.xpose.msk.msrb.mxu2 %vm2233_vm1, %v3982_v33  ;;  %v1919_v36 = vpop.f32.mrf.mxu2  ;;  %v2204_v51 = vmax.f32 %v1911_v13, 0.0 }
 0x7da   : > { %v1920_v14 = vadd.f32 %v8335_v12, %v1919_v36 }
 0x7dc   : > { %v8301_v15 = vpop.f32.mrf.mxu3  ;;  %v2207_v3 = vmax.f32 %v1920_v14, 0.0 }
 0x7dd   : > { %6007 = vmatpush.xpose.msk.msrb.mxu2 %vm2233_vm1, %v3981_v61  ;;  %v2206_v61 = vmax.f32 %v1917_v48, 0.0 }
 0x7e1   : > { %5765 = vmatmul.msk.f32.gmra.mxu3 %vm2233_vm1, %v2198_v17  ;;  %6008 = vmatpush.xpose.msk.msrb.mxu2 %vm2233_vm1, %v3980_v54  ;;  %v1922_v29 = vpop.f32.mrf.mxu2 }
 0x7e4   : > { %v8310_v45 = vpop.f32.mrf.mxu3 }
 0x7e5   : > { %6009 = vmatpush.xpose.msk.msrb.mxu2 %vm2233_vm1, %v3979_v20  ;;  %v1923_v20 = vadd.f32 %v8335_v12, %v1922_v29 }
 0x7e7   : > { %v2208_v24 = vmax.f32 %v1923_v20, 0.0 }
 0x7e8   : > { %6010 = vmatmul.msk.f32.vlgmr.msrb.gmra.mxu2 %vm2233_vm1, %v7804_v39  ;;  %v1908_v39 = vadd.f32 %v8335_v12, %v8216_v42 }
 0x7e9   : > { %5766 = vmatmul.msk.f32.gmra.mxu3 %vm2233_vm1, %v2199_v52  ;;  %v1925_v42 = vpop.f32.mrf.mxu2 }
 0x7ea   : > { %v2203_v47 = vmax.f32 %v1908_v39, 0.0  ;;  %v1926_v26 = vadd.f32 %v8335_v12, %v1925_v42 }
 0x7ec   : > { %v8318_v7 = vpop.f32.mrf.mxu3  ;;  %v2209_v28 = vmax.f32 %v1926_v26, 0.0 }
 0x7f1   : > { %5767 = vmatmul.msk.f32.gmra.mxu3 %vm2233_vm1, %v2200_v6  ;;  %v1928_v17 = vpop.f32.mrf.mxu2 }
 0x7f4   : > { %v8325_v43 = vpop.f32.mrf.mxu3 }
 0x7f9   : > { %5768 = vmatmul.msk.f32.gmra.mxu3 %vm2233_vm1, %v2201_v62  ;;  %v1931_v41 = vpop.f32.mrf.mxu2  ;;  %v1929_v62 = vadd.f32 %v8335_v12, %v1928_v17 }
 0x7fa   : > { %v1932_v39 = vadd.f32 %v8335_v12, %v1931_v41 }
 0x7fc   : > { %v8330_v9 = vpop.f32.mrf.mxu3 }
 0x801   : > { %5769 = vmatmul.msk.f32.gmra.mxu3 %vm2233_vm1, %v2202_v18  ;;  %v1934_v6 = vpop.f32.mrf.mxu2  ;;  %v2210_v18 = vmax.f32 %v1929_v62, 0.0 }
 0x802   : > { %v1935_v29 = vadd.f32 %v8335_v12, %v1934_v6 }
 0x804   : > { %v8340_v63 = vpop.f32.mrf.mxu3  ;;  %v2212_v8 = vmax.f32 %v1935_v29, 0.0 }
 0x809   : > { %5770 = vmatmul.msk.f32.gmra.mxu3 %vm2233_vm1, %v2203_v47  ;;  %v1937_v57 = vpop.f32.mrf.mxu2  ;;  %v2211_v47 = vmax.f32 %v1932_v39, 0.0 }
 0x80c   : > { %v8344_v34 = vpop.f32.mrf.mxu3 }
 0x811   : > { %5771 = vmatmul.msk.f32.gmra.mxu3 %vm2233_vm1, %v2204_v51  ;;  %v1940_v13 = vpop.f32.mrf.mxu2 }
 0x812   : > { %v1941_v17 = vadd.f32 %v8335_v12, %v1940_v13 }
 0x814   : > { %v8348_v33 = vpop.f32.mrf.mxu3  ;;  %v2214_v41 = vmax.f32 %v1941_v17, 0.0 }
 0x819   : > { %5772 = vmatmul.msk.f32.gmra.mxu3 %vm2233_vm1, %v2205_v4  ;;  %v1943_v42 = vpop.f32.mrf.mxu2  ;;  %v1938_v4 = vadd.f32 %v8335_v12, %v1937_v57 }
 0x81a   : > { %v1944_v20 = vadd.f32 %v8335_v12, %v1943_v42 }
 0x81c   : > { %v8352_v37 = vpop.f32.mrf.mxu3  ;;  %v2215_v6 = vmax.f32 %v1944_v20, 0.0 }
 0x821   : > { %5773 = vmatmul.msk.f32.gmra.mxu3 %vm2233_vm1, %v2206_v61  ;;  %v2213_v61 = vmax.f32 %v1938_v4, 0.0  ;;  %v1946_v14 = vpop.f32.mrf.mxu2 }
 0x824   : > { %v8356_v54 = vpop.f32.mrf.mxu3 }
 0x829   : > { %5774 = vmatmul.msk.f32.gmra.mxu3 %vm2233_vm1, %v2207_v3  ;;  %v1949_v26 = vpop.f32.mrf.mxu2 }
 0x82a   : > { %v1950_v39 = vadd.f32 %v8335_v12, %v1949_v26 }
 0x82c   : > { %v8360_v52 = vpop.f32.mrf.mxu3  ;;  %v2217_v13 = vmax.f32 %v1950_v39, 0.0 }
 0x831   : > { %5775 = vmatmul.msk.f32.gmra.mxu3 %vm2233_vm1, %v2208_v24 }
 0x834   : > { %v8364_v1 = vpop.f32.mrf.mxu3 }
 0x839   : > { %5776 = vmatmul.msk.f32.gmra.mxu3 %vm2233_vm1, %v2209_v28  ;;  %v1947_v28 = vadd.f32 %v8335_v12, %v1946_v14 }
 0x83b   : > { %v2216_v57 = vmax.f32 %v1947_v28, 0.0 }
 0x83c   : > { %v8368_v27 = vpop.f32.mrf.mxu3 }
 0x841   : > { %5777 = vmatmul.msk.f32.gmra.mxu3 %vm2233_vm1, %v2210_v18  ;;  %v1952_v18 = vpop.f32.mrf.mxu2 }
 0x844   : > { %v8372_v36 = vpop.f32.mrf.mxu3 }
 0x849   : > { %5778 = vmatmul.msk.f32.gmra.mxu3 %vm2233_vm1, %v2211_v47  ;;  %v1955_v29 = vpop.f32.mrf.mxu2 }
 0x84c   : > { %v8376_v51 = vpop.f32.mrf.mxu3 }
 0x851   : > { %5779 = vmatmul.msk.f32.gmra.mxu3 %vm2233_vm1, %v2212_v8  ;;  %v1953_v8 = vadd.f32 %v8335_v12, %v1952_v18  ;;  %v1958_v17 = vpop.f32.mrf.mxu2 }
 0x852   : > { %v1959_v20 = vadd.f32 %v8335_v12, %v1958_v17 }
 0x853   : > { %v2218_v4 = vmax.f32 %v1953_v8, 0.0  ;;  %v6201_v8 = vmov 0  }
 0x854   : > { %v8380_v48 = vpop.f32.mrf.mxu3  ;;  %v2220_v28 = vmax.f32 %v1959_v20, 0.0  ;;  %6124 = vset.pattern.permute.xlu0 %v6201_v8  ;;  %v9038_v8 = vld [vmem:[#allocation76_spill] sm:$0xff] }
 0x859   : > { %5780 = vmatmul.msk.f32.gmra.mxu3 %vm2233_vm1, %v2213_v61  ;;  %v1956_v61 = vadd.f32 %v8335_v12, %v1955_v29 }
 0x85c   : > { %v8384_v3 = vpop.f32.mrf.mxu3 }
 0x861   : > { %5781 = vmatmul.msk.f32.gmra.mxu3 %vm2233_vm1, %v2214_v41  ;;  %v2219_v41 = vmax.f32 %v1956_v61, 0.0 }
 0x864   : > { %v8388_v24 = vpop.f32.mrf.mxu3 }
 0x869   : > { %5782 = vmatmul.msk.f32.gmra.mxu3 %vm2233_vm1, %v2215_v6  ;;  %v1961_v6 = vpop.f32.mrf.mxu2 }
 0x86c   : > { %v8392_v62 = vpop.f32.mrf.mxu3 }
 0x871   : > { %5783 = vmatmul.msk.f32.gmra.mxu3 %vm2233_vm1, %v2216_v57  ;;  %v1962_v57 = vadd.f32 %v8335_v12, %v1961_v6 }
 0x873   : > { %v2221_v39 = vmax.f32 %v1962_v57, 0.0 }
 0x874   : > { %v8396_v47 = vpop.f32.mrf.mxu3 }
 0x879   : > { %5784 = vmatmul.msk.f32.gmra.mxu3 %vm2233_vm1, %v2217_v13  ;;  %v1964_v13 = vpop.f32.mrf.mxu2 }
 0x87a   : > { %v1965_v29 = vadd.f32 %v8335_v12, %v1964_v13  ;;  %v3302_v12 = vadd.f32 %v8100_v60, %v9038_v8 }
 0x87c   : > { %v3721_v42 = vpop.f32.mrf.mxu3  ;;  %v2222_v17 = vmax.f32 %v1965_v29, 0.0 }
 0x881   : > { %5785 = vmatmul.msk.f32.gmra.mxu3 %vm2233_vm1, %v2218_v4  ;;  %v4044_v4 = vld [vmem:[%s8887_s1 + $0xe8] sm:$0x1] }
 0x882   : > { %4047 = vperm.xlu0 %6124, %v4044_v4   ;;  %v8421_v4 = vld [vmem:[%s8887_s1 + $0xa0] sm:$0x1] }
 0x884   : > { %v3724_v14 = vpop.f32.mrf.mxu3 }
 0x889   : > { %5786 = vmatmul.msk.f32.gmra.mxu3 %vm2233_vm1, %v2219_v41  ;;  %v9037_v41 = vld [vmem:[#allocation77_spill] sm:$0xff] }
 0x88a   : > { %v3305_v20 = vadd.f32 %v8100_v60, %v9037_v41 }
 0x88c   : > { %v3727_v26 = vpop.f32.mrf.mxu3  ;;  %v3882_v13 = vmax.f32 %v3305_v20, 0.0  ;;  %v8432_v20 = vpop.f32.mrf.mxu1 }
 0x891   : > { %5787 = vmatmul.msk.f32.gmra.mxu3 %vm2233_vm1, %v2220_v28 }
 0x894   : > { %v3730_v18 = vpop.f32.mrf.mxu3 }
 0x895   : > { %v3731_v29 = vadd.f32 %v8100_v60, %v3730_v18  ;;  %v3725_v18 = vadd.f32 %v8100_v60, %v3724_v14  ;;  %v3719_v14 = vadd.f32 %v8100_v60, %v8396_v47 }
 0x897   : > { %v4024_v8 = vmax.f32 %v3731_v29, 0.0  ;;  %v9042_v29 = vld [vmem:[#allocation72_spill] sm:$0xff] }
 0x899   : > { %5788 = vmatmul.msk.f32.gmra.mxu3 %vm2233_vm1, %v2221_v39 }
 0x89c   : > { %v3733_v61 = vpop.f32.mrf.mxu3 }
 0x89d   : > { %v3734_v57 = vadd.f32 %v8100_v60, %v3733_v61 }
 0x89f   : > { %v4025_v61 = vmax.f32 %v3734_v57, 0.0 }
 0x8a1   : > { %5789 = vmatmul.msk.f32.gmra.mxu3 %vm2233_vm1, %v2222_v17  ;;  %v9039_v17 = vld [vmem:[#allocation75_spill] sm:$0xff] }
 0x8a2   : > { %v3299_v41 = vadd.f32 %v8100_v60, %v9039_v17 }
 0x8a4   : > { %v3736_v6 = vpop.f32.mrf.mxu3 }
 0x8a5   : > { %v3737_v28 = vadd.f32 %v8100_v60, %v3736_v6  ;;  %v3881_v6 = vmax.f32 %v3302_v12, 0.0  ;;  %v9041_v12 = vld [vmem:[#allocation73_spill] sm:$0xff] }
 0x8a7   : > { %v4026_v39 = vmax.f32 %v3737_v28, 0.0  ;;  %v3728_v28 = vadd.f32 %v8100_v60, %v3727_v26  ;;  %v4022_v26 = vmax.f32 %v3725_v18, 0.0  ;;  %v4020_v18 = vmax.f32 %v3719_v14, 0.0 }
 0x8a9   : > { %5823 = vmatmul.msk.f32.vlgmr.msrb.gmra.mxu3 %vm2233_vm1, %v8421_v4  ;;  %6028 = vmatpush.xpose.msk.msra.mxu2 %vm2233_vm1, %v4026_v39  ;;  %v3296_v39 = vadd.f32 %v8100_v60, %v9040_v31  ;;  %v4023_v57 = vmax.f32 %v3728_v28, 0.0  ;;  %v3722_v31 = vadd.f32 %v8100_v60, %v3721_v42  ;;  %v3716_v42 = vadd.f32 %v8100_v60, %v8392_v62 }
 0x8aa   : > { %5875 = vmatpush.xpose.msk.msrb.mxu3 %vm2233_vm1, %v3882_v13  ;;  %v3880_v13 = vmax.f32 %v3299_v41, 0.0  ;;  %v3290_v41 = vadd.f32 %v8100_v60, %v9042_v29  ;;  %v9045_v29 = vld [vmem:[#allocation69_spill] sm:$0xff]  ;;  %v3710_v62 = vadd.f32 %v8100_v60, %v8384_v3  ;;  %v3704_v3 = vadd.f32 %v8100_v60, %v8376_v51 }
 0x8ab   : > { %v3879_v17 = vmax.f32 %v3296_v39, 0.0  ;;  %v4021_v28 = vmax.f32 %v3722_v31, 0.0  ;;  %v9043_v39 = vld [vmem:[#allocation71_spill] sm:$0xff]  ;;  %v3713_v31 = vadd.f32 %v8100_v60, %v8388_v24  ;;  %v3707_v24 = vadd.f32 %v8100_v60, %v8380_v48 }
 0x8ac   : > { %v3701_v48 = vadd.f32 %v8100_v60, %v8372_v36  ;;  %v3695_v36 = vadd.f32 %v8100_v60, %v8364_v1  ;;  %v3401_v1 = vadd.f32 %v8100_v60, %v7743_v44  ;;  %v9054_v44 = vld [vmem:[#allocation91_spill] sm:$0xff] }
 0x8ad   : > { %6029 = vmatpush.xpose.msk.msra.mxu2 %vm2233_vm1, %v4025_v61  ;;  %v3293_v61 = vadd.f32 %v8100_v60, %v9041_v12  ;;  %v9044_v12 = vld [vmem:[#allocation70_spill] sm:$0xff]  ;;  %v4018_v14 = vmax.f32 %v3713_v31, 0.0 }
 0x8ae   : > { %5876 = vmatpush.xpose.msk.msrb.mxu3 %vm2233_vm1, %v3881_v6  ;;  %v9048_v31 = vld [vmem:[#allocation66_spill] sm:$0xff] }
 0x8af   : > { %v3878_v6 = vmax.f32 %v3293_v61, 0.0  ;;  %v3284_v61 = vadd.f32 %v8100_v60, %v9044_v12 }
 0x8b1   : > { %5857 = vmatmul.msk.f32.vlgmr.msra.gmra.mxu3 %vm2233_vm1, %v8421_v4  ;;  %6030 = vmatpush.xpose.msk.msra.mxu2 %vm2233_vm1, %v4024_v8  ;;  %v8449_v8 = vpop.f32.mrf.mxu1 }
 0x8b2   : > { %5877 = vmatpush.xpose.msk.msrb.mxu3 %vm2233_vm1, %v3880_v13  ;;  %v3287_v13 = vadd.f32 %v8100_v60, %v9043_v39 }
 0x8b5   : > { %6031 = vmatpush.xpose.msk.msra.mxu2 %vm2233_vm1, %v4023_v57  ;;  %v3877_v57 = vmax.f32 %v3290_v41, 0.0  ;;  %v3281_v41 = vadd.f32 %v8100_v60, %v9045_v29 }
 0x8b6   : > { %5878 = vmatpush.xpose.msk.msrb.mxu3 %vm2233_vm1, %v3879_v17  ;;  %v3876_v17 = vmax.f32 %v3287_v13, 0.0 }
 0x8b7   : > { %v3874_v13 = vmax.f32 %v3281_v41, 0.0  ;;  %v4015_v41 = vmax.f32 %v3704_v3, 0.0 }
 0x8b9   : > { %6032 = vmatpush.xpose.msk.msra.mxu2 %vm2233_vm1, %v4022_v26  ;;  %v8465_v47 = vpop.f32.mrf.mxu1  ;;  %v4019_v26 = vmax.f32 %v3716_v42, 0.0  ;;  %v9047_v42 = vld [vmem:[#allocation67_spill] sm:$0xff] }
 0x8ba   : > { %5879 = vmatpush.xpose.msk.msrb.mxu3 %vm2233_vm1, %v3878_v6  ;;  %v3875_v6 = vmax.f32 %v3284_v61, 0.0 }
 0x8bd   : > { %6033 = vmatpush.xpose.msk.msra.mxu2 %vm2233_vm1, %v4021_v28  ;;  %v9046_v28 = vld [vmem:[#allocation68_spill] sm:$0xff] }
 0x8be   : > { %5880 = vmatpush.xpose.msk.msrb.mxu3 %vm2233_vm1, %v3877_v57  ;;  %v3278_v39 = vadd.f32 %v8100_v60, %v9046_v28  ;;  %v4017_v57 = vmax.f32 %v3710_v62, 0.0  ;;  %v3698_v28 = vadd.f32 %v8100_v60, %v8368_v27  ;;  %v3692_v27 = vadd.f32 %v8100_v60, %v8360_v52 }
 0x8bf   : > { %v3914_v52 = vmax.f32 %v3401_v1, 0.0  ;;  %v9058_v1 = vld [vmem:[#allocation87_spill] sm:$0xff] }
 0x8c0   : > { %v3873_v12 = vmax.f32 %v3278_v39, 0.0  ;;  %v4014_v39 = vmax.f32 %v3701_v48, 0.0 }
 0x8c1   : > { %6034 = vmatpush.xpose.msk.msra.mxu2 %vm2233_vm1, %v4020_v18  ;;  %v3275_v18 = vadd.f32 %v8100_v60, %v9047_v42  ;;  %v8483_v61 = vpop.f32.mrf.mxu1  ;;  %v4013_v42 = vmax.f32 %v3698_v28, 0.0  ;;  %v3395_v28 = vadd.f32 %v8100_v60, %v9054_v44 }
 0x8c2   : > { %5881 = vmatpush.xpose.msk.msrb.mxu3 %vm2233_vm1, %v3876_v17  ;;  %v4016_v17 = vmax.f32 %v3707_v24, 0.0 }
 0x8c3   : > { %v3872_v29 = vmax.f32 %v3275_v18, 0.0  ;;  %v9051_v18 = vld [vmem:[#allocation63_spill] sm:$0xff] }
 0x8c5   : > { %6035 = vmatpush.xpose.msk.msra.mxu2 %vm2233_vm1, %v4019_v26  ;;  %v3272_v26 = vadd.f32 %v8100_v60, %v9048_v31  ;;  %v9052_v31 = vld [vmem:[#allocation62_spill] sm:$0xff] }
 0x8c6   : > { %5882 = vmatpush.xpose.msk.msrb.mxu3 %vm2233_vm1, %v3875_v6  ;;  %v9049_v6 = vld [vmem:[#allocation65_spill] sm:$0xff] }
 0x8c7   : > { %v3269_v62 = vadd.f32 %v8100_v60, %v9049_v6 }
 0x8c9   : > { %6036 = vmatpush.xpose.msk.msra.mxu2 %vm2233_vm1, %v4018_v14  ;;  %v3871_v14 = vmax.f32 %v3272_v26, 0.0  ;;  %v8499_v51 = vpop.f32.mrf.mxu1  ;;  %v3260_v26 = vadd.f32 %v8100_v60, %v9052_v31 }
 0x8ca   : > { %5883 = vmatpush.xpose.msk.msrb.mxu3 %vm2233_vm1, %v3874_v13  ;;  %v9050_v13 = vld [vmem:[#allocation64_spill] sm:$0xff] }
 0x8cb   : > { %v3266_v24 = vadd.f32 %v8100_v60, %v9050_v13  ;;  %v3867_v6 = vmax.f32 %v3260_v26, 0.0 }
 0x8cd   : > { %6037 = vmatpush.xpose.msk.msra.mxu2 %vm2233_vm1, %v4017_v57  ;;  %v3870_v57 = vmax.f32 %v3269_v62, 0.0  ;;  %v3869_v3 = vmax.f32 %v3266_v24, 0.0  ;;  %v9053_v62 = vld [vmem:[#allocation92_spill] sm:$0xff]  ;;  %v9055_v24 = vld [vmem:[#allocation90_spill] sm:$0xff] }
 0x8ce   : > { %5884 = vmatpush.xpose.msk.msrb.mxu3 %vm2233_vm1, %v3873_v12  ;;  %v3263_v12 = vadd.f32 %v8100_v60, %v9051_v18  ;;  %v9056_v18 = vld [vmem:[#allocation89_spill] sm:$0xff] }
 0x8d1   : > { %6038 = vmatpush.xpose.msk.msra.mxu2 %vm2233_vm1, %v4016_v17  ;;  %v4012_v17 = vmax.f32 %v3695_v36, 0.0  ;;  %v8519_v48 = vpop.f32.mrf.mxu1  ;;  %v3912_v36 = vmax.f32 %v3395_v28, 0.0  ;;  %v9060_v28 = vld [vmem:[#allocation85_spill] sm:$0xff] }
 0x8d2   : > { %5885 = vmatpush.xpose.msk.msrb.mxu3 %vm2233_vm1, %v3872_v29  ;;  %v3868_v29 = vmax.f32 %v3263_v12, 0.0  ;;  %v3389_v12 = vadd.f32 %v8100_v60, %v9056_v18 }
 0x8d4   : > { %v3910_v31 = vmax.f32 %v3389_v12, 0.0 }
 0x8d5   : > { %6039 = vmatpush.xpose.msk.msra.mxu2 %vm2233_vm1, %v4015_v41  ;;  %v4011_v41 = vmax.f32 %v3692_v27, 0.0  ;;  %v9057_v27 = vld [vmem:[#allocation88_spill] sm:$0xff] }
 0x8d6   : > { %5886 = vmatpush.xpose.msk.msrb.mxu3 %vm2233_vm1, %v3871_v14  ;;  %v3398_v14 = vadd.f32 %v8100_v60, %v9053_v62  ;;  %v9059_v62 = vld [vmem:[#allocation86_spill] sm:$0xff] }
 0x8d9   : > { %6040 = vmatpush.xpose.msk.msra.mxu2 %vm2233_vm1, %v4014_v39  ;;  %v3913_v39 = vmax.f32 %v3398_v14, 0.0  ;;  %v8534_v13 = vpop.f32.mrf.mxu1  ;;  %v3380_v14 = vadd.f32 %v8100_v60, %v9059_v62 }
 0x8da   : > { %5887 = vmatpush.xpose.msk.msrb.mxu3 %vm2233_vm1, %v3870_v57  ;;  %v3392_v57 = vadd.f32 %v8100_v60, %v9055_v24 }
 0x8db   : > { %v3907_v24 = vmax.f32 %v3380_v14, 0.0  ;;  %v9064_v14 = vld [vmem:[#allocation81_spill] sm:$0xff] }
 0x8dd   : > { %6041 = vmatpush.xpose.msk.msra.mxu2 %vm2233_vm1, %v4013_v42  ;;  %v8539_v42 = vpop.f32.mrf.mxu3 }
 0x8de   : > { %5888 = vmatpush.xpose.msk.msrb.mxu3 %vm2233_vm1, %v3869_v3  ;;  %v3911_v3 = vmax.f32 %v3392_v57, 0.0 }
 0x8e1   : > { %6042 = vmatpush.xpose.msk.msra.mxu2 %vm2233_vm1, %v4012_v17  ;;  %v3386_v17 = vadd.f32 %v8100_v60, %v9057_v27  ;;  %v8547_v26 = vpop.f32.mrf.mxu1 }
 0x8e2   : > { %5889 = vmatpush.xpose.msk.msrb.mxu3 %vm2233_vm1, %v3868_v29 }
 0x8e5   : > { %6043 = vmatpush.xpose.msk.msra.mxu2 %vm2233_vm1, %v4011_v41  ;;  %v8549_v29 = vpop.f32.mrf.mxu3  ;;  %v3383_v41 = vadd.f32 %v8100_v60, %v9058_v1 }
 0x8e6   : > { %5890 = vmatpush.xpose.msk.msrb.mxu3 %vm2233_vm1, %v3867_v6  ;;  %v3909_v6 = vmax.f32 %v3386_v17, 0.0 }
 0x8e8   : > { %6044 = vmatmul.msk.f32.vlgmr.msra.gmra.mxu2 %vm2233_vm1, %v8421_v4 }
 0x8e9   : > { %5891 = vmatmul.msk.f32.vlgmr.msrb.gmra.mxu3 %vm2233_vm1, %v8421_v4  ;;  %v3475_v44 = vpop.f32.mrf.mxu1 }
 0x8ea   : > { %5909 = vmatpush.xpose.msk.msra.mxu3 %vm2233_vm1, %v3914_v52  ;;  %v3908_v52 = vmax.f32 %v3383_v41, 0.0  ;;  %v9063_v41 = vld [vmem:[#allocation82_spill] sm:$0xff] }
 0x8ed   : > { %v8560_v57 = vpop.f32.mrf.mxu3 }
 0x8ee   : > { %5910 = vmatpush.xpose.msk.msra.mxu3 %vm2233_vm1, %v3913_v39  ;;  %v3377_v39 = vadd.f32 %v8100_v60, %v9060_v28 }
 0x8f0   : > { %v3906_v12 = vmax.f32 %v3377_v39, 0.0 }
 0x8f2   : > { %5911 = vmatpush.xpose.msk.msra.mxu3 %vm2233_vm1, %v3912_v36  ;;  %v9061_v36 = vld [vmem:[#allocation84_spill] sm:$0xff] }
 0x8f3   : > { %v3374_v18 = vadd.f32 %v8100_v60, %v9061_v36 }
 0x8f5   : > { %v3905_v17 = vmax.f32 %v3374_v18, 0.0  ;;  %v8568_v1 = vpop.f32.mrf.mxu3 }
 0x8f6   : > { %5912 = vmatpush.xpose.msk.msra.mxu3 %vm2233_vm1, %v3911_v3  ;;  %v9062_v3 = vld [vmem:[#allocation83_spill] sm:$0xff] }
 0x8f7   : > { %v3371_v27 = vadd.f32 %v8100_v60, %v9062_v3  ;;  %v9066_v3 = vld [vmem:[#allocation79_spill] sm:$0xff] }
 0x8f9   : > { %v3904_v62 = vmax.f32 %v3371_v27, 0.0  ;;  %v3359_v27 = vadd.f32 %v8100_v60, %v9066_v3 }
 0x8fa   : > { %5913 = vmatpush.xpose.msk.msra.mxu3 %vm2233_vm1, %v3910_v31  ;;  %v3478_v31 = vpop.f32.mrf.mxu1 }
 0x8fe   : > { %5914 = vmatpush.xpose.msk.msra.mxu3 %vm2233_vm1, %v3909_v6  ;;  %v3368_v6 = vadd.f32 %v8100_v60, %v9063_v41  ;;  %v9067_v41 = vld [vmem:[#allocation78_spill] sm:$0xff] }
 0x900   : > { %v3903_v28 = vmax.f32 %v3368_v6, 0.0  ;;  %v3356_v6 = vadd.f32 %v8100_v60, %v9067_v41 }
 0x902   : > { %5915 = vmatpush.xpose.msk.msra.mxu3 %vm2233_vm1, %v3908_v52  ;;  %v3365_v52 = vadd.f32 %v8100_v60, %v9064_v14  ;;  %v3481_v39 = vpop.f32.mrf.mxu1 }
 0x904   : > { %v3902_v18 = vmax.f32 %v3365_v52, 0.0  ;;  %v3899_v52 = vmax.f32 %v3356_v6, 0.0 }
 0x906   : > { %5916 = vmatpush.xpose.msk.msra.mxu3 %vm2233_vm1, %v3907_v24  ;;  %v9065_v24 = vld [vmem:[#allocation80_spill] sm:$0xff] }
 0x907   : > { %v3362_v36 = vadd.f32 %v8100_v60, %v9065_v24 }
 0x90a   : > { %5917 = vmatpush.xpose.msk.msra.mxu3 %vm2233_vm1, %v3906_v12  ;;  %v8579_v12 = vpop.f32.mrf.mxu3  ;;  %v3484_v14 = vpop.f32.mrf.mxu1 }
 0x90b   : > { %v3485_v6 = vadd.f32 %v8100_v60, %v3484_v14 }
 0x90e   : > { %5918 = vmatpush.xpose.msk.msra.mxu3 %vm2233_vm1, %v3905_v17  ;;  %v3901_v17 = vmax.f32 %v3362_v36, 0.0  ;;  %v3491_v36 = vadd.f32 %v8100_v60, %v7954_v50  ;;  %v3482_v50 = vadd.f32 %v8100_v60, %v3481_v39  ;;  %v3473_v39 = vadd.f32 %v8100_v60, %v8547_v26 }
 0x912   : > { %5919 = vmatpush.xpose.msk.msra.mxu3 %vm2233_vm1, %v3904_v62  ;;  %v3900_v62 = vmax.f32 %v3359_v27, 0.0  ;;  %v8589_v24 = vpop.f32.mrf.mxu3 }
 0x916   : > { %5920 = vmatpush.xpose.msk.msra.mxu3 %vm2233_vm1, %v3903_v28  ;;  %v3497_v28 = vadd.f32 %v8100_v60, %v7964_v40  ;;  %v3487_v40 = vpop.f32.mrf.mxu1 }
 0x917   : > { %v3488_v41 = vadd.f32 %v8100_v60, %v3487_v40 }
 0x918   : > { %v3946_v3 = vmax.f32 %v3497_v28, 0.0  ;;  %v3942_v28 = vmax.f32 %v3485_v6, 0.0 }
 0x91a   : > { %5921 = vmatpush.xpose.msk.msra.mxu3 %vm2233_vm1, %v3902_v18  ;;  %v3494_v18 = vadd.f32 %v8100_v60, %v7959_v32  ;;  %v3944_v32 = vmax.f32 %v3491_v36, 0.0  ;;  %v3476_v36 = vadd.f32 %v8100_v60, %v3475_v44  ;;  %v3938_v44 = vmax.f32 %v3473_v39, 0.0 }
 0x91c   : > { %v3945_v27 = vmax.f32 %v3494_v18, 0.0  ;;  %v3479_v18 = vadd.f32 %v8100_v60, %v3478_v31  ;;  %v3939_v40 = vmax.f32 %v3476_v36, 0.0  ;;  %v8623_v31 = vld [vmem:[%s8887_s1 + $0x98] ss:$0 sm:$0xff] }
 0x91d   : > { %v3464_v60 = vadd.f32 %v8623_v31, %v8499_v51  ;;  %v3455_v51 = vadd.f32 %v8623_v31, %v8449_v8 }
 0x91e   : > { %5922 = vmatpush.xpose.msk.msra.mxu3 %vm2233_vm1, %v3901_v17  ;;  %v8601_v17 = vpop.f32.mrf.mxu3 }
 0x91f   : > { %v3932_v36 = vmax.f32 %v3455_v51, 0.0 }
 0x922   : > { %5923 = vmatpush.xpose.msk.msra.mxu3 %vm2233_vm1, %v3900_v62  ;;  %v3943_v62 = vmax.f32 %v3488_v41, 0.0  ;;  %v3470_v41 = vadd.f32 %v8623_v31, %v8534_v13  ;;  %v3461_v13 = vadd.f32 %v8623_v31, %v8483_v61  ;;  %v3452_v61 = vadd.f32 %v8623_v31, %v8432_v20 }
 0x923   : > { %v3587_v20 = vadd.f32 %v8623_v31, %v8150_v55  ;;  %v3578_v55 = vadd.f32 %v8623_v31, %v8135_v19  ;;  %v3569_v19 = vadd.f32 %v8623_v31, %v8119_v30  ;;  %v3560_v30 = vadd.f32 %v8623_v31, %v8083_v58 }
 0x924   : > { %v3937_v6 = vmax.f32 %v3470_v41, 0.0  ;;  %v3551_v58 = vadd.f32 %v8623_v31, %v8052_v10 }
 0x925   : > { %v3970_v51 = vmax.f32 %v3569_v19, 0.0 }
 0x926   : > { %5924 = vmatpush.xpose.msk.msra.mxu3 %vm2233_vm1, %v3899_v52  ;;  %v8608_v52 = vpop.f32.mrf.mxu3 }
 0x929   : > { %5925 = vmatmul.msk.f32.vlgmr.msra.gmra.mxu3 %vm2233_vm1, %v8421_v4 }
 0x92a   : > { %5943 = vmatpush.xpose.msk.msrb.mxu3 %vm2233_vm1, %v3946_v3  ;;  %v3941_v3 = vmax.f32 %v3482_v50, 0.0  ;;  %v3935_v50 = vmax.f32 %v3464_v60, 0.0 }
 0x92e   : > { %5944 = vmatpush.xpose.msk.msrb.mxu3 %vm2233_vm1, %v3945_v27  ;;  %v3940_v27 = vmax.f32 %v3479_v18, 0.0  ;;  %v8615_v14 = vpop.f32.mrf.mxu3  ;;  %v3934_v18 = vmax.f32 %v3461_v13, 0.0  ;;  %v3973_v13 = vmax.f32 %v3578_v55, 0.0  ;;  %v3686_v55 = vadd.f32 %v8623_v31, %v8352_v37 }
 0x92f   : > { %v3680_v37 = vadd.f32 %v8623_v31, %v8344_v34 }
 0x932   : > { %5945 = vmatpush.xpose.msk.msrb.mxu3 %vm2233_vm1, %v3944_v32  ;;  %v3467_v32 = vadd.f32 %v8623_v31, %v8519_v48  ;;  %v3458_v48 = vadd.f32 %v8623_v31, %v8465_v47  ;;  %v3931_v47 = vmax.f32 %v3452_v61, 0.0 }
 0x934   : > { %v3936_v26 = vmax.f32 %v3467_v32, 0.0  ;;  %v3581_v32 = vadd.f32 %v8623_v31, %v8140_v38  ;;  %v3572_v38 = vadd.f32 %v8623_v31, %v8125_v46  ;;  %v3563_v46 = vadd.f32 %v8623_v31, %v8094_v21 }
 0x935   : > { %v3554_v21 = vadd.f32 %v8623_v31, %v8061_v16 }
 0x936   : > { %5946 = vmatpush.xpose.msk.msrb.mxu3 %vm2233_vm1, %v3943_v62  ;;  %v8630_v62 = vpop.f32.mrf.mxu3  ;;  %v3974_v60 = vmax.f32 %v3581_v32, 0.0  ;;  %v3689_v32 = vadd.f32 %v8623_v31, %v8356_v54  ;;  %v8720_v54 = vpop.permute.xlu0 %4047 }
 0x93a   : > { %5947 = vmatpush.xpose.msk.msrb.mxu3 %vm2233_vm1, %v3942_v28 }
 0x93e   : > { %5948 = vmatpush.xpose.msk.msrb.mxu3 %vm2233_vm1, %v3941_v3  ;;  %v8639_v28 = vpop.f32.mrf.mxu3  ;;  %v3933_v3 = vmax.f32 %v3458_v48, 0.0 }
 0x942   : > { %5949 = vmatpush.xpose.msk.msrb.mxu3 %vm2233_vm1, %v3940_v27  ;;  %v3593_v27 = vadd.f32 %v8623_v31, %v8160_v35 }
 0x944   : > { %v3978_v41 = vmax.f32 %v3593_v27, 0.0  ;;  %v4838_v27 = vpop.f32.mrf.mxu2 }
 0x946   : > { %5950 = vmatpush.xpose.msk.msrb.mxu3 %vm2233_vm1, %v3939_v40  ;;  %v8651_v39 = vpop.f32.mrf.mxu3  ;;  %v3590_v40 = vadd.f32 %v8623_v31, %v8155_v5  ;;  %v3976_v5 = vmax.f32 %v3587_v20, 0.0 }
 0x948   : > { %v3977_v8 = vmax.f32 %v3590_v40, 0.0 }
 0x94a   : > { %5951 = vmatpush.xpose.msk.msrb.mxu3 %vm2233_vm1, %v3938_v44  ;;  %v3584_v44 = vadd.f32 %v8623_v31, %v8145_v23  ;;  %v3575_v23 = vadd.f32 %v8623_v31, %v8130_v59  ;;  %v3566_v59 = vadd.f32 %v8623_v31, %v8110_v22  ;;  %v3557_v22 = vadd.f32 %v8623_v31, %v8072_v25 }
 0x94b   : > { %v3548_v25 = vadd.f32 %v8623_v31, %v8043_v11  ;;  %v3683_v11 = vadd.f32 %v8623_v31, %v8348_v33  ;;  %v3677_v33 = vadd.f32 %v8623_v31, %v8340_v63 }
 0x94c   : > { %v4878_v20 = vpop.f32.mrf.mxu2 }
 0x94e   : > { %5952 = vmatpush.xpose.msk.msrb.mxu3 %vm2233_vm1, %v3937_v6  ;;  %v8662_v35 = vpop.f32.mrf.mxu3  ;;  %v3975_v6 = vmax.f32 %v3584_v44, 0.0  ;;  %v3964_v44 = vmax.f32 %v3551_v58, 0.0  ;;  %v4839_v58 = vadd.f32 %v4838_v27, %v8720_v54 }
 0x952   : > { %5953 = vmatpush.xpose.msk.msrb.mxu3 %vm2233_vm1, %v3936_v26 }
 0x954   : > { %v4918_v16 = vpop.f32.mrf.mxu2 }
 0x956   : > { %5954 = vmatpush.xpose.msk.msrb.mxu3 %vm2233_vm1, %v3935_v50  ;;  %v8673_v26 = vpop.f32.mrf.mxu3  ;;  %v3972_v50 = vmax.f32 %v3575_v23, 0.0  ;;  %v4009_v23 = vmax.f32 %v3686_v55, 0.0 }
 0x95a   : > { %5955 = vmatpush.xpose.msk.msrb.mxu3 %vm2233_vm1, %v3934_v18  ;;  %v3971_v18 = vmax.f32 %v3572_v38, 0.0  ;;  %v4008_v38 = vmax.f32 %v3683_v11, 0.0  ;;  %v3665_v11 = vadd.f32 %v8623_v31, %v8310_v45  ;;  %v3653_v45 = vadd.f32 %v8623_v31, %v8268_v49 }
 0x95e   : > { %5956 = vmatpush.xpose.msk.msrb.mxu3 %vm2233_vm1, %v3933_v3  ;;  %v8681_v48 = vpop.f32.mrf.mxu3  ;;  %v3969_v3 = vmax.f32 %v3566_v59, 0.0  ;;  %v4919_v59 = vadd.f32 %v4918_v16, %v8720_v54  ;;  %v3671_v16 = vadd.f32 %v8623_v31, %v8325_v43  ;;  %v3662_v43 = vadd.f32 %v8623_v31, %v8301_v15 }
 0x95f   : > { %v3650_v15 = vadd.f32 %v8623_v31, %v8257_v56  ;;  %v3782_v56 = vadd.f32 %v8623_v31, %v8681_v48  ;;  %v3773_v48 = vadd.f32 %v8623_v31, %v8651_v39  ;;  %v3761_v39 = vadd.f32 %v8623_v31, %v8608_v52 }
 0x960   : > { %v3749_v52 = vadd.f32 %v8623_v31, %v8568_v1 }
 0x962   : > { %5957 = vmatpush.xpose.msk.msrb.mxu3 %vm2233_vm1, %v3932_v36  ;;  %v3968_v36 = vmax.f32 %v3563_v46, 0.0 }
 0x966   : > { %5958 = vmatpush.xpose.msk.msrb.mxu3 %vm2233_vm1, %v3931_v47  ;;  %v8692_v61 = vpop.f32.mrf.mxu3  ;;  %v3967_v47 = vmax.f32 %v3560_v30, 0.0 }
 0x967   : > { %v3785_v49 = vadd.f32 %v8623_v31, %v8692_v61  ;;  %v3776_v61 = vadd.f32 %v8623_v31, %v8662_v35  ;;  %v3764_v35 = vadd.f32 %v8623_v31, %v8615_v14  ;;  %v3752_v14 = vadd.f32 %v8623_v31, %v8579_v12 }
 0x968   : > { %v3740_v12 = vadd.f32 %v8623_v31, %v8539_v42 }
 0x969   : > { %5959 = vmatmul.msk.f32.vlgmr.msrb.gmra.mxu3 %vm2233_vm1, %v8421_v4 }
 0x96a   : > { %5977 = vmatpush.xpose.msk.msra.mxu3 %vm2233_vm1, %v3978_v41  ;;  %v3966_v41 = vmax.f32 %v3557_v22, 0.0  ;;  %v4006_v22 = vmax.f32 %v3677_v33, 0.0  ;;  %v3998_v33 = vmax.f32 %v3653_v45, 0.0  ;;  %v4027_v1 = vmax.f32 %v3740_v12, 0.0 }
 0x96e   : > { %5978 = vmatpush.xpose.msk.msra.mxu3 %vm2233_vm1, %v3977_v8  ;;  %v4858_v40 = vpop.f32.mrf.mxu3  ;;  %v3965_v8 = vmax.f32 %v3554_v21, 0.0 }
 0x972   : > { %5979 = vmatpush.xpose.msk.msra.mxu3 %vm2233_vm1, %v3976_v5 }
 0x976   : > { %5980 = vmatpush.xpose.msk.msra.mxu3 %vm2233_vm1, %v3975_v6  ;;  %v4898_v5 = vpop.f32.mrf.mxu3  ;;  %v3963_v6 = vmax.f32 %v3548_v25, 0.0 }
 0x977   : > { %v4899_v19 = vadd.f32 %v4898_v5, %v8720_v54 }
 0x979   : > { %v5159_v30 = vrot.slane %v4899_v19, 5 }
 0x97a   : > { %5981 = vmatpush.xpose.msk.msra.mxu3 %vm2233_vm1, %v3974_v60  ;;  %v4010_v60 = vmax.f32 %v3689_v32, 0.0 }
 0x97e   : > { %5982 = vmatpush.xpose.msk.msra.mxu3 %vm2233_vm1, %v3973_v13  ;;  %v4938_v10 = vpop.f32.mrf.mxu3  ;;  %v4958_v13 = vpop.f32.mrf.mxu2 }
 0x97f   : > { %v4959_v46 = vadd.f32 %v4958_v13, %v8720_v54  ;;  %v4002_v13 = vmax.f32 %v3665_v11, 0.0 }
 0x982   : > { %5983 = vmatpush.xpose.msk.msra.mxu3 %vm2233_vm1, %v3972_v50  ;;  %v4879_v50 = vadd.f32 %v4878_v20, %v8720_v54 }
 0x984   : > { %v5158_v34 = vrot.slane %v4879_v50, 6 }
 0x986   : > { %5984 = vmatpush.xpose.msk.msra.mxu3 %vm2233_vm1, %v3971_v18  ;;  %v4859_v18 = vadd.f32 %v4858_v40, %v8720_v54  ;;  %v5160_v40 = vrot.slane %v4919_v59, 4 }
 0x988   : > { %v5157_v63 = vrot.slane %v4859_v18, 7  ;;  %v3997_v18 = vmax.f32 %v3650_v15, 0.0 }
 0x98a   : > { %5985 = vmatpush.xpose.msk.msra.mxu3 %vm2233_vm1, %v3970_v51  ;;  %v4939_v51 = vadd.f32 %v4938_v10, %v8720_v54  ;;  %v5172_v25 = vsel %vm5171_vm3, %v4839_v58, %v5157_v63  ;;  %v4004_v10 = vmax.f32 %v3671_v16, 0.0  ;;  %v3767_v63 = vadd.f32 %v8623_v31, %v8630_v62 }
 0x98b   : > { %v3755_v62 = vadd.f32 %v8623_v31, %v8589_v24  ;;  %v3743_v24 = vadd.f32 %v8623_v31, %v8549_v29 }
 0x98c   : > { %v5161_v21 = vrot.slane %v4939_v51, 3 }
 0x98d   : > { %v4032_v58 = vmax.f32 %v3755_v62, 0.0 }
 0x98e   : > { %5986 = vmatpush.xpose.msk.msra.mxu3 %vm2233_vm1, %v3969_v3  ;;  %v4007_v3 = vmax.f32 %v3680_v37, 0.0  ;;  %v3659_v37 = vadd.f32 %v8623_v31, %v8290_v2  ;;  %v3647_v2 = vadd.f32 %v8623_v31, %v8248_v53  ;;  %v3779_v53 = vadd.f32 %v8623_v31, %v8673_v26 }
 0x98f   : > { %v3770_v26 = vadd.f32 %v8623_v31, %v8639_v28  ;;  %v3758_v28 = vadd.f32 %v8623_v31, %v8601_v17  ;;  %v3746_v17 = vadd.f32 %v8623_v31, %v8560_v57  ;;  %v4998_v57 = vpop.f32.mrf.mxu2 }
 0x990   : > { %v4000_v50 = vmax.f32 %v3659_v37, 0.0  ;;  %v3996_v51 = vmax.f32 %v3647_v2, 0.0 }
 0x992   : > { %5987 = vmatpush.xpose.msk.msra.mxu3 %vm2233_vm1, %v3968_v36  ;;  %v3674_v36 = vadd.f32 %v8623_v31, %v8330_v9  ;;  %v5174_v9 = vsel %vm5173_vm2, %v5158_v34, %v5159_v30  ;;  %v4041_v34 = vmax.f32 %v3782_v56, 0.0  ;;  %v4040_v30 = vmax.f32 %v3779_v53, 0.0 }
 0x993   : > { %v5176_v27 = vsel %vm5175_vm6, %v5172_v25, %v5174_v9  ;;  %v4031_v9 = vmax.f32 %v3752_v14, 0.0  ;;  %v4029_v25 = vmax.f32 %v3746_v17, 0.0 }
 0x996   : > { %5988 = vmatpush.xpose.msk.msra.mxu3 %vm2233_vm1, %v3967_v47 }
 0x99a   : > { %5989 = vmatpush.xpose.msk.msra.mxu3 %vm2233_vm1, %v3966_v41  ;;  %v5162_v41 = vrot.slane %v4959_v46, 2 }
 0x99e   : > { %5990 = vmatpush.xpose.msk.msra.mxu3 %vm2233_vm1, %v3965_v8 }
 0x9a2   : > { %5991 = vmatpush.xpose.msk.msra.mxu3 %vm2233_vm1, %v3964_v44  ;;  %v5178_v44 = vsel %vm5177_vm4, %v5160_v40, %v5161_v21  ;;  %v4036_v40 = vmax.f32 %v3767_v63, 0.0  ;;  %v4035_v21 = vmax.f32 %v3764_v35, 0.0 }
 0x9a6   : > { %5992 = vmatpush.xpose.msk.msra.mxu3 %vm2233_vm1, %v3963_v6  ;;  %v4005_v6 = vmax.f32 %v3674_v36, 0.0  ;;  %v4039_v36 = vmax.f32 %v3776_v61, 0.0 }
 0x9a9   : > { %5993 = vmatmul.msk.f32.vlgmr.msra.gmra.mxu3 %vm2233_vm1, %v8421_v4 }
 0x9aa   : > { %6011 = vmatpush.xpose.msk.msrb.mxu3 %vm2233_vm1, %v4010_v60  ;;  %v3668_v60 = vadd.f32 %v8623_v31, %v8318_v7  ;;  %v3656_v7 = vadd.f32 %v8623_v31, %v8279_v0  ;;  %v9068_v0 = vld [vmem:[#allocation5_spill] sm:$0xff] }
 0x9ab   : > { %v3644_v59 = vadd.f32 %v8623_v31, %v9068_v0 }
 0x9ac   : > { %v4978_v47 = vpop.f32.mrf.mxu3  ;;  %v3999_v19 = vmax.f32 %v3656_v7, 0.0 }
 0x9ad   : > { %v4979_v20 = vadd.f32 %v4978_v47, %v8720_v54  ;;  %v3995_v46 = vmax.f32 %v3644_v59, 0.0  ;;  %v4037_v47 = vmax.f32 %v3770_v26, 0.0 }
 0x9ae   : > { %6012 = vmatpush.xpose.msk.msrb.mxu3 %vm2233_vm1, %v4009_v23  ;;  %v4003_v23 = vmax.f32 %v3668_v60, 0.0 }
 0x9af   : > { %v5163_v8 = vrot.slane %v4979_v20, 1  ;;  %v4033_v20 = vmax.f32 %v3758_v28, 0.0 }
 0x9b1   : > { %v5180_v5 = vsel %vm5179_vm5, %v5162_v41, %v5163_v8  ;;  %v4034_v41 = vmax.f32 %v3761_v39, 0.0  ;;  %v4030_v8 = vmax.f32 %v3749_v52, 0.0 }
 0x9b2   : > { %6013 = vmatpush.xpose.msk.msrb.mxu3 %vm2233_vm1, %v4008_v38  ;;  %v5182_v32 = vsel %vm5181_vm7, %v5178_v44, %v5180_v5  ;;  %v4001_v38 = vmax.f32 %v3662_v43, 0.0  ;;  %v4028_v44 = vmax.f32 %v3743_v24, 0.0  ;;  %v4999_v43 = vadd.f32 %v4998_v57, %v8720_v54 }
 0x9b3   : > { %v5184_v55 = vsel %vm5183_vm8, %v5176_v27, %v5182_v32  ;;  %v5038_v27 = vpop.f32.mrf.mxu2 }
 0x9b4   : > { %5194 = vst [vmem:[%s8752_s8] sm:$0xff] %v5184_v55  ;;  %v5039_v55 = vadd.f32 %v5038_v27, %v8720_v54 }
 0x9b6   : > { %6014 = vmatpush.xpose.msk.msrb.mxu3 %vm2233_vm1, %v4007_v3  ;;  %v4042_v3 = vmax.f32 %v3785_v49, 0.0  ;;  %v5165_v11 = vrot.slane %v5039_v55, 6 }
 0x9ba   : > { %6015 = vmatpush.xpose.msk.msrb.mxu3 %vm2233_vm1, %v4006_v22  ;;  %v4038_v22 = vmax.f32 %v3773_v48, 0.0 }
 0x9bb   : > { %v5078_v32 = vpop.f32.mrf.mxu2 }
 0x9bc   : > { %v5079_v60 = vadd.f32 %v5078_v32, %v8720_v54 }
 0x9be   : > { %6016 = vmatpush.xpose.msk.msrb.mxu3 %vm2233_vm1, %v4005_v6 }
 0x9c2   : > { %6017 = vmatpush.xpose.msk.msrb.mxu3 %vm2233_vm1, %v4004_v10 }
 0x9c3   : > { %v5118_v6 = vpop.f32.mrf.mxu2 }
 0x9c6   : > { %6018 = vmatpush.xpose.msk.msrb.mxu3 %vm2233_vm1, %v4003_v23 }
 0x9ca   : > { %6019 = vmatpush.xpose.msk.msrb.mxu3 %vm2233_vm1, %v4002_v13 }
 0x9ce   : > { %6020 = vmatpush.xpose.msk.msrb.mxu3 %vm2233_vm1, %v4001_v38  ;;  %v5167_v38 = vrot.slane %v5079_v60, 4 }
 0x9d2   : > { %6021 = vmatpush.xpose.msk.msrb.mxu3 %vm2233_vm1, %v4000_v50 }
 0x9d6   : > { %6022 = vmatpush.xpose.msk.msrb.mxu3 %vm2233_vm1, %v3999_v19 }
 0x9da   : > { %6023 = vmatpush.xpose.msk.msrb.mxu3 %vm2233_vm1, %v3998_v33 }
 0x9de   : > { %6024 = vmatpush.xpose.msk.msrb.mxu3 %vm2233_vm1, %v3997_v18 }
 0x9e2   : > { %6025 = vmatpush.xpose.msk.msrb.mxu3 %vm2233_vm1, %v3996_v51 }
 0x9e6   : > { %6026 = vmatpush.xpose.msk.msrb.mxu3 %vm2233_vm1, %v3995_v46 }
 0x9e9   : > { %6027 = vmatmul.msk.f32.vlgmr.msrb.gmra.mxu3 %vm2233_vm1, %v8421_v4 }
 0x9ea   : > { %6045 = vmatpush.xpose.msk.msra.mxu3 %vm2233_vm1, %v4042_v3 }
 0x9ec   : > { %v5018_v5 = vpop.f32.mrf.mxu3 }
 0x9ed   : > { %v5019_v31 = vadd.f32 %v5018_v5, %v8720_v54 }
 0x9ee   : > { %6046 = vmatpush.xpose.msk.msra.mxu3 %vm2233_vm1, %v4041_v34 }
 0x9ef   : > { %v5164_v13 = vrot.slane %v5019_v31, 7 }
 0x9f1   : > { %v5185_v33 = vsel %vm5171_vm3, %v4999_v43, %v5164_v13 }
 0x9f2   : > { %6047 = vmatpush.xpose.msk.msra.mxu3 %vm2233_vm1, %v4040_v30 }
 0x9f6   : > { %6048 = vmatpush.xpose.msk.msra.mxu3 %vm2233_vm1, %v4039_v36 }
 0x9fa   : > { %6049 = vmatpush.xpose.msk.msra.mxu3 %vm2233_vm1, %v4038_v22 }
 0x9fe   : > { %6050 = vmatpush.xpose.msk.msra.mxu3 %vm2233_vm1, %v4037_v47 }
 0xa02   : > { %6051 = vmatpush.xpose.msk.msra.mxu3 %vm2233_vm1, %v4036_v40 }
 0xa06   : > { %6052 = vmatpush.xpose.msk.msra.mxu3 %vm2233_vm1, %v4035_v21 }
 0xa0a   : > { %6053 = vmatpush.xpose.msk.msra.mxu3 %vm2233_vm1, %v4034_v41 }
 0xa0e   : > { %6054 = vmatpush.xpose.msk.msra.mxu3 %vm2233_vm1, %v4033_v20 }
 0xa12   : > { %6055 = vmatpush.xpose.msk.msra.mxu3 %vm2233_vm1, %v4032_v58 }
 0xa16   : > { %6056 = vmatpush.xpose.msk.msra.mxu3 %vm2233_vm1, %v4031_v9 }
 0xa1a   : > { %6057 = vmatpush.xpose.msk.msra.mxu3 %vm2233_vm1, %v4030_v8 }
 0xa1e   : > { %6058 = vmatpush.xpose.msk.msra.mxu3 %vm2233_vm1, %v4029_v25 }
 0xa22   : > { %6059 = vmatpush.xpose.msk.msra.mxu3 %vm2233_vm1, %v4028_v44 }
 0xa26   : > { %6060 = vmatpush.xpose.msk.msra.mxu3 %vm2233_vm1, %v4027_v1 }
 0xa29   : > { %6061 = vmatmul.msk.f32.vlgmr.msra.gmra.mxu3 %vm2233_vm1, %v8421_v4  ;;  %v5119_v4 = vadd.f32 %v5118_v6, %v8720_v54 }
 0xa2b   : > { %v5169_v50 = vrot.slane %v5119_v4, 2 }
 0xa2c   : > { %v5058_v29 = vpop.f32.mrf.mxu3 }
 0xa2d   : > { %v5059_v42 = vadd.f32 %v5058_v29, %v8720_v54 }
 0xa2f   : > { %v5166_v23 = vrot.slane %v5059_v42, 5 }
 0xa31   : > { %v5186_v19 = vsel %vm5173_vm2, %v5165_v11, %v5166_v23 }
 0xa32   : > { %v5187_v0 = vsel %vm5175_vm6, %v5185_v33, %v5186_v19 }
 0xa6c   : > { %v5098_v16 = vpop.f32.mrf.mxu3 }
 0xa6d   : > { %v5099_v10 = vadd.f32 %v5098_v16, %v8720_v54 }
 0xa6f   : > { %v5168_v7 = vrot.slane %v5099_v10, 3 }
 0xa71   : > { %v5188_v2 = vsel %vm5177_vm4, %v5167_v38, %v5168_v7 }
 0xaac   : > { %v5138_v37 = vpop.f32.mrf.mxu3 }
 0xaad   : > { %v5139_v45 = vadd.f32 %v5138_v37, %v8720_v54 }
 0xaaf   : > { %v5170_v15 = vrot.slane %v5139_v45, 1 }
 0xab1   : > { %v5189_v18 = vsel %vm5179_vm5, %v5169_v50, %v5170_v15 }
 0xab2   : > { %v5190_v59 = vsel %vm5181_vm7, %v5188_v2, %v5189_v18 }
 0xab3   : > { %v5191_v54 = vsel %vm5183_vm8, %v5187_v0, %v5190_v59 }
 0xab4   : > { %5195 = vst [vmem:[%s8752_s8 + $0x8] sm:$0xff] %v5191_v54 }
 0xab5   : > { %6164 = shalt.err (!%p6161_p3)
}
 0xab6   : > { %6084 = dma.vmem_to_hbm [thread:$0]  (%p6255_p5), %s5210_s13, 256, %s5212_s21, %s5197_s22  }
 0xab7 PF: > { %p6090_p4 = scmp.ge.s32.totalorder %s6199_s12, 2  ;;  %s5223_s3 = sand.u32 1, %s6187_s9  }
 0xab8   : > { %s5224_s4 = scalar_lea.sflag [#allocation3], %s5223_s3 }
 0xab9   : > { %p6087_p7 = pnand %p6090_p4, %p6259_p6 }
 0xabb   : > { %p6088_p8 = pneg %p6087_p7 }
 0xabd   : > { %6182 = dma.done.wait (%p6088_p8), %s5224_s4, 256  }
 0xabe   : > { %6184 = vsyncadd (%p6088_p8), %s5224_s4, 4294967040  ;;  %p12_p9 = scmp.ge.s32.totalorder %s6242_s15, 4   ;;  %s9069_s9 = smov %s6191_s10 }
 0xabf   : > { %s9070_s10 = smov %s6195_s11  ;;  %s9071_s11 = smov %s6253_s18 }
 0xac0   : > { %s9072_s12 = smov %s6242_s15  ;;  %14 = sbr.rel (!%p12_p9) target bundleno = 3 (0x3), region = 63 }
 0xac5   :  { %5230 = vsyncpa [#allocation3], 1 }
 0xac6   :  { %5232 = vsyncpa [#allocation3 + $0x1], 1 }

</bundles_post_ra>
